<compile_context>
chip_gen: v5e
topology: v5e:2x2
jax: 0.10.0
libtpu: 0.0.40
codegen_flags: <defaults>
</compile_context>

<pallas_src>
import functools

import jax
import jax.numpy as jnp
from jax.experimental import pallas as pl
from jax.experimental.pallas import tpu as pltpu


LANE = 128            # channel padding unit (vreg lane width)
SUB = 16              # row padding unit (bf16 sublane packing)
BN_EPS = 1e-5


# ----------------------------- small helpers ---------------------------------

def _round_up(x, m):
    return (x + m - 1) // m * m


def _pad2d(x, rp, cp):
    r, c = x.shape
    return jnp.pad(x, ((0, rp - r), (0, cp - c)))


def _pick_tile(total, cap, unit=LANE):
    """Largest multiple of `unit` that divides `total` and is <= cap."""
    assert total % unit == 0
    d = total // unit
    best = unit
    for m in range(1, d + 1):
        if d % m == 0 and unit * m <= cap:
            best = unit * m
    return best


# --------------------- fused conv matmul (BN / residual / ReLU) --------------

def _fused_matmul_kernel(*refs, relu, has_residual):
    """A @ B accumulated over the K grid axis; epilogue: *scale + shift
    (+ residual) (+ ReLU) applied on the last K step, stored as bf16."""
    if has_residual:
        a_ref, b_ref, s_ref, t_ref, r_ref, o_ref, acc_ref = refs
    else:
        a_ref, b_ref, s_ref, t_ref, o_ref, acc_ref = refs
        r_ref = None

    @pl.when(pl.program_id(2) == 0)
    def _init():
        acc_ref[...] = jnp.zeros_like(acc_ref)

    acc_ref[...] += jnp.dot(a_ref[...], b_ref[...],
                            preferred_element_type=jnp.float32)

    @pl.when(pl.program_id(2) == pl.num_programs(2) - 1)
    def _epilogue():
        y = acc_ref[...] * s_ref[...] + t_ref[...]          # folded BN (f32)
        if has_residual:
            y = y + r_ref[...].astype(jnp.float32)          # residual in f32
        if relu:
            y = jnp.maximum(y, 0.0)
        o_ref[...] = y.astype(o_ref.dtype)


def fused_conv_matmul(a, b, scale, shift, residual=None, relu=True,
                      tm_cap=256, tn_cap=256, tk_cap=512):
    """(M,K)@(Kp,Np) with fused BN(+residual)(+ReLU) epilogue.

    a        : (M, K)   activations / im2col patches (any float dtype)
    b        : (Kp, Np) bf16 weight, K already padded to a multiple of 128
    scale    : (1, Np)  f32 folded-BN scale   (zeros on padded channels)
    shift    : (1, Np)  f32 folded-BN shift   (zeros on padded channels)
    residual : (M, Np)  optional bf16 identity added before ReLU
    returns  : (M, Np)  bf16
    """
    M, K = a.shape
    Kp, Np = b.shape
    assert Kp >= K and Kp % LANE == 0 and Np % LANE == 0

    tm = min(tm_cap, _round_up(M, SUB))
    Mp = _round_up(M, tm)
    tn = _pick_tile(Np, tn_cap)
    tk = _pick_tile(Kp, tk_cap)

    a_p = _pad2d(a.astype(jnp.bfloat16), Mp, Kp)

    inputs = [a_p, b, scale, shift]
    in_specs = [pl.BlockSpec((tm, tk), lambda i, j, k: (i, k)),
                pl.BlockSpec((tk, tn), lambda i, j, k: (k, j)),
                pl.BlockSpec((1, tn), lambda i, j, k: (0, j)),
                pl.BlockSpec((1, tn), lambda i, j, k: (0, j))]
    if residual is not None:
        r_p = _pad2d(residual.astype(jnp.bfloat16), Mp, Np)
        inputs.append(r_p)
        in_specs.append(pl.BlockSpec((tm, tn), lambda i, j, k: (i, j)))

    out = pl.pallas_call(
        functools.partial(_fused_matmul_kernel, relu=relu,
                          has_residual=residual is not None),
        grid=(Mp // tm, Np // tn, Kp // tk),
        in_specs=in_specs,
        out_specs=pl.BlockSpec((tm, tn), lambda i, j, k: (i, j)),
        out_shape=jax.ShapeDtypeStruct((Mp, Np), jnp.bfloat16),
        scratch_shapes=[pltpu.VMEM((tm, tn), jnp.float32)],
        compiler_params=pltpu.CompilerParams(
            dimension_semantics=("parallel", "parallel", "arbitrary"),
            vmem_limit_bytes=32 * 1024 * 1024),
    )(*inputs)
    return out[:M]


# ----------------------------- max-pool kernel --------------------------------

def _max9_kernel(*refs):
    in_refs, o_ref = refs[:-1], refs[-1]
    acc = in_refs[0][...]
    for r in in_refs[1:]:
        acc = jnp.maximum(acc, r[...])
    o_ref[...] = acc


def maxpool3x3s2(x):
    """3x3 stride-2 pad-1 max-pool on channel-padded NHWC bf16 activations."""
    N, H, W, Cp = x.shape
    k, s, pad = 3, 2, 1
    xp = jnp.pad(x, ((0, 0), (pad, pad), (pad, pad), (0, 0)),
                 constant_values=-1e30)
    Ho = (H + 2 * pad - k) // s + 1
    Wo = (W + 2 * pad - k) // s + 1
    M = N * Ho * Wo

    views = [xp[:, i:i + s * Ho:s, j:j + s * Wo:s, :].reshape(M, Cp)
             for i in range(k) for j in range(k)]

    tm = min(512, _round_up(M, SUB))
    Mp = _round_up(M, tm)
    views = [jnp.pad(v, ((0, Mp - M), (0, 0))) for v in views]

    out = pl.pallas_call(
        _max9_kernel,
        grid=(Mp // tm,),
        in_specs=[pl.BlockSpec((tm, Cp), lambda i: (i, 0))] * 9,
        out_specs=pl.BlockSpec((tm, Cp), lambda i: (i, 0)),
        out_shape=jax.ShapeDtypeStruct((Mp, Cp), x.dtype),
        compiler_params=pltpu.CompilerParams(
            dimension_semantics=("parallel",),
            vmem_limit_bytes=32 * 1024 * 1024),
    )(*views)
    return out[:M].reshape(N, Ho, Wo, Cp)


# ------------------ fused GVB head (avgpool + fc + gvbg) ----------------------

def _gvb_head_kernel(x_ref, w_ref, b_ref, y_ref, br_ref, *,
                     inv_hw, ncls_p, apply_gvbg):
    # global average pool (f32), then one concatenated dot for [fc | gvbg]
    f = jnp.sum(x_ref[...].astype(jnp.float32), axis=1) * inv_hw   # (Nb, Cp)
    out = jnp.dot(f.astype(jnp.bfloat16), w_ref[...],
                  preferred_element_type=jnp.float32) + b_ref[...]
    logits = out[:, :ncls_p]
    bridge = out[:, ncls_p:]
    y_ref[...] = logits - bridge if apply_gvbg else logits
    br_ref[...] = bridge


def gvb_head(x, w, b, *, hw, ncls, apply_gvbg):
    """x: (N, HW, Cp) bf16; w: (Cp, 2*ncls_p) bf16; b: (1, 2*ncls_p) f32."""
    N, HW, Cp = x.shape
    ncls_p = w.shape[1] // 2
    Np = _round_up(N, SUB)
    HWp = _round_up(HW, SUB)
    x_p = jnp.pad(x, ((0, Np - N), (0, HWp - HW), (0, 0)))

    # The head is tiny (batch x Cp features); a single block suffices.
    y, br = pl.pallas_call(
        functools.partial(_gvb_head_kernel, inv_hw=1.0 / hw,
                          ncls_p=ncls_p, apply_gvbg=apply_gvbg),
        grid=(1,),
        in_specs=[pl.BlockSpec((Np, HWp, Cp), lambda i: (0, 0, 0)),
                  pl.BlockSpec(w.shape, lambda i: (0, 0)),
                  pl.BlockSpec(b.shape, lambda i: (0, 0))],
        out_specs=[pl.BlockSpec((Np, ncls_p), lambda i: (0, 0)),
                   pl.BlockSpec((Np, ncls_p), lambda i: (0, 0))],
        out_shape=[jax.ShapeDtypeStruct((Np, ncls_p), jnp.float32),
                   jax.ShapeDtypeStruct((Np, ncls_p), jnp.float32)],
        compiler_params=pltpu.CompilerParams(
            dimension_semantics=("arbitrary",),
            vmem_limit_bytes=32 * 1024 * 1024),
    )(x_p, w, b)
    return y[:N, :ncls], br[:N, :ncls]


# ------------------------- plain-JAX glue (layout only) -----------------------

def _im2col(x, kh, kw, stride, pad):
    """x: (N,H,W,C) -> (N,Ho,Wo,kh*kw*C) patches (strided-slice views + concat)."""
    N, H, W, C = x.shape
    xp = jnp.pad(x, ((0, 0), (pad, pad), (pad, pad), (0, 0))) if pad > 0 else x
    Ho = (H + 2 * pad - kh) // stride + 1
    Wo = (W + 2 * pad - kw) // stride + 1
    cols = [xp[:, i:i + stride * Ho:stride, j:j + stride * Wo:stride, :]
            for i in range(kh) for j in range(kw)]
    if len(cols) == 1:
        return cols[0], Ho, Wo
    return jnp.concatenate(cols, axis=-1), Ho, Wo


def conv_bn(x, cw, *, stride, pad, relu, residual=None):
    """Conv (im2col + fused Pallas matmul) with folded BN / residual / ReLU."""
    kh, kw = cw["kh"], cw["kw"]
    patches, Ho, Wo = _im2col(x, kh, kw, stride, pad)
    N = x.shape[0]
    M = N * Ho * Wo
    a = patches.reshape(M, patches.shape[-1])
    r = residual.reshape(M, residual.shape[-1]) if residual is not None else None
    out = fused_conv_matmul(a, cw["w"], cw["scale"], cw["shift"],
                            residual=r, relu=relu)
    return out.reshape(N, Ho, Wo, cw["w"].shape[1])


def basic_block(x, blk, stride):
    out = conv_bn(x, blk["conv1"], stride=stride, pad=1, relu=True)
    if "down" in blk:
        identity = conv_bn(x, blk["down"], stride=stride, pad=0, relu=False)
    else:
        identity = x
    # conv2 + bn2 + residual add + ReLU fused in one kernel
    out = conv_bn(out, blk["conv2"], stride=1, pad=1, relu=True,
                  residual=identity)
    return out


# ----------------------- parameter preparation (fold / pad) -------------------

def _fold_bn(bn):
    scale = bn["gamma"] * jax.lax.rsqrt(bn["var"] + BN_EPS)
    shift = bn["beta"] - bn["mean"] * scale
    return scale, shift


def _prep_conv(w, bn, cin_pad):
    """(kh,kw,cin,cout) conv + BN -> padded bf16 (Kp, Cp_out) weight + f32 scale/shift."""
    kh, kw, cin, cout = w.shape
    cp_out = _round_up(cout, LANE)
    if cin_pad is None:                       # stem conv on raw RGB input
        w2 = w.reshape(kh * kw * cin, cout)
        kp = _round_up(kh * kw * cin, LANE)
    else:                                     # channel-padded activations
        w2 = jnp.pad(w, ((0, 0), (0, 0), (0, cin_pad - cin), (0, 0)))
        w2 = w2.reshape(kh * kw * cin_pad, cout)
        kp = kh * kw * cin_pad
    w2 = _pad2d(w2, kp, cp_out).astype(jnp.bfloat16)
    scale, shift = _fold_bn(bn)
    scale = _pad2d(scale.reshape(1, cout).astype(jnp.float32), 1, cp_out)
    shift = _pad2d(shift.reshape(1, cout).astype(jnp.float32), 1, cp_out)
    return {"w": w2, "scale": scale, "shift": shift, "kh": kh, "kw": kw}


def prepare_params(params):
    prep = {"conv1": _prep_conv(params["conv1"], params["bn1"], cin_pad=None)}
    layers = []
    for stage in params["layers"]:
        pstage = []
        for blk in stage:
            cin = blk["conv1"].shape[2]
            width = blk["conv1"].shape[3]
            pblk = {"conv1": _prep_conv(blk["conv1"], blk["bn1"],
                                        cin_pad=_round_up(cin, LANE)),
                    "conv2": _prep_conv(blk["conv2"], blk["bn2"],
                                        cin_pad=_round_up(width, LANE))}
            if "downsample" in blk:
                pblk["down"] = _prep_conv(blk["downsample"]["conv"],
                                          blk["downsample"]["bn"],
                                          cin_pad=_round_up(cin, LANE))
            pstage.append(pblk)
        layers.append(pstage)
    prep["layers"] = layers

    feat, ncls = params["fc_w"].shape
    fp, cp = _round_up(feat, LANE), _round_up(ncls, LANE)
    wf = _pad2d(params["fc_w"].astype(jnp.float32), fp, cp)
    wg = _pad2d(params["gvbg_w"].astype(jnp.float32), fp, cp)
    prep["head_w"] = jnp.concatenate([wf, wg], axis=1).astype(jnp.bfloat16)
    bf = _pad2d(params["fc_b"].reshape(1, ncls).astype(jnp.float32), 1, cp)
    bg = _pad2d(params["gvbg_b"].reshape(1, ncls).astype(jnp.float32), 1, cp)
    prep["head_b"] = jnp.concatenate([bf, bg], axis=1)
    return prep


# --------------------------------- forward ------------------------------------

def gvb_resnet_forward(params, x_nchw, gvbg=True):
    prep = prepare_params(params)

    # NCHW (PyTorch) -> NHWC bf16 (kernel layout)
    x = jnp.transpose(x_nchw.astype(jnp.float32), (0, 2, 3, 1)).astype(jnp.bfloat16)

    # stem: conv1 7x7/s2 + bn1 + relu fused into one Pallas call
    x = conv_bn(x, prep["conv1"], stride=2, pad=3, relu=True)
    x = maxpool3x3s2(x)

    for si, stage in enumerate(prep["layers"]):
        for bi, blk in enumerate(stage):
            stride = 2 if (si > 0 and bi == 0) else 1
            x = basic_block(x, blk, stride)

    N, H, W, Cp = x.shape
    ncls = params["fc_w"].shape[1]
    # avgpool + view + fc/gvbg (y = fc - gvbg) fused into one Pallas call
    y, bridge = gvb_head(x.reshape(N, H * W, Cp), prep["head_w"], prep["head_b"],
                         hw=H * W, ncls=ncls, apply_gvbg=gvbg)
    return y, bridge


# ----------------------------- parameter init ---------------------------------

def _kaiming_uniform_conv(key, kh, kw, cin, cout):
    fan_in = kh * kw * cin
    bound = (6.0 / fan_in) ** 0.5
    return jax.random.uniform(key, (kh, kw, cin, cout), jnp.float32, -bound, bound)


def _bn_params(key, c):
    k1, k2, k3 = jax.random.split(key, 3)
    return {"gamma": 1.0 + 0.02 * jax.random.normal(k1, (c,), jnp.float32),
            "beta": 0.02 * jax.random.normal(k2, (c,), jnp.float32),
            "mean": 0.1 * jax.random.normal(k3, (c,), jnp.float32),
            "var": jnp.ones((c,), jnp.float32)}


def init_params(key, class_num=10, widths=(8, 16, 32, 64), blocks=(2, 2, 2, 2)):
    keys = iter(jax.random.split(key, 96))
    params = {"conv1": _kaiming_uniform_conv(next(keys), 7, 7, 3, widths[0]),
              "bn1": _bn_params(next(keys), widths[0])}
    layers = []
    cin = widths[0]
    for si, (w, nb) in enumerate(zip(widths, blocks)):
        stage = []
        for bi in range(nb):
            stride = 2 if (si > 0 and bi == 0) else 1
            blk = {"conv1": _kaiming_uniform_conv(next(keys), 3, 3, cin, w),
                   "bn1": _bn_params(next(keys), w),
                   "conv2": _kaiming_uniform_conv(next(keys), 3, 3, w, w),
                   "bn2": _bn_params(next(keys), w)}
            if stride != 1 or cin != w:
                blk["downsample"] = {"conv": _kaiming_uniform_conv(next(keys), 1, 1, cin, w),
                                     "bn": _bn_params(next(keys), w)}
            stage.append(blk)
            cin = w
        layers.append(stage)
    params["layers"] = layers
    feat = widths[-1]
    # nn.init.kaiming_normal_ on Linear: std = sqrt(2 / fan_in); bias = 0
    params["fc_w"] = jax.random.normal(next(keys), (feat, class_num), jnp.float32) * (2.0 / feat) ** 0.5
    params["fc_b"] = jnp.zeros((class_num,), jnp.float32)
    params["gvbg_w"] = jax.random.normal(next(keys), (feat, class_num), jnp.float32) * (2.0 / feat) ** 0.5
    params["gvbg_b"] = jnp.zeros((class_num,), jnp.float32)
    return params


# ----------------------------------- main --------------------------------------

if __name__ == "__main__":
    key = jax.random.PRNGKey(0)
    pkey, xkey = jax.random.split(key)

    class_num = 10
    params = init_params(pkey, class_num=class_num)

    # PyTorch-style NCHW input.
    x = jax.random.normal(xkey, (2, 3, 32, 32), jnp.float32)

    fwd = jax.jit(functools.partial(gvb_resnet_forward, gvbg=True))
    y, bridge = fwd(params, x)
    jax.block_until_ready((y, bridge))

    assert y.shape == (2, class_num) and bridge.shape == (2, class_num)
    assert jnp.all(jnp.isfinite(y)) and jnp.all(jnp.isfinite(bridge))
    print("KERNEL_OK")
</pallas_src>

<mosaic_0001>
module attributes {stable_mosaic.version = 11 : i64} {
  func.func @_fused_matmul_kernel(%arg0: i32, %arg1: i32, %arg2: i32, %arg3: memref<256x256xbf16, #tpu.memory_space<vmem>>, %arg4: memref<256x128xbf16, #tpu.memory_space<vmem>>, %arg5: memref<1x128xf32, #tpu.memory_space<vmem>>, %arg6: memref<1x128xf32, #tpu.memory_space<vmem>>, %arg7: memref<256x128xbf16, #tpu.memory_space<vmem>>, %arg8: memref<256x128xf32, #tpu.memory_space<vmem>>) attributes {dimension_semantics = [#tpu.dimension_semantics<parallel>, #tpu.dimension_semantics<parallel>, #tpu.dimension_semantics<arbitrary>], iteration_bounds = array<i64: 2, 1, 1>, scalar_prefetch = 0 : i64, scratch_operands = 1 : i64, tpu.core_type = #tpu.core_type<tc>, window_params = [{transform_indices = @transform_0, window_bounds = array<i64: 256, 256>}, {transform_indices = @transform_1, window_bounds = array<i64: 256, 128>}, {transform_indices = @transform_2, window_bounds = array<i64: 1, 128>}, {transform_indices = @transform_3, window_bounds = array<i64: 1, 128>}, {transform_indices = @transform_4, window_bounds = array<i64: 256, 128>}]} {
    %c0_i32 = arith.constant 0 : i32
    %0 = arith.cmpi eq, %arg2, %c0_i32 : i32
    %1 = arith.extui %0 : i1 to i32
    %c0_i32_0 = arith.constant 0 : i32
    %2 = arith.cmpi ne, %1, %c0_i32_0 : i32
    scf.if %2 {
      %cst_10 = arith.constant 0.000000e+00 : f32
      %12 = vector.broadcast %cst_10 : f32 to vector<256x128xf32>
      %c0_11 = arith.constant 0 : index
      %c0_12 = arith.constant 0 : index
      %13 = vector.load %arg8[%c0_11, %c0_12] : memref<256x128xf32, #tpu.memory_space<vmem>>, vector<256x128xf32>
      tpu.vector_store %arg8[%c0_11, %c0_12], %12 {strides = array<i32>} : memref<256x128xf32, #tpu.memory_space<vmem>>, vector<256x128xf32>,
    } else {
    }
    %c0 = arith.constant 0 : index
    %c0_1 = arith.constant 0 : index
    %3 = vector.load %arg8[%c0, %c0_1] : memref<256x128xf32, #tpu.memory_space<vmem>>, vector<256x128xf32>
    %c0_2 = arith.constant 0 : index
    %c0_3 = arith.constant 0 : index
    %4 = vector.load %arg3[%c0_2, %c0_3] : memref<256x256xbf16, #tpu.memory_space<vmem>>, vector<256x256xbf16>
    %c0_4 = arith.constant 0 : index
    %c0_5 = arith.constant 0 : index
    %5 = vector.load %arg4[%c0_4, %c0_5] : memref<256x128xbf16, #tpu.memory_space<vmem>>, vector<256x128xbf16>
    %cst = arith.constant dense<0.000000e+00> : vector<256x128xf32>
    %6 = tpu.matmul %4, %5, %cst {dimension_numbers = #tpu.dot_dimension_numbers<[1], [0], [0], [1], [0, 0, 1, 1], [], []>} : vector<256x256xbf16>, vector<256x128xbf16>, vector<256x128xf32> -> vector<256x128xf32>
    %7 = arith.addf %3, %6 : vector<256x128xf32>
    %c0_6 = arith.constant 0 : index
    %c0_7 = arith.constant 0 : index
    %8 = vector.load %arg8[%c0_6, %c0_7] : memref<256x128xf32, #tpu.memory_space<vmem>>, vector<256x128xf32>
    tpu.vector_store %arg8[%c0_6, %c0_7], %7 {strides = array<i32>} : memref<256x128xf32, #tpu.memory_space<vmem>>, vector<256x128xf32>,
    %c0_i32_8 = arith.constant 0 : i32
    %9 = arith.cmpi eq, %arg2, %c0_i32_8 : i32
    %10 = arith.extui %9 : i1 to i32
    %c0_i32_9 = arith.constant 0 : i32
    %11 = arith.cmpi ne, %10, %c0_i32_9 : i32
    scf.if %11 {
      %c0_10 = arith.constant 0 : index
      %c0_11 = arith.constant 0 : index
      %12 = vector.load %arg8[%c0_10, %c0_11] : memref<256x128xf32, #tpu.memory_space<vmem>>, vector<256x128xf32>
      %c0_12 = arith.constant 0 : index
      %c0_13 = arith.constant 0 : index
      %13 = vector.load %arg5[%c0_12, %c0_13] : memref<1x128xf32, #tpu.memory_space<vmem>>, vector<1x128xf32>
      %14 = vector.broadcast %13 : vector<1x128xf32> to vector<256x128xf32>
      %15 = arith.mulf %12, %14 : vector<256x128xf32>
      %c0_14 = arith.constant 0 : index
      %c0_15 = arith.constant 0 : index
      %16 = vector.load %arg6[%c0_14, %c0_15] : memref<1x128xf32, #tpu.memory_space<vmem>>, vector<1x128xf32>
      %17 = vector.broadcast %16 : vector<1x128xf32> to vector<256x128xf32>
      %18 = arith.addf %15, %17 : vector<256x128xf32>
      %cst_16 = arith.constant 0.000000e+00 : f32
      %19 = vector.broadcast %cst_16 : f32 to vector<256x128xf32>
      %20 = arith.maximumf %18, %19 : vector<256x128xf32>
      %21 = arith.truncf %20 : vector<256x128xf32> to vector<256x128xbf16>
      %c0_17 = arith.constant 0 : index
      %c0_18 = arith.constant 0 : index
      %22 = vector.load %arg7[%c0_17, %c0_18] : memref<256x128xbf16, #tpu.memory_space<vmem>>, vector<256x128xbf16>
      tpu.vector_store %arg7[%c0_17, %c0_18], %21 {strides = array<i32>} : memref<256x128xbf16, #tpu.memory_space<vmem>>, vector<256x128xbf16>,
    } else {
    }
    return
  }
  func.func @transform_0(%arg0: i32, %arg1: i32, %arg2: i32) -> (i32, i32) {
    %c0_i32 = arith.constant 0 : i32
    return %arg0, %arg2 : i32, i32
  }
  func.func @transform_1(%arg0: i32, %arg1: i32, %arg2: i32) -> (i32, i32) {
    %c0_i32 = arith.constant 0 : i32
    return %arg2, %arg1 : i32, i32
  }
  func.func @transform_2(%arg0: i32, %arg1: i32, %arg2: i32) -> (i32, i32) {
    %c0_i32 = arith.constant 0 : i32
    %c0_i32_0 = arith.constant 0 : i32
    return %c0_i32, %arg1 : i32, i32
  }
  func.func @transform_3(%arg0: i32, %arg1: i32, %arg2: i32) -> (i32, i32) {
    %c0_i32 = arith.constant 0 : i32
    %c0_i32_0 = arith.constant 0 : i32
    return %c0_i32, %arg1 : i32, i32
  }
  func.func @transform_4(%arg0: i32, %arg1: i32, %arg2: i32) -> (i32, i32) {
    %c0_i32 = arith.constant 0 : i32
    return %arg0, %arg1 : i32, i32
  }
}

module attributes {stable_mosaic.version = 11 : i64} {
  func.func @_max9_kernel(%arg0: i32, %arg1: memref<128x128xbf16, #tpu.memory_space<vmem>>, %arg2: memref<128x128xbf16, #tpu.memory_space<vmem>>, %arg3: memref<128x128xbf16, #tpu.memory_space<vmem>>, %arg4: memref<128x128xbf16, #tpu.memory_space<vmem>>, %arg5: memref<128x128xbf16, #tpu.memory_space<vmem>>, %arg6: memref<128x128xbf16, #tpu.memory_space<vmem>>, %arg7: memref<128x128xbf16, #tpu.memory_space<vmem>>, %arg8: memref<128x128xbf16, #tpu.memory_space<vmem>>, %arg9: memref<128x128xbf16, #tpu.memory_space<vmem>>, %arg10: memref<128x128xbf16, #tpu.memory_space<vmem>>) attributes {dimension_semantics = [#tpu.dimension_semantics<parallel>], iteration_bounds = array<i64: 1>, scalar_prefetch = 0 : i64, scratch_operands = 0 : i64, tpu.core_type = #tpu.core_type<tc>, window_params = [{transform_indices = @transform_0, window_bounds = array<i64: 128, 128>}, {transform_indices = @transform_1, window_bounds = array<i64: 128, 128>}, {transform_indices = @transform_2, window_bounds = array<i64: 128, 128>}, {transform_indices = @transform_3, window_bounds = array<i64: 128, 128>}, {transform_indices = @transform_4, window_bounds = array<i64: 128, 128>}, {transform_indices = @transform_5, window_bounds = array<i64: 128, 128>}, {transform_indices = @transform_6, window_bounds = array<i64: 128, 128>}, {transform_indices = @transform_7, window_bounds = array<i64: 128, 128>}, {transform_indices = @transform_8, window_bounds = array<i64: 128, 128>}, {transform_indices = @transform_9, window_bounds = array<i64: 128, 128>}]} {
    %c0 = arith.constant 0 : index
    %c0_0 = arith.constant 0 : index
    %0 = vector.load %arg1[%c0, %c0_0] : memref<128x128xbf16, #tpu.memory_space<vmem>>, vector<128x128xbf16>
    %c0_1 = arith.constant 0 : index
    %c0_2 = arith.constant 0 : index
    %1 = vector.load %arg2[%c0_1, %c0_2] : memref<128x128xbf16, #tpu.memory_space<vmem>>, vector<128x128xbf16>
    %2 = arith.maximumf %0, %1 : vector<128x128xbf16>
    %c0_3 = arith.constant 0 : index
    %c0_4 = arith.constant 0 : index
    %3 = vector.load %arg3[%c0_3, %c0_4] : memref<128x128xbf16, #tpu.memory_space<vmem>>, vector<128x128xbf16>
    %4 = arith.maximumf %2, %3 : vector<128x128xbf16>
    %c0_5 = arith.constant 0 : index
    %c0_6 = arith.constant 0 : index
    %5 = vector.load %arg4[%c0_5, %c0_6] : memref<128x128xbf16, #tpu.memory_space<vmem>>, vector<128x128xbf16>
    %6 = arith.maximumf %4, %5 : vector<128x128xbf16>
    %c0_7 = arith.constant 0 : index
    %c0_8 = arith.constant 0 : index
    %7 = vector.load %arg5[%c0_7, %c0_8] : memref<128x128xbf16, #tpu.memory_space<vmem>>, vector<128x128xbf16>
    %8 = arith.maximumf %6, %7 : vector<128x128xbf16>
    %c0_9 = arith.constant 0 : index
    %c0_10 = arith.constant 0 : index
    %9 = vector.load %arg6[%c0_9, %c0_10] : memref<128x128xbf16, #tpu.memory_space<vmem>>, vector<128x128xbf16>
    %10 = arith.maximumf %8, %9 : vector<128x128xbf16>
    %c0_11 = arith.constant 0 : index
    %c0_12 = arith.constant 0 : index
    %11 = vector.load %arg7[%c0_11, %c0_12] : memref<128x128xbf16, #tpu.memory_space<vmem>>, vector<128x128xbf16>
    %12 = arith.maximumf %10, %11 : vector<128x128xbf16>
    %c0_13 = arith.constant 0 : index
    %c0_14 = arith.constant 0 : index
    %13 = vector.load %arg8[%c0_13, %c0_14] : memref<128x128xbf16, #tpu.memory_space<vmem>>, vector<128x128xbf16>
    %14 = arith.maximumf %12, %13 : vector<128x128xbf16>
    %c0_15 = arith.constant 0 : index
    %c0_16 = arith.constant 0 : index
    %15 = vector.load %arg9[%c0_15, %c0_16] : memref<128x128xbf16, #tpu.memory_space<vmem>>, vector<128x128xbf16>
    %16 = arith.maximumf %14, %15 : vector<128x128xbf16>
    %c0_17 = arith.constant 0 : index
    %c0_18 = arith.constant 0 : index
    %17 = vector.load %arg10[%c0_17, %c0_18] : memref<128x128xbf16, #tpu.memory_space<vmem>>, vector<128x128xbf16>
    tpu.vector_store %arg10[%c0_17, %c0_18], %16 {strides = array<i32>} : memref<128x128xbf16, #tpu.memory_space<vmem>>, vector<128x128xbf16>,
    return
  }
  func.func @transform_0(%arg0: i32) -> (i32, i32) {
    %c0_i32 = arith.constant 0 : i32
    %c0_i32_0 = arith.constant 0 : i32
    return %arg0, %c0_i32 : i32, i32
  }
  func.func @transform_1(%arg0: i32) -> (i32, i32) {
    %c0_i32 = arith.constant 0 : i32
    %c0_i32_0 = arith.constant 0 : i32
    return %arg0, %c0_i32 : i32, i32
  }
  func.func @transform_2(%arg0: i32) -> (i32, i32) {
    %c0_i32 = arith.constant 0 : i32
    %c0_i32_0 = arith.constant 0 : i32
    return %arg0, %c0_i32 : i32, i32
  }
  func.func @transform_3(%arg0: i32) -> (i32, i32) {
    %c0_i32 = arith.constant 0 : i32
    %c0_i32_0 = arith.constant 0 : i32
    return %arg0, %c0_i32 : i32, i32
  }
  func.func @transform_4(%arg0: i32) -> (i32, i32) {
    %c0_i32 = arith.constant 0 : i32
    %c0_i32_0 = arith.constant 0 : i32
    return %arg0, %c0_i32 : i32, i32
  }
  func.func @transform_5(%arg0: i32) -> (i32, i32) {
    %c0_i32 = arith.constant 0 : i32
    %c0_i32_0 = arith.constant 0 : i32
    return %arg0, %c0_i32 : i32, i32
  }
  func.func @transform_6(%arg0: i32) -> (i32, i32) {
    %c0_i32 = arith.constant 0 : i32
    %c0_i32_0 = arith.constant 0 : i32
    return %arg0, %c0_i32 : i32, i32
  }
  func.func @transform_7(%arg0: i32) -> (i32, i32) {
    %c0_i32 = arith.constant 0 : i32
    %c0_i32_0 = arith.constant 0 : i32
    return %arg0, %c0_i32 : i32, i32
  }
  func.func @transform_8(%arg0: i32) -> (i32, i32) {
    %c0_i32 = arith.constant 0 : i32
    %c0_i32_0 = arith.constant 0 : i32
    return %arg0, %c0_i32 : i32, i32
  }
  func.func @transform_9(%arg0: i32) -> (i32, i32) {
    %c0_i32 = arith.constant 0 : i32
    %c0_i32_0 = arith.constant 0 : i32
    return %arg0, %c0_i32 : i32, i32
  }
}

module attributes {stable_mosaic.version = 11 : i64} {
  func.func @_fused_matmul_kernel(%arg0: i32, %arg1: i32, %arg2: i32, %arg3: memref<128x384xbf16, #tpu.memory_space<vmem>>, %arg4: memref<384x128xbf16, #tpu.memory_space<vmem>>, %arg5: memref<1x128xf32, #tpu.memory_space<vmem>>, %arg6: memref<1x128xf32, #tpu.memory_space<vmem>>, %arg7: memref<128x128xbf16, #tpu.memory_space<vmem>>, %arg8: memref<128x128xbf16, #tpu.memory_space<vmem>>, %arg9: memref<128x128xf32, #tpu.memory_space<vmem>>) attributes {dimension_semantics = [#tpu.dimension_semantics<parallel>, #tpu.dimension_semantics<parallel>, #tpu.dimension_semantics<arbitrary>], iteration_bounds = array<i64: 1, 1, 3>, scalar_prefetch = 0 : i64, scratch_operands = 1 : i64, tpu.core_type = #tpu.core_type<tc>, window_params = [{transform_indices = @transform_0, window_bounds = array<i64: 128, 384>}, {transform_indices = @transform_1, window_bounds = array<i64: 384, 128>}, {transform_indices = @transform_2, window_bounds = array<i64: 1, 128>}, {transform_indices = @transform_3, window_bounds = array<i64: 1, 128>}, {transform_indices = @transform_4, window_bounds = array<i64: 128, 128>}, {transform_indices = @transform_5, window_bounds = array<i64: 128, 128>}]} {
    %c0_i32 = arith.constant 0 : i32
    %0 = arith.cmpi eq, %arg2, %c0_i32 : i32
    %1 = arith.extui %0 : i1 to i32
    %c0_i32_0 = arith.constant 0 : i32
    %2 = arith.cmpi ne, %1, %c0_i32_0 : i32
    scf.if %2 {
      %cst_9 = arith.constant 0.000000e+00 : f32
      %12 = vector.broadcast %cst_9 : f32 to vector<128x128xf32>
      %c0_10 = arith.constant 0 : index
      %c0_11 = arith.constant 0 : index
      %13 = vector.load %arg9[%c0_10, %c0_11] : memref<128x128xf32, #tpu.memory_space<vmem>>, vector<128x128xf32>
      tpu.vector_store %arg9[%c0_10, %c0_11], %12 {strides = array<i32>} : memref<128x128xf32, #tpu.memory_space<vmem>>, vector<128x128xf32>,
    } else {
    }
    %c0 = arith.constant 0 : index
    %c0_1 = arith.constant 0 : index
    %3 = vector.load %arg9[%c0, %c0_1] : memref<128x128xf32, #tpu.memory_space<vmem>>, vector<128x128xf32>
    %c0_2 = arith.constant 0 : index
    %c0_3 = arith.constant 0 : index
    %4 = vector.load %arg3[%c0_2, %c0_3] : memref<128x384xbf16, #tpu.memory_space<vmem>>, vector<128x384xbf16>
    %c0_4 = arith.constant 0 : index
    %c0_5 = arith.constant 0 : index
    %5 = vector.load %arg4[%c0_4, %c0_5] : memref<384x128xbf16, #tpu.memory_space<vmem>>, vector<384x128xbf16>
    %cst = arith.constant dense<0.000000e+00> : vector<128x128xf32>
    %6 = tpu.matmul %4, %5, %cst {dimension_numbers = #tpu.dot_dimension_numbers<[1], [0], [0], [1], [0, 0, 1, 1], [], []>} : vector<128x384xbf16>, vector<384x128xbf16>, vector<128x128xf32> -> vector<128x128xf32>
    %7 = arith.addf %3, %6 : vector<128x128xf32>
    %c0_6 = arith.constant 0 : index
    %c0_7 = arith.constant 0 : index
    %8 = vector.load %arg9[%c0_6, %c0_7] : memref<128x128xf32, #tpu.memory_space<vmem>>, vector<128x128xf32>
    tpu.vector_store %arg9[%c0_6, %c0_7], %7 {strides = array<i32>} : memref<128x128xf32, #tpu.memory_space<vmem>>, vector<128x128xf32>,
    %c2_i32 = arith.constant 2 : i32
    %9 = arith.cmpi eq, %arg2, %c2_i32 : i32
    %10 = arith.extui %9 : i1 to i32
    %c0_i32_8 = arith.constant 0 : i32
    %11 = arith.cmpi ne, %10, %c0_i32_8 : i32
    scf.if %11 {
      %c0_9 = arith.constant 0 : index
      %c0_10 = arith.constant 0 : index
      %12 = vector.load %arg9[%c0_9, %c0_10] : memref<128x128xf32, #tpu.memory_space<vmem>>, vector<128x128xf32>
      %c0_11 = arith.constant 0 : index
      %c0_12 = arith.constant 0 : index
      %13 = vector.load %arg5[%c0_11, %c0_12] : memref<1x128xf32, #tpu.memory_space<vmem>>, vector<1x128xf32>
      %14 = vector.broadcast %13 : vector<1x128xf32> to vector<128x128xf32>
      %15 = arith.mulf %12, %14 : vector<128x128xf32>
      %c0_13 = arith.constant 0 : index
      %c0_14 = arith.constant 0 : index
      %16 = vector.load %arg6[%c0_13, %c0_14] : memref<1x128xf32, #tpu.memory_space<vmem>>, vector<1x128xf32>
      %17 = vector.broadcast %16 : vector<1x128xf32> to vector<128x128xf32>
      %18 = arith.addf %15, %17 : vector<128x128xf32>
      %c0_15 = arith.constant 0 : index
      %c0_16 = arith.constant 0 : index
      %19 = vector.load %arg7[%c0_15, %c0_16] : memref<128x128xbf16, #tpu.memory_space<vmem>>, vector<128x128xbf16>
      %20 = arith.extf %19 : vector<128x128xbf16> to vector<128x128xf32>
      %21 = arith.addf %18, %20 : vector<128x128xf32>
      %cst_17 = arith.constant 0.000000e+00 : f32
      %22 = vector.broadcast %cst_17 : f32 to vector<128x128xf32>
      %23 = arith.maximumf %21, %22 : vector<128x128xf32>
      %24 = arith.truncf %23 : vector<128x128xf32> to vector<128x128xbf16>
      %c0_18 = arith.constant 0 : index
      %c0_19 = arith.constant 0 : index
      %25 = vector.load %arg8[%c0_18, %c0_19] : memref<128x128xbf16, #tpu.memory_space<vmem>>, vector<128x128xbf16>
      tpu.vector_store %arg8[%c0_18, %c0_19], %24 {strides = array<i32>} : memref<128x128xbf16, #tpu.memory_space<vmem>>, vector<128x128xbf16>,
    } else {
    }
    return
  }
  func.func @transform_0(%arg0: i32, %arg1: i32, %arg2: i32) -> (i32, i32) {
    %c0_i32 = arith.constant 0 : i32
    return %arg0, %arg2 : i32, i32
  }
  func.func @transform_1(%arg0: i32, %arg1: i32, %arg2: i32) -> (i32, i32) {
    %c0_i32 = arith.constant 0 : i32
    return %arg2, %arg1 : i32, i32
  }
  func.func @transform_2(%arg0: i32, %arg1: i32, %arg2: i32) -> (i32, i32) {
    %c0_i32 = arith.constant 0 : i32
    %c0_i32_0 = arith.constant 0 : i32
    return %c0_i32, %arg1 : i32, i32
  }
  func.func @transform_3(%arg0: i32, %arg1: i32, %arg2: i32) -> (i32, i32) {
    %c0_i32 = arith.constant 0 : i32
    %c0_i32_0 = arith.constant 0 : i32
    return %c0_i32, %arg1 : i32, i32
  }
  func.func @transform_4(%arg0: i32, %arg1: i32, %arg2: i32) -> (i32, i32) {
    %c0_i32 = arith.constant 0 : i32
    return %arg0, %arg1 : i32, i32
  }
  func.func @transform_5(%arg0: i32, %arg1: i32, %arg2: i32) -> (i32, i32) {
    %c0_i32 = arith.constant 0 : i32
    return %arg0, %arg1 : i32, i32
  }
}

module attributes {stable_mosaic.version = 11 : i64} {
  func.func @_fused_matmul_kernel(%arg0: i32, %arg1: i32, %arg2: i32, %arg3: memref<128x384xbf16, #tpu.memory_space<vmem>>, %arg4: memref<384x128xbf16, #tpu.memory_space<vmem>>, %arg5: memref<1x128xf32, #tpu.memory_space<vmem>>, %arg6: memref<1x128xf32, #tpu.memory_space<vmem>>, %arg7: memref<128x128xbf16, #tpu.memory_space<vmem>>, %arg8: memref<128x128xf32, #tpu.memory_space<vmem>>) attributes {dimension_semantics = [#tpu.dimension_semantics<parallel>, #tpu.dimension_semantics<parallel>, #tpu.dimension_semantics<arbitrary>], iteration_bounds = array<i64: 1, 1, 3>, scalar_prefetch = 0 : i64, scratch_operands = 1 : i64, tpu.core_type = #tpu.core_type<tc>, window_params = [{transform_indices = @transform_0, window_bounds = array<i64: 128, 384>}, {transform_indices = @transform_1, window_bounds = array<i64: 384, 128>}, {transform_indices = @transform_2, window_bounds = array<i64: 1, 128>}, {transform_indices = @transform_3, window_bounds = array<i64: 1, 128>}, {transform_indices = @transform_4, window_bounds = array<i64: 128, 128>}]} {
    %c0_i32 = arith.constant 0 : i32
    %0 = arith.cmpi eq, %arg2, %c0_i32 : i32
    %1 = arith.extui %0 : i1 to i32
    %c0_i32_0 = arith.constant 0 : i32
    %2 = arith.cmpi ne, %1, %c0_i32_0 : i32
    scf.if %2 {
      %cst_9 = arith.constant 0.000000e+00 : f32
      %12 = vector.broadcast %cst_9 : f32 to vector<128x128xf32>
      %c0_10 = arith.constant 0 : index
      %c0_11 = arith.constant 0 : index
      %13 = vector.load %arg8[%c0_10, %c0_11] : memref<128x128xf32, #tpu.memory_space<vmem>>, vector<128x128xf32>
      tpu.vector_store %arg8[%c0_10, %c0_11], %12 {strides = array<i32>} : memref<128x128xf32, #tpu.memory_space<vmem>>, vector<128x128xf32>,
    } else {
    }
    %c0 = arith.constant 0 : index
    %c0_1 = arith.constant 0 : index
    %3 = vector.load %arg8[%c0, %c0_1] : memref<128x128xf32, #tpu.memory_space<vmem>>, vector<128x128xf32>
    %c0_2 = arith.constant 0 : index
    %c0_3 = arith.constant 0 : index
    %4 = vector.load %arg3[%c0_2, %c0_3] : memref<128x384xbf16, #tpu.memory_space<vmem>>, vector<128x384xbf16>
    %c0_4 = arith.constant 0 : index
    %c0_5 = arith.constant 0 : index
    %5 = vector.load %arg4[%c0_4, %c0_5] : memref<384x128xbf16, #tpu.memory_space<vmem>>, vector<384x128xbf16>
    %cst = arith.constant dense<0.000000e+00> : vector<128x128xf32>
    %6 = tpu.matmul %4, %5, %cst {dimension_numbers = #tpu.dot_dimension_numbers<[1], [0], [0], [1], [0, 0, 1, 1], [], []>} : vector<128x384xbf16>, vector<384x128xbf16>, vector<128x128xf32> -> vector<128x128xf32>
    %7 = arith.addf %3, %6 : vector<128x128xf32>
    %c0_6 = arith.constant 0 : index
    %c0_7 = arith.constant 0 : index
    %8 = vector.load %arg8[%c0_6, %c0_7] : memref<128x128xf32, #tpu.memory_space<vmem>>, vector<128x128xf32>
    tpu.vector_store %arg8[%c0_6, %c0_7], %7 {strides = array<i32>} : memref<128x128xf32, #tpu.memory_space<vmem>>, vector<128x128xf32>,
    %c2_i32 = arith.constant 2 : i32
    %9 = arith.cmpi eq, %arg2, %c2_i32 : i32
    %10 = arith.extui %9 : i1 to i32
    %c0_i32_8 = arith.constant 0 : i32
    %11 = arith.cmpi ne, %10, %c0_i32_8 : i32
    scf.if %11 {
      %c0_9 = arith.constant 0 : index
      %c0_10 = arith.constant 0 : index
      %12 = vector.load %arg8[%c0_9, %c0_10] : memref<128x128xf32, #tpu.memory_space<vmem>>, vector<128x128xf32>
      %c0_11 = arith.constant 0 : index
      %c0_12 = arith.constant 0 : index
      %13 = vector.load %arg5[%c0_11, %c0_12] : memref<1x128xf32, #tpu.memory_space<vmem>>, vector<1x128xf32>
      %14 = vector.broadcast %13 : vector<1x128xf32> to vector<128x128xf32>
      %15 = arith.mulf %12, %14 : vector<128x128xf32>
      %c0_13 = arith.constant 0 : index
      %c0_14 = arith.constant 0 : index
      %16 = vector.load %arg6[%c0_13, %c0_14] : memref<1x128xf32, #tpu.memory_space<vmem>>, vector<1x128xf32>
      %17 = vector.broadcast %16 : vector<1x128xf32> to vector<128x128xf32>
      %18 = arith.addf %15, %17 : vector<128x128xf32>
      %cst_15 = arith.constant 0.000000e+00 : f32
      %19 = vector.broadcast %cst_15 : f32 to vector<128x128xf32>
      %20 = arith.maximumf %18, %19 : vector<128x128xf32>
      %21 = arith.truncf %20 : vector<128x128xf32> to vector<128x128xbf16>
      %c0_16 = arith.constant 0 : index
      %c0_17 = arith.constant 0 : index
      %22 = vector.load %arg7[%c0_16, %c0_17] : memref<128x128xbf16, #tpu.memory_space<vmem>>, vector<128x128xbf16>
      tpu.vector_store %arg7[%c0_16, %c0_17], %21 {strides = array<i32>} : memref<128x128xbf16, #tpu.memory_space<vmem>>, vector<128x128xbf16>,
    } else {
    }
    return
  }
  func.func @transform_0(%arg0: i32, %arg1: i32, %arg2: i32) -> (i32, i32) {
    %c0_i32 = arith.constant 0 : i32
    return %arg0, %arg2 : i32, i32
  }
  func.func @transform_1(%arg0: i32, %arg1: i32, %arg2: i32) -> (i32, i32) {
    %c0_i32 = arith.constant 0 : i32
    return %arg2, %arg1 : i32, i32
  }
  func.func @transform_2(%arg0: i32, %arg1: i32, %arg2: i32) -> (i32, i32) {
    %c0_i32 = arith.constant 0 : i32
    %c0_i32_0 = arith.constant 0 : i32
    return %c0_i32, %arg1 : i32, i32
  }
  func.func @transform_3(%arg0: i32, %arg1: i32, %arg2: i32) -> (i32, i32) {
    %c0_i32 = arith.constant 0 : i32
    %c0_i32_0 = arith.constant 0 : i32
    return %c0_i32, %arg1 : i32, i32
  }
  func.func @transform_4(%arg0: i32, %arg1: i32, %arg2: i32) -> (i32, i32) {
    %c0_i32 = arith.constant 0 : i32
    return %arg0, %arg1 : i32, i32
  }
}

module attributes {stable_mosaic.version = 11 : i64} {
  func.func @_fused_matmul_kernel(%arg0: i32, %arg1: i32, %arg2: i32, %arg3: memref<32x384xbf16, #tpu.memory_space<vmem>>, %arg4: memref<384x128xbf16, #tpu.memory_space<vmem>>, %arg5: memref<1x128xf32, #tpu.memory_space<vmem>>, %arg6: memref<1x128xf32, #tpu.memory_space<vmem>>, %arg7: memref<32x128xbf16, #tpu.memory_space<vmem>>, %arg8: memref<32x128xf32, #tpu.memory_space<vmem>>) attributes {dimension_semantics = [#tpu.dimension_semantics<parallel>, #tpu.dimension_semantics<parallel>, #tpu.dimension_semantics<arbitrary>], iteration_bounds = array<i64: 1, 1, 3>, scalar_prefetch = 0 : i64, scratch_operands = 1 : i64, tpu.core_type = #tpu.core_type<tc>, window_params = [{transform_indices = @transform_0, window_bounds = array<i64: 32, 384>}, {transform_indices = @transform_1, window_bounds = array<i64: 384, 128>}, {transform_indices = @transform_2, window_bounds = array<i64: 1, 128>}, {transform_indices = @transform_3, window_bounds = array<i64: 1, 128>}, {transform_indices = @transform_4, window_bounds = array<i64: 32, 128>}]} {
    %c0_i32 = arith.constant 0 : i32
    %0 = arith.cmpi eq, %arg2, %c0_i32 : i32
    %1 = arith.extui %0 : i1 to i32
    %c0_i32_0 = arith.constant 0 : i32
    %2 = arith.cmpi ne, %1, %c0_i32_0 : i32
    scf.if %2 {
      %cst_9 = arith.constant 0.000000e+00 : f32
      %12 = vector.broadcast %cst_9 : f32 to vector<32x128xf32>
      %c0_10 = arith.constant 0 : index
      %c0_11 = arith.constant 0 : index
      %13 = vector.load %arg8[%c0_10, %c0_11] : memref<32x128xf32, #tpu.memory_space<vmem>>, vector<32x128xf32>
      tpu.vector_store %arg8[%c0_10, %c0_11], %12 {strides = array<i32>} : memref<32x128xf32, #tpu.memory_space<vmem>>, vector<32x128xf32>,
    } else {
    }
    %c0 = arith.constant 0 : index
    %c0_1 = arith.constant 0 : index
    %3 = vector.load %arg8[%c0, %c0_1] : memref<32x128xf32, #tpu.memory_space<vmem>>, vector<32x128xf32>
    %c0_2 = arith.constant 0 : index
    %c0_3 = arith.constant 0 : index
    %4 = vector.load %arg3[%c0_2, %c0_3] : memref<32x384xbf16, #tpu.memory_space<vmem>>, vector<32x384xbf16>
    %c0_4 = arith.constant 0 : index
    %c0_5 = arith.constant 0 : index
    %5 = vector.load %arg4[%c0_4, %c0_5] : memref<384x128xbf16, #tpu.memory_space<vmem>>, vector<384x128xbf16>
    %cst = arith.constant dense<0.000000e+00> : vector<32x128xf32>
    %6 = tpu.matmul %4, %5, %cst {dimension_numbers = #tpu.dot_dimension_numbers<[1], [0], [0], [1], [0, 0, 1, 1], [], []>} : vector<32x384xbf16>, vector<384x128xbf16>, vector<32x128xf32> -> vector<32x128xf32>
    %7 = arith.addf %3, %6 : vector<32x128xf32>
    %c0_6 = arith.constant 0 : index
    %c0_7 = arith.constant 0 : index
    %8 = vector.load %arg8[%c0_6, %c0_7] : memref<32x128xf32, #tpu.memory_space<vmem>>, vector<32x128xf32>
    tpu.vector_store %arg8[%c0_6, %c0_7], %7 {strides = array<i32>} : memref<32x128xf32, #tpu.memory_space<vmem>>, vector<32x128xf32>,
    %c2_i32 = arith.constant 2 : i32
    %9 = arith.cmpi eq, %arg2, %c2_i32 : i32
    %10 = arith.extui %9 : i1 to i32
    %c0_i32_8 = arith.constant 0 : i32
    %11 = arith.cmpi ne, %10, %c0_i32_8 : i32
    scf.if %11 {
      %c0_9 = arith.constant 0 : index
      %c0_10 = arith.constant 0 : index
      %12 = vector.load %arg8[%c0_9, %c0_10] : memref<32x128xf32, #tpu.memory_space<vmem>>, vector<32x128xf32>
      %c0_11 = arith.constant 0 : index
      %c0_12 = arith.constant 0 : index
      %13 = vector.load %arg5[%c0_11, %c0_12] : memref<1x128xf32, #tpu.memory_space<vmem>>, vector<1x128xf32>
      %14 = vector.broadcast %13 : vector<1x128xf32> to vector<32x128xf32>
      %15 = arith.mulf %12, %14 : vector<32x128xf32>
      %c0_13 = arith.constant 0 : index
      %c0_14 = arith.constant 0 : index
      %16 = vector.load %arg6[%c0_13, %c0_14] : memref<1x128xf32, #tpu.memory_space<vmem>>, vector<1x128xf32>
      %17 = vector.broadcast %16 : vector<1x128xf32> to vector<32x128xf32>
      %18 = arith.addf %15, %17 : vector<32x128xf32>
      %cst_15 = arith.constant 0.000000e+00 : f32
      %19 = vector.broadcast %cst_15 : f32 to vector<32x128xf32>
      %20 = arith.maximumf %18, %19 : vector<32x128xf32>
      %21 = arith.truncf %20 : vector<32x128xf32> to vector<32x128xbf16>
      %c0_16 = arith.constant 0 : index
      %c0_17 = arith.constant 0 : index
      %22 = vector.load %arg7[%c0_16, %c0_17] : memref<32x128xbf16, #tpu.memory_space<vmem>>, vector<32x128xbf16>
      tpu.vector_store %arg7[%c0_16, %c0_17], %21 {strides = array<i32>} : memref<32x128xbf16, #tpu.memory_space<vmem>>, vector<32x128xbf16>,
    } else {
    }
    return
  }
  func.func @transform_0(%arg0: i32, %arg1: i32, %arg2: i32) -> (i32, i32) {
    %c0_i32 = arith.constant 0 : i32
    return %arg0, %arg2 : i32, i32
  }
  func.func @transform_1(%arg0: i32, %arg1: i32, %arg2: i32) -> (i32, i32) {
    %c0_i32 = arith.constant 0 : i32
    return %arg2, %arg1 : i32, i32
  }
  func.func @transform_2(%arg0: i32, %arg1: i32, %arg2: i32) -> (i32, i32) {
    %c0_i32 = arith.constant 0 : i32
    %c0_i32_0 = arith.constant 0 : i32
    return %c0_i32, %arg1 : i32, i32
  }
  func.func @transform_3(%arg0: i32, %arg1: i32, %arg2: i32) -> (i32, i32) {
    %c0_i32 = arith.constant 0 : i32
    %c0_i32_0 = arith.constant 0 : i32
    return %c0_i32, %arg1 : i32, i32
  }
  func.func @transform_4(%arg0: i32, %arg1: i32, %arg2: i32) -> (i32, i32) {
    %c0_i32 = arith.constant 0 : i32
    return %arg0, %arg1 : i32, i32
  }
}

module attributes {stable_mosaic.version = 11 : i64} {
  func.func @_fused_matmul_kernel(%arg0: i32, %arg1: i32, %arg2: i32, %arg3: memref<32x384xbf16, #tpu.memory_space<vmem>>, %arg4: memref<384x128xbf16, #tpu.memory_space<vmem>>, %arg5: memref<1x128xf32, #tpu.memory_space<vmem>>, %arg6: memref<1x128xf32, #tpu.memory_space<vmem>>, %arg7: memref<32x128xbf16, #tpu.memory_space<vmem>>, %arg8: memref<32x128xbf16, #tpu.memory_space<vmem>>, %arg9: memref<32x128xf32, #tpu.memory_space<vmem>>) attributes {dimension_semantics = [#tpu.dimension_semantics<parallel>, #tpu.dimension_semantics<parallel>, #tpu.dimension_semantics<arbitrary>], iteration_bounds = array<i64: 1, 1, 3>, scalar_prefetch = 0 : i64, scratch_operands = 1 : i64, tpu.core_type = #tpu.core_type<tc>, window_params = [{transform_indices = @transform_0, window_bounds = array<i64: 32, 384>}, {transform_indices = @transform_1, window_bounds = array<i64: 384, 128>}, {transform_indices = @transform_2, window_bounds = array<i64: 1, 128>}, {transform_indices = @transform_3, window_bounds = array<i64: 1, 128>}, {transform_indices = @transform_4, window_bounds = array<i64: 32, 128>}, {transform_indices = @transform_5, window_bounds = array<i64: 32, 128>}]} {
    %c0_i32 = arith.constant 0 : i32
    %0 = arith.cmpi eq, %arg2, %c0_i32 : i32
    %1 = arith.extui %0 : i1 to i32
    %c0_i32_0 = arith.constant 0 : i32
    %2 = arith.cmpi ne, %1, %c0_i32_0 : i32
    scf.if %2 {
      %cst_9 = arith.constant 0.000000e+00 : f32
      %12 = vector.broadcast %cst_9 : f32 to vector<32x128xf32>
      %c0_10 = arith.constant 0 : index
      %c0_11 = arith.constant 0 : index
      %13 = vector.load %arg9[%c0_10, %c0_11] : memref<32x128xf32, #tpu.memory_space<vmem>>, vector<32x128xf32>
      tpu.vector_store %arg9[%c0_10, %c0_11], %12 {strides = array<i32>} : memref<32x128xf32, #tpu.memory_space<vmem>>, vector<32x128xf32>,
    } else {
    }
    %c0 = arith.constant 0 : index
    %c0_1 = arith.constant 0 : index
    %3 = vector.load %arg9[%c0, %c0_1] : memref<32x128xf32, #tpu.memory_space<vmem>>, vector<32x128xf32>
    %c0_2 = arith.constant 0 : index
    %c0_3 = arith.constant 0 : index
    %4 = vector.load %arg3[%c0_2, %c0_3] : memref<32x384xbf16, #tpu.memory_space<vmem>>, vector<32x384xbf16>
    %c0_4 = arith.constant 0 : index
    %c0_5 = arith.constant 0 : index
    %5 = vector.load %arg4[%c0_4, %c0_5] : memref<384x128xbf16, #tpu.memory_space<vmem>>, vector<384x128xbf16>
    %cst = arith.constant dense<0.000000e+00> : vector<32x128xf32>
    %6 = tpu.matmul %4, %5, %cst {dimension_numbers = #tpu.dot_dimension_numbers<[1], [0], [0], [1], [0, 0, 1, 1], [], []>} : vector<32x384xbf16>, vector<384x128xbf16>, vector<32x128xf32> -> vector<32x128xf32>
    %7 = arith.addf %3, %6 : vector<32x128xf32>
    %c0_6 = arith.constant 0 : index
    %c0_7 = arith.constant 0 : index
    %8 = vector.load %arg9[%c0_6, %c0_7] : memref<32x128xf32, #tpu.memory_space<vmem>>, vector<32x128xf32>
    tpu.vector_store %arg9[%c0_6, %c0_7], %7 {strides = array<i32>} : memref<32x128xf32, #tpu.memory_space<vmem>>, vector<32x128xf32>,
    %c2_i32 = arith.constant 2 : i32
    %9 = arith.cmpi eq, %arg2, %c2_i32 : i32
    %10 = arith.extui %9 : i1 to i32
    %c0_i32_8 = arith.constant 0 : i32
    %11 = arith.cmpi ne, %10, %c0_i32_8 : i32
    scf.if %11 {
      %c0_9 = arith.constant 0 : index
      %c0_10 = arith.constant 0 : index
      %12 = vector.load %arg9[%c0_9, %c0_10] : memref<32x128xf32, #tpu.memory_space<vmem>>, vector<32x128xf32>
      %c0_11 = arith.constant 0 : index
      %c0_12 = arith.constant 0 : index
      %13 = vector.load %arg5[%c0_11, %c0_12] : memref<1x128xf32, #tpu.memory_space<vmem>>, vector<1x128xf32>
      %14 = vector.broadcast %13 : vector<1x128xf32> to vector<32x128xf32>
      %15 = arith.mulf %12, %14 : vector<32x128xf32>
      %c0_13 = arith.constant 0 : index
      %c0_14 = arith.constant 0 : index
      %16 = vector.load %arg6[%c0_13, %c0_14] : memref<1x128xf32, #tpu.memory_space<vmem>>, vector<1x128xf32>
      %17 = vector.broadcast %16 : vector<1x128xf32> to vector<32x128xf32>
      %18 = arith.addf %15, %17 : vector<32x128xf32>
      %c0_15 = arith.constant 0 : index
      %c0_16 = arith.constant 0 : index
      %19 = vector.load %arg7[%c0_15, %c0_16] : memref<32x128xbf16, #tpu.memory_space<vmem>>, vector<32x128xbf16>
      %20 = arith.extf %19 : vector<32x128xbf16> to vector<32x128xf32>
      %21 = arith.addf %18, %20 : vector<32x128xf32>
      %cst_17 = arith.constant 0.000000e+00 : f32
      %22 = vector.broadcast %cst_17 : f32 to vector<32x128xf32>
      %23 = arith.maximumf %21, %22 : vector<32x128xf32>
      %24 = arith.truncf %23 : vector<32x128xf32> to vector<32x128xbf16>
      %c0_18 = arith.constant 0 : index
      %c0_19 = arith.constant 0 : index
      %25 = vector.load %arg8[%c0_18, %c0_19] : memref<32x128xbf16, #tpu.memory_space<vmem>>, vector<32x128xbf16>
      tpu.vector_store %arg8[%c0_18, %c0_19], %24 {strides = array<i32>} : memref<32x128xbf16, #tpu.memory_space<vmem>>, vector<32x128xbf16>,
    } else {
    }
    return
  }
  func.func @transform_0(%arg0: i32, %arg1: i32, %arg2: i32) -> (i32, i32) {
    %c0_i32 = arith.constant 0 : i32
    return %arg0, %arg2 : i32, i32
  }
  func.func @transform_1(%arg0: i32, %arg1: i32, %arg2: i32) -> (i32, i32) {
    %c0_i32 = arith.constant 0 : i32
    return %arg2, %arg1 : i32, i32
  }
  func.func @transform_2(%arg0: i32, %arg1: i32, %arg2: i32) -> (i32, i32) {
    %c0_i32 = arith.constant 0 : i32
    %c0_i32_0 = arith.constant 0 : i32
    return %c0_i32, %arg1 : i32, i32
  }
  func.func @transform_3(%arg0: i32, %arg1: i32, %arg2: i32) -> (i32, i32) {
    %c0_i32 = arith.constant 0 : i32
    %c0_i32_0 = arith.constant 0 : i32
    return %c0_i32, %arg1 : i32, i32
  }
  func.func @transform_4(%arg0: i32, %arg1: i32, %arg2: i32) -> (i32, i32) {
    %c0_i32 = arith.constant 0 : i32
    return %arg0, %arg1 : i32, i32
  }
  func.func @transform_5(%arg0: i32, %arg1: i32, %arg2: i32) -> (i32, i32) {
    %c0_i32 = arith.constant 0 : i32
    return %arg0, %arg1 : i32, i32
  }
}

module attributes {stable_mosaic.version = 11 : i64} {
  func.func @_fused_matmul_kernel(%arg0: i32, %arg1: i32, %arg2: i32, %arg3: memref<32x128xbf16, #tpu.memory_space<vmem>>, %arg4: memref<128x128xbf16, #tpu.memory_space<vmem>>, %arg5: memref<1x128xf32, #tpu.memory_space<vmem>>, %arg6: memref<1x128xf32, #tpu.memory_space<vmem>>, %arg7: memref<32x128xbf16, #tpu.memory_space<vmem>>, %arg8: memref<32x128xf32, #tpu.memory_space<vmem>>) attributes {dimension_semantics = [#tpu.dimension_semantics<parallel>, #tpu.dimension_semantics<parallel>, #tpu.dimension_semantics<arbitrary>], iteration_bounds = array<i64: 1, 1, 1>, scalar_prefetch = 0 : i64, scratch_operands = 1 : i64, tpu.core_type = #tpu.core_type<tc>, window_params = [{transform_indices = @transform_0, window_bounds = array<i64: 32, 128>}, {transform_indices = @transform_1, window_bounds = array<i64: 128, 128>}, {transform_indices = @transform_2, window_bounds = array<i64: 1, 128>}, {transform_indices = @transform_3, window_bounds = array<i64: 1, 128>}, {transform_indices = @transform_4, window_bounds = array<i64: 32, 128>}]} {
    %c0_i32 = arith.constant 0 : i32
    %0 = arith.cmpi eq, %arg2, %c0_i32 : i32
    %1 = arith.extui %0 : i1 to i32
    %c0_i32_0 = arith.constant 0 : i32
    %2 = arith.cmpi ne, %1, %c0_i32_0 : i32
    scf.if %2 {
      %cst_10 = arith.constant 0.000000e+00 : f32
      %12 = vector.broadcast %cst_10 : f32 to vector<32x128xf32>
      %c0_11 = arith.constant 0 : index
      %c0_12 = arith.constant 0 : index
      %13 = vector.load %arg8[%c0_11, %c0_12] : memref<32x128xf32, #tpu.memory_space<vmem>>, vector<32x128xf32>
      tpu.vector_store %arg8[%c0_11, %c0_12], %12 {strides = array<i32>} : memref<32x128xf32, #tpu.memory_space<vmem>>, vector<32x128xf32>,
    } else {
    }
    %c0 = arith.constant 0 : index
    %c0_1 = arith.constant 0 : index
    %3 = vector.load %arg8[%c0, %c0_1] : memref<32x128xf32, #tpu.memory_space<vmem>>, vector<32x128xf32>
    %c0_2 = arith.constant 0 : index
    %c0_3 = arith.constant 0 : index
    %4 = vector.load %arg3[%c0_2, %c0_3] : memref<32x128xbf16, #tpu.memory_space<vmem>>, vector<32x128xbf16>
    %c0_4 = arith.constant 0 : index
    %c0_5 = arith.constant 0 : index
    %5 = vector.load %arg4[%c0_4, %c0_5] : memref<128x128xbf16, #tpu.memory_space<vmem>>, vector<128x128xbf16>
    %cst = arith.constant dense<0.000000e+00> : vector<32x128xf32>
    %6 = tpu.matmul %4, %5, %cst {dimension_numbers = #tpu.dot_dimension_numbers<[1], [0], [0], [1], [0, 0, 1, 1], [], []>} : vector<32x128xbf16>, vector<128x128xbf16>, vector<32x128xf32> -> vector<32x128xf32>
    %7 = arith.addf %3, %6 : vector<32x128xf32>
    %c0_6 = arith.constant 0 : index
    %c0_7 = arith.constant 0 : index
    %8 = vector.load %arg8[%c0_6, %c0_7] : memref<32x128xf32, #tpu.memory_space<vmem>>, vector<32x128xf32>
    tpu.vector_store %arg8[%c0_6, %c0_7], %7 {strides = array<i32>} : memref<32x128xf32, #tpu.memory_space<vmem>>, vector<32x128xf32>,
    %c0_i32_8 = arith.constant 0 : i32
    %9 = arith.cmpi eq, %arg2, %c0_i32_8 : i32
    %10 = arith.extui %9 : i1 to i32
    %c0_i32_9 = arith.constant 0 : i32
    %11 = arith.cmpi ne, %10, %c0_i32_9 : i32
    scf.if %11 {
      %c0_10 = arith.constant 0 : index
      %c0_11 = arith.constant 0 : index
      %12 = vector.load %arg8[%c0_10, %c0_11] : memref<32x128xf32, #tpu.memory_space<vmem>>, vector<32x128xf32>
      %c0_12 = arith.constant 0 : index
      %c0_13 = arith.constant 0 : index
      %13 = vector.load %arg5[%c0_12, %c0_13] : memref<1x128xf32, #tpu.memory_space<vmem>>, vector<1x128xf32>
      %14 = vector.broadcast %13 : vector<1x128xf32> to vector<32x128xf32>
      %15 = arith.mulf %12, %14 : vector<32x128xf32>
      %c0_14 = arith.constant 0 : index
      %c0_15 = arith.constant 0 : index
      %16 = vector.load %arg6[%c0_14, %c0_15] : memref<1x128xf32, #tpu.memory_space<vmem>>, vector<1x128xf32>
      %17 = vector.broadcast %16 : vector<1x128xf32> to vector<32x128xf32>
      %18 = arith.addf %15, %17 : vector<32x128xf32>
      %19 = arith.truncf %18 : vector<32x128xf32> to vector<32x128xbf16>
      %c0_16 = arith.constant 0 : index
      %c0_17 = arith.constant 0 : index
      %20 = vector.load %arg7[%c0_16, %c0_17] : memref<32x128xbf16, #tpu.memory_space<vmem>>, vector<32x128xbf16>
      tpu.vector_store %arg7[%c0_16, %c0_17], %19 {strides = array<i32>} : memref<32x128xbf16, #tpu.memory_space<vmem>>, vector<32x128xbf16>,
    } else {
    }
    return
  }
  func.func @transform_0(%arg0: i32, %arg1: i32, %arg2: i32) -> (i32, i32) {
    %c0_i32 = arith.constant 0 : i32
    return %arg0, %arg2 : i32, i32
  }
  func.func @transform_1(%arg0: i32, %arg1: i32, %arg2: i32) -> (i32, i32) {
    %c0_i32 = arith.constant 0 : i32
    return %arg2, %arg1 : i32, i32
  }
  func.func @transform_2(%arg0: i32, %arg1: i32, %arg2: i32) -> (i32, i32) {
    %c0_i32 = arith.constant 0 : i32
    %c0_i32_0 = arith.constant 0 : i32
    return %c0_i32, %arg1 : i32, i32
  }
  func.func @transform_3(%arg0: i32, %arg1: i32, %arg2: i32) -> (i32, i32) {
    %c0_i32 = arith.constant 0 : i32
    %c0_i32_0 = arith.constant 0 : i32
    return %c0_i32, %arg1 : i32, i32
  }
  func.func @transform_4(%arg0: i32, %arg1: i32, %arg2: i32) -> (i32, i32) {
    %c0_i32 = arith.constant 0 : i32
    return %arg0, %arg1 : i32, i32
  }
}

module attributes {stable_mosaic.version = 11 : i64} {
  func.func @_fused_matmul_kernel(%arg0: i32, %arg1: i32, %arg2: i32, %arg3: memref<16x384xbf16, #tpu.memory_space<vmem>>, %arg4: memref<384x128xbf16, #tpu.memory_space<vmem>>, %arg5: memref<1x128xf32, #tpu.memory_space<vmem>>, %arg6: memref<1x128xf32, #tpu.memory_space<vmem>>, %arg7: memref<16x128xbf16, #tpu.memory_space<vmem>>, %arg8: memref<16x128xf32, #tpu.memory_space<vmem>>) attributes {dimension_semantics = [#tpu.dimension_semantics<parallel>, #tpu.dimension_semantics<parallel>, #tpu.dimension_semantics<arbitrary>], iteration_bounds = array<i64: 1, 1, 3>, scalar_prefetch = 0 : i64, scratch_operands = 1 : i64, tpu.core_type = #tpu.core_type<tc>, window_params = [{transform_indices = @transform_0, window_bounds = array<i64: 16, 384>}, {transform_indices = @transform_1, window_bounds = array<i64: 384, 128>}, {transform_indices = @transform_2, window_bounds = array<i64: 1, 128>}, {transform_indices = @transform_3, window_bounds = array<i64: 1, 128>}, {transform_indices = @transform_4, window_bounds = array<i64: 16, 128>}]} {
    %c0_i32 = arith.constant 0 : i32
    %0 = arith.cmpi eq, %arg2, %c0_i32 : i32
    %1 = arith.extui %0 : i1 to i32
    %c0_i32_0 = arith.constant 0 : i32
    %2 = arith.cmpi ne, %1, %c0_i32_0 : i32
    scf.if %2 {
      %cst_9 = arith.constant 0.000000e+00 : f32
      %12 = vector.broadcast %cst_9 : f32 to vector<16x128xf32>
      %c0_10 = arith.constant 0 : index
      %c0_11 = arith.constant 0 : index
      %13 = vector.load %arg8[%c0_10, %c0_11] : memref<16x128xf32, #tpu.memory_space<vmem>>, vector<16x128xf32>
      tpu.vector_store %arg8[%c0_10, %c0_11], %12 {strides = array<i32>} : memref<16x128xf32, #tpu.memory_space<vmem>>, vector<16x128xf32>,
    } else {
    }
    %c0 = arith.constant 0 : index
    %c0_1 = arith.constant 0 : index
    %3 = vector.load %arg8[%c0, %c0_1] : memref<16x128xf32, #tpu.memory_space<vmem>>, vector<16x128xf32>
    %c0_2 = arith.constant 0 : index
    %c0_3 = arith.constant 0 : index
    %4 = vector.load %arg3[%c0_2, %c0_3] : memref<16x384xbf16, #tpu.memory_space<vmem>>, vector<16x384xbf16>
    %c0_4 = arith.constant 0 : index
    %c0_5 = arith.constant 0 : index
    %5 = vector.load %arg4[%c0_4, %c0_5] : memref<384x128xbf16, #tpu.memory_space<vmem>>, vector<384x128xbf16>
    %cst = arith.constant dense<0.000000e+00> : vector<16x128xf32>
    %6 = tpu.matmul %4, %5, %cst {dimension_numbers = #tpu.dot_dimension_numbers<[1], [0], [0], [1], [0, 0, 1, 1], [], []>} : vector<16x384xbf16>, vector<384x128xbf16>, vector<16x128xf32> -> vector<16x128xf32>
    %7 = arith.addf %3, %6 : vector<16x128xf32>
    %c0_6 = arith.constant 0 : index
    %c0_7 = arith.constant 0 : index
    %8 = vector.load %arg8[%c0_6, %c0_7] : memref<16x128xf32, #tpu.memory_space<vmem>>, vector<16x128xf32>
    tpu.vector_store %arg8[%c0_6, %c0_7], %7 {strides = array<i32>} : memref<16x128xf32, #tpu.memory_space<vmem>>, vector<16x128xf32>,
    %c2_i32 = arith.constant 2 : i32
    %9 = arith.cmpi eq, %arg2, %c2_i32 : i32
    %10 = arith.extui %9 : i1 to i32
    %c0_i32_8 = arith.constant 0 : i32
    %11 = arith.cmpi ne, %10, %c0_i32_8 : i32
    scf.if %11 {
      %c0_9 = arith.constant 0 : index
      %c0_10 = arith.constant 0 : index
      %12 = vector.load %arg8[%c0_9, %c0_10] : memref<16x128xf32, #tpu.memory_space<vmem>>, vector<16x128xf32>
      %c0_11 = arith.constant 0 : index
      %c0_12 = arith.constant 0 : index
      %13 = vector.load %arg5[%c0_11, %c0_12] : memref<1x128xf32, #tpu.memory_space<vmem>>, vector<1x128xf32>
      %14 = vector.broadcast %13 : vector<1x128xf32> to vector<16x128xf32>
      %15 = arith.mulf %12, %14 : vector<16x128xf32>
      %c0_13 = arith.constant 0 : index
      %c0_14 = arith.constant 0 : index
      %16 = vector.load %arg6[%c0_13, %c0_14] : memref<1x128xf32, #tpu.memory_space<vmem>>, vector<1x128xf32>
      %17 = vector.broadcast %16 : vector<1x128xf32> to vector<16x128xf32>
      %18 = arith.addf %15, %17 : vector<16x128xf32>
      %cst_15 = arith.constant 0.000000e+00 : f32
      %19 = vector.broadcast %cst_15 : f32 to vector<16x128xf32>
      %20 = arith.maximumf %18, %19 : vector<16x128xf32>
      %21 = arith.truncf %20 : vector<16x128xf32> to vector<16x128xbf16>
      %c0_16 = arith.constant 0 : index
      %c0_17 = arith.constant 0 : index
      %22 = vector.load %arg7[%c0_16, %c0_17] : memref<16x128xbf16, #tpu.memory_space<vmem>>, vector<16x128xbf16>
      tpu.vector_store %arg7[%c0_16, %c0_17], %21 {strides = array<i32>} : memref<16x128xbf16, #tpu.memory_space<vmem>>, vector<16x128xbf16>,
    } else {
    }
    return
  }
  func.func @transform_0(%arg0: i32, %arg1: i32, %arg2: i32) -> (i32, i32) {
    %c0_i32 = arith.constant 0 : i32
    return %arg0, %arg2 : i32, i32
  }
  func.func @transform_1(%arg0: i32, %arg1: i32, %arg2: i32) -> (i32, i32) {
    %c0_i32 = arith.constant 0 : i32
    return %arg2, %arg1 : i32, i32
  }
  func.func @transform_2(%arg0: i32, %arg1: i32, %arg2: i32) -> (i32, i32) {
    %c0_i32 = arith.constant 0 : i32
    %c0_i32_0 = arith.constant 0 : i32
    return %c0_i32, %arg1 : i32, i32
  }
  func.func @transform_3(%arg0: i32, %arg1: i32, %arg2: i32) -> (i32, i32) {
    %c0_i32 = arith.constant 0 : i32
    %c0_i32_0 = arith.constant 0 : i32
    return %c0_i32, %arg1 : i32, i32
  }
  func.func @transform_4(%arg0: i32, %arg1: i32, %arg2: i32) -> (i32, i32) {
    %c0_i32 = arith.constant 0 : i32
    return %arg0, %arg1 : i32, i32
  }
}

module attributes {stable_mosaic.version = 11 : i64} {
  func.func @_fused_matmul_kernel(%arg0: i32, %arg1: i32, %arg2: i32, %arg3: memref<16x128xbf16, #tpu.memory_space<vmem>>, %arg4: memref<128x128xbf16, #tpu.memory_space<vmem>>, %arg5: memref<1x128xf32, #tpu.memory_space<vmem>>, %arg6: memref<1x128xf32, #tpu.memory_space<vmem>>, %arg7: memref<16x128xbf16, #tpu.memory_space<vmem>>, %arg8: memref<16x128xf32, #tpu.memory_space<vmem>>) attributes {dimension_semantics = [#tpu.dimension_semantics<parallel>, #tpu.dimension_semantics<parallel>, #tpu.dimension_semantics<arbitrary>], iteration_bounds = array<i64: 1, 1, 1>, scalar_prefetch = 0 : i64, scratch_operands = 1 : i64, tpu.core_type = #tpu.core_type<tc>, window_params = [{transform_indices = @transform_0, window_bounds = array<i64: 16, 128>}, {transform_indices = @transform_1, window_bounds = array<i64: 128, 128>}, {transform_indices = @transform_2, window_bounds = array<i64: 1, 128>}, {transform_indices = @transform_3, window_bounds = array<i64: 1, 128>}, {transform_indices = @transform_4, window_bounds = array<i64: 16, 128>}]} {
    %c0_i32 = arith.constant 0 : i32
    %0 = arith.cmpi eq, %arg2, %c0_i32 : i32
    %1 = arith.extui %0 : i1 to i32
    %c0_i32_0 = arith.constant 0 : i32
    %2 = arith.cmpi ne, %1, %c0_i32_0 : i32
    scf.if %2 {
      %cst_10 = arith.constant 0.000000e+00 : f32
      %12 = vector.broadcast %cst_10 : f32 to vector<16x128xf32>
      %c0_11 = arith.constant 0 : index
      %c0_12 = arith.constant 0 : index
      %13 = vector.load %arg8[%c0_11, %c0_12] : memref<16x128xf32, #tpu.memory_space<vmem>>, vector<16x128xf32>
      tpu.vector_store %arg8[%c0_11, %c0_12], %12 {strides = array<i32>} : memref<16x128xf32, #tpu.memory_space<vmem>>, vector<16x128xf32>,
    } else {
    }
    %c0 = arith.constant 0 : index
    %c0_1 = arith.constant 0 : index
    %3 = vector.load %arg8[%c0, %c0_1] : memref<16x128xf32, #tpu.memory_space<vmem>>, vector<16x128xf32>
    %c0_2 = arith.constant 0 : index
    %c0_3 = arith.constant 0 : index
    %4 = vector.load %arg3[%c0_2, %c0_3] : memref<16x128xbf16, #tpu.memory_space<vmem>>, vector<16x128xbf16>
    %c0_4 = arith.constant 0 : index
    %c0_5 = arith.constant 0 : index
    %5 = vector.load %arg4[%c0_4, %c0_5] : memref<128x128xbf16, #tpu.memory_space<vmem>>, vector<128x128xbf16>
    %cst = arith.constant dense<0.000000e+00> : vector<16x128xf32>
    %6 = tpu.matmul %4, %5, %cst {dimension_numbers = #tpu.dot_dimension_numbers<[1], [0], [0], [1], [0, 0, 1, 1], [], []>} : vector<16x128xbf16>, vector<128x128xbf16>, vector<16x128xf32> -> vector<16x128xf32>
    %7 = arith.addf %3, %6 : vector<16x128xf32>
    %c0_6 = arith.constant 0 : index
    %c0_7 = arith.constant 0 : index
    %8 = vector.load %arg8[%c0_6, %c0_7] : memref<16x128xf32, #tpu.memory_space<vmem>>, vector<16x128xf32>
    tpu.vector_store %arg8[%c0_6, %c0_7], %7 {strides = array<i32>} : memref<16x128xf32, #tpu.memory_space<vmem>>, vector<16x128xf32>,
    %c0_i32_8 = arith.constant 0 : i32
    %9 = arith.cmpi eq, %arg2, %c0_i32_8 : i32
    %10 = arith.extui %9 : i1 to i32
    %c0_i32_9 = arith.constant 0 : i32
    %11 = arith.cmpi ne, %10, %c0_i32_9 : i32
    scf.if %11 {
      %c0_10 = arith.constant 0 : index
      %c0_11 = arith.constant 0 : index
      %12 = vector.load %arg8[%c0_10, %c0_11] : memref<16x128xf32, #tpu.memory_space<vmem>>, vector<16x128xf32>
      %c0_12 = arith.constant 0 : index
      %c0_13 = arith.constant 0 : index
      %13 = vector.load %arg5[%c0_12, %c0_13] : memref<1x128xf32, #tpu.memory_space<vmem>>, vector<1x128xf32>
      %14 = vector.broadcast %13 : vector<1x128xf32> to vector<16x128xf32>
      %15 = arith.mulf %12, %14 : vector<16x128xf32>
      %c0_14 = arith.constant 0 : index
      %c0_15 = arith.constant 0 : index
      %16 = vector.load %arg6[%c0_14, %c0_15] : memref<1x128xf32, #tpu.memory_space<vmem>>, vector<1x128xf32>
      %17 = vector.broadcast %16 : vector<1x128xf32> to vector<16x128xf32>
      %18 = arith.addf %15, %17 : vector<16x128xf32>
      %19 = arith.truncf %18 : vector<16x128xf32> to vector<16x128xbf16>
      %c0_16 = arith.constant 0 : index
      %c0_17 = arith.constant 0 : index
      %20 = vector.load %arg7[%c0_16, %c0_17] : memref<16x128xbf16, #tpu.memory_space<vmem>>, vector<16x128xbf16>
      tpu.vector_store %arg7[%c0_16, %c0_17], %19 {strides = array<i32>} : memref<16x128xbf16, #tpu.memory_space<vmem>>, vector<16x128xbf16>,
    } else {
    }
    return
  }
  func.func @transform_0(%arg0: i32, %arg1: i32, %arg2: i32) -> (i32, i32) {
    %c0_i32 = arith.constant 0 : i32
    return %arg0, %arg2 : i32, i32
  }
  func.func @transform_1(%arg0: i32, %arg1: i32, %arg2: i32) -> (i32, i32) {
    %c0_i32 = arith.constant 0 : i32
    return %arg2, %arg1 : i32, i32
  }
  func.func @transform_2(%arg0: i32, %arg1: i32, %arg2: i32) -> (i32, i32) {
    %c0_i32 = arith.constant 0 : i32
    %c0_i32_0 = arith.constant 0 : i32
    return %c0_i32, %arg1 : i32, i32
  }
  func.func @transform_3(%arg0: i32, %arg1: i32, %arg2: i32) -> (i32, i32) {
    %c0_i32 = arith.constant 0 : i32
    %c0_i32_0 = arith.constant 0 : i32
    return %c0_i32, %arg1 : i32, i32
  }
  func.func @transform_4(%arg0: i32, %arg1: i32, %arg2: i32) -> (i32, i32) {
    %c0_i32 = arith.constant 0 : i32
    return %arg0, %arg1 : i32, i32
  }
}

module attributes {stable_mosaic.version = 11 : i64} {
  func.func @_fused_matmul_kernel(%arg0: i32, %arg1: i32, %arg2: i32, %arg3: memref<16x384xbf16, #tpu.memory_space<vmem>>, %arg4: memref<384x128xbf16, #tpu.memory_space<vmem>>, %arg5: memref<1x128xf32, #tpu.memory_space<vmem>>, %arg6: memref<1x128xf32, #tpu.memory_space<vmem>>, %arg7: memref<16x128xbf16, #tpu.memory_space<vmem>>, %arg8: memref<16x128xbf16, #tpu.memory_space<vmem>>, %arg9: memref<16x128xf32, #tpu.memory_space<vmem>>) attributes {dimension_semantics = [#tpu.dimension_semantics<parallel>, #tpu.dimension_semantics<parallel>, #tpu.dimension_semantics<arbitrary>], iteration_bounds = array<i64: 1, 1, 3>, scalar_prefetch = 0 : i64, scratch_operands = 1 : i64, tpu.core_type = #tpu.core_type<tc>, window_params = [{transform_indices = @transform_0, window_bounds = array<i64: 16, 384>}, {transform_indices = @transform_1, window_bounds = array<i64: 384, 128>}, {transform_indices = @transform_2, window_bounds = array<i64: 1, 128>}, {transform_indices = @transform_3, window_bounds = array<i64: 1, 128>}, {transform_indices = @transform_4, window_bounds = array<i64: 16, 128>}, {transform_indices = @transform_5, window_bounds = array<i64: 16, 128>}]} {
    %c0_i32 = arith.constant 0 : i32
    %0 = arith.cmpi eq, %arg2, %c0_i32 : i32
    %1 = arith.extui %0 : i1 to i32
    %c0_i32_0 = arith.constant 0 : i32
    %2 = arith.cmpi ne, %1, %c0_i32_0 : i32
    scf.if %2 {
      %cst_9 = arith.constant 0.000000e+00 : f32
      %12 = vector.broadcast %cst_9 : f32 to vector<16x128xf32>
      %c0_10 = arith.constant 0 : index
      %c0_11 = arith.constant 0 : index
      %13 = vector.load %arg9[%c0_10, %c0_11] : memref<16x128xf32, #tpu.memory_space<vmem>>, vector<16x128xf32>
      tpu.vector_store %arg9[%c0_10, %c0_11], %12 {strides = array<i32>} : memref<16x128xf32, #tpu.memory_space<vmem>>, vector<16x128xf32>,
    } else {
    }
    %c0 = arith.constant 0 : index
    %c0_1 = arith.constant 0 : index
    %3 = vector.load %arg9[%c0, %c0_1] : memref<16x128xf32, #tpu.memory_space<vmem>>, vector<16x128xf32>
    %c0_2 = arith.constant 0 : index
    %c0_3 = arith.constant 0 : index
    %4 = vector.load %arg3[%c0_2, %c0_3] : memref<16x384xbf16, #tpu.memory_space<vmem>>, vector<16x384xbf16>
    %c0_4 = arith.constant 0 : index
    %c0_5 = arith.constant 0 : index
    %5 = vector.load %arg4[%c0_4, %c0_5] : memref<384x128xbf16, #tpu.memory_space<vmem>>, vector<384x128xbf16>
    %cst = arith.constant dense<0.000000e+00> : vector<16x128xf32>
    %6 = tpu.matmul %4, %5, %cst {dimension_numbers = #tpu.dot_dimension_numbers<[1], [0], [0], [1], [0, 0, 1, 1], [], []>} : vector<16x384xbf16>, vector<384x128xbf16>, vector<16x128xf32> -> vector<16x128xf32>
    %7 = arith.addf %3, %6 : vector<16x128xf32>
    %c0_6 = arith.constant 0 : index
    %c0_7 = arith.constant 0 : index
    %8 = vector.load %arg9[%c0_6, %c0_7] : memref<16x128xf32, #tpu.memory_space<vmem>>, vector<16x128xf32>
    tpu.vector_store %arg9[%c0_6, %c0_7], %7 {strides = array<i32>} : memref<16x128xf32, #tpu.memory_space<vmem>>, vector<16x128xf32>,
    %c2_i32 = arith.constant 2 : i32
    %9 = arith.cmpi eq, %arg2, %c2_i32 : i32
    %10 = arith.extui %9 : i1 to i32
    %c0_i32_8 = arith.constant 0 : i32
    %11 = arith.cmpi ne, %10, %c0_i32_8 : i32
    scf.if %11 {
      %c0_9 = arith.constant 0 : index
      %c0_10 = arith.constant 0 : index
      %12 = vector.load %arg9[%c0_9, %c0_10] : memref<16x128xf32, #tpu.memory_space<vmem>>, vector<16x128xf32>
      %c0_11 = arith.constant 0 : index
      %c0_12 = arith.constant 0 : index
      %13 = vector.load %arg5[%c0_11, %c0_12] : memref<1x128xf32, #tpu.memory_space<vmem>>, vector<1x128xf32>
      %14 = vector.broadcast %13 : vector<1x128xf32> to vector<16x128xf32>
      %15 = arith.mulf %12, %14 : vector<16x128xf32>
      %c0_13 = arith.constant 0 : index
      %c0_14 = arith.constant 0 : index
      %16 = vector.load %arg6[%c0_13, %c0_14] : memref<1x128xf32, #tpu.memory_space<vmem>>, vector<1x128xf32>
      %17 = vector.broadcast %16 : vector<1x128xf32> to vector<16x128xf32>
      %18 = arith.addf %15, %17 : vector<16x128xf32>
      %c0_15 = arith.constant 0 : index
      %c0_16 = arith.constant 0 : index
      %19 = vector.load %arg7[%c0_15, %c0_16] : memref<16x128xbf16, #tpu.memory_space<vmem>>, vector<16x128xbf16>
      %20 = arith.extf %19 : vector<16x128xbf16> to vector<16x128xf32>
      %21 = arith.addf %18, %20 : vector<16x128xf32>
      %cst_17 = arith.constant 0.000000e+00 : f32
      %22 = vector.broadcast %cst_17 : f32 to vector<16x128xf32>
      %23 = arith.maximumf %21, %22 : vector<16x128xf32>
      %24 = arith.truncf %23 : vector<16x128xf32> to vector<16x128xbf16>
      %c0_18 = arith.constant 0 : index
      %c0_19 = arith.constant 0 : index
      %25 = vector.load %arg8[%c0_18, %c0_19] : memref<16x128xbf16, #tpu.memory_space<vmem>>, vector<16x128xbf16>
      tpu.vector_store %arg8[%c0_18, %c0_19], %24 {strides = array<i32>} : memref<16x128xbf16, #tpu.memory_space<vmem>>, vector<16x128xbf16>,
    } else {
    }
    return
  }
  func.func @transform_0(%arg0: i32, %arg1: i32, %arg2: i32) -> (i32, i32) {
    %c0_i32 = arith.constant 0 : i32
    return %arg0, %arg2 : i32, i32
  }
  func.func @transform_1(%arg0: i32, %arg1: i32, %arg2: i32) -> (i32, i32) {
    %c0_i32 = arith.constant 0 : i32
    return %arg2, %arg1 : i32, i32
  }
  func.func @transform_2(%arg0: i32, %arg1: i32, %arg2: i32) -> (i32, i32) {
    %c0_i32 = arith.constant 0 : i32
    %c0_i32_0 = arith.constant 0 : i32
    return %c0_i32, %arg1 : i32, i32
  }
  func.func @transform_3(%arg0: i32, %arg1: i32, %arg2: i32) -> (i32, i32) {
    %c0_i32 = arith.constant 0 : i32
    %c0_i32_0 = arith.constant 0 : i32
    return %c0_i32, %arg1 : i32, i32
  }
  func.func @transform_4(%arg0: i32, %arg1: i32, %arg2: i32) -> (i32, i32) {
    %c0_i32 = arith.constant 0 : i32
    return %arg0, %arg1 : i32, i32
  }
  func.func @transform_5(%arg0: i32, %arg1: i32, %arg2: i32) -> (i32, i32) {
    %c0_i32 = arith.constant 0 : i32
    return %arg0, %arg1 : i32, i32
  }
}

module attributes {stable_mosaic.version = 11 : i64} {
  func.func @_gvb_head_kernel(%arg0: i32, %arg1: memref<16x16x128xbf16, #tpu.memory_space<vmem>>, %arg2: memref<128x256xbf16, #tpu.memory_space<vmem>>, %arg3: memref<1x256xf32, #tpu.memory_space<vmem>>, %arg4: memref<16x128xf32, #tpu.memory_space<vmem>>, %arg5: memref<16x128xf32, #tpu.memory_space<vmem>>) attributes {dimension_semantics = [#tpu.dimension_semantics<arbitrary>], iteration_bounds = array<i64: 1>, scalar_prefetch = 0 : i64, scratch_operands = 0 : i64, tpu.core_type = #tpu.core_type<tc>, window_params = [{pipeline_mode = #tpu.pipeline_mode<synchronous>, transform_indices = @transform_0, window_bounds = array<i64: 16, 16, 128>}, {pipeline_mode = #tpu.pipeline_mode<synchronous>, transform_indices = @transform_1, window_bounds = array<i64: 128, 256>}, {pipeline_mode = #tpu.pipeline_mode<synchronous>, transform_indices = @transform_2, window_bounds = array<i64: 1, 256>}, {pipeline_mode = #tpu.pipeline_mode<synchronous>, transform_indices = @transform_3, window_bounds = array<i64: 16, 128>}, {pipeline_mode = #tpu.pipeline_mode<synchronous>, transform_indices = @transform_4, window_bounds = array<i64: 16, 128>}]} {
    %c0 = arith.constant 0 : index
    %c0_0 = arith.constant 0 : index
    %c0_1 = arith.constant 0 : index
    %0 = vector.load %arg1[%c0, %c0_0, %c0_1] : memref<16x16x128xbf16, #tpu.memory_space<vmem>>, vector<16x16x128xbf16>
    %1 = arith.extf %0 : vector<16x16x128xbf16> to vector<16x16x128xf32>
    %cst = arith.constant dense<0.000000e+00> : vector<16x128xf32>
    %2 = vector.multi_reduction <add>, %1, %cst [1] : vector<16x16x128xf32> to vector<16x128xf32>
    %cst_2 = arith.constant 1.000000e+00 : f32
    %3 = vector.broadcast %cst_2 : f32 to vector<16x128xf32>
    %4 = arith.mulf %2, %3 : vector<16x128xf32>
    %5 = arith.truncf %4 : vector<16x128xf32> to vector<16x128xbf16>
    %c0_3 = arith.constant 0 : index
    %c0_4 = arith.constant 0 : index
    %6 = vector.load %arg2[%c0_3, %c0_4] : memref<128x256xbf16, #tpu.memory_space<vmem>>, vector<128x256xbf16>
    %cst_5 = arith.constant dense<0.000000e+00> : vector<16x256xf32>
    %7 = tpu.matmul %5, %6, %cst_5 {dimension_numbers = #tpu.dot_dimension_numbers<[1], [0], [0], [1], [0, 0, 1, 1], [], []>} : vector<16x128xbf16>, vector<128x256xbf16>, vector<16x256xf32> -> vector<16x256xf32>
    %c0_6 = arith.constant 0 : index
    %c0_7 = arith.constant 0 : index
    %8 = vector.load %arg3[%c0_6, %c0_7] : memref<1x256xf32, #tpu.memory_space<vmem>>, vector<1x256xf32>
    %9 = vector.broadcast %8 : vector<1x256xf32> to vector<16x256xf32>
    %10 = arith.addf %7, %9 : vector<16x256xf32>
    %11 = vector.extract_strided_slice %10 {offsets = [0, 0], sizes = [16, 128], strides = [1, 1]} : vector<16x256xf32> to vector<16x128xf32>
    %12 = vector.extract_strided_slice %10 {offsets = [0, 128], sizes = [16, 128], strides = [1, 1]} : vector<16x256xf32> to vector<16x128xf32>
    %13 = arith.subf %11, %12 : vector<16x128xf32>
    %c0_8 = arith.constant 0 : index
    %c0_9 = arith.constant 0 : index
    %14 = vector.load %arg4[%c0_8, %c0_9] : memref<16x128xf32, #tpu.memory_space<vmem>>, vector<16x128xf32>
    tpu.vector_store %arg4[%c0_8, %c0_9], %13 {strides = array<i32>} : memref<16x128xf32, #tpu.memory_space<vmem>>, vector<16x128xf32>,
    %c0_10 = arith.constant 0 : index
    %c0_11 = arith.constant 0 : index
    %15 = vector.load %arg5[%c0_10, %c0_11] : memref<16x128xf32, #tpu.memory_space<vmem>>, vector<16x128xf32>
    tpu.vector_store %arg5[%c0_10, %c0_11], %12 {strides = array<i32>} : memref<16x128xf32, #tpu.memory_space<vmem>>, vector<16x128xf32>,
    return
  }
  func.func @transform_0(%arg0: i32) -> (i32, i32, i32) {
    %c0_i32 = arith.constant 0 : i32
    %c0_i32_0 = arith.constant 0 : i32
    %c0_i32_1 = arith.constant 0 : i32
    %c0_i32_2 = arith.constant 0 : i32
    return %c0_i32, %c0_i32_0, %c0_i32_1 : i32, i32, i32
  }
  func.func @transform_1(%arg0: i32) -> (i32, i32) {
    %c0_i32 = arith.constant 0 : i32
    %c0_i32_0 = arith.constant 0 : i32
    %c0_i32_1 = arith.constant 0 : i32
    return %c0_i32, %c0_i32_0 : i32, i32
  }
  func.func @transform_2(%arg0: i32) -> (i32, i32) {
    %c0_i32 = arith.constant 0 : i32
    %c0_i32_0 = arith.constant 0 : i32
    %c0_i32_1 = arith.constant 0 : i32
    return %c0_i32, %c0_i32_0 : i32, i32
  }
  func.func @transform_3(%arg0: i32) -> (i32, i32) {
    %c0_i32 = arith.constant 0 : i32
    %c0_i32_0 = arith.constant 0 : i32
    %c0_i32_1 = arith.constant 0 : i32
    return %c0_i32, %c0_i32_0 : i32, i32
  }
  func.func @transform_4(%arg0: i32) -> (i32, i32) {
    %c0_i32 = arith.constant 0 : i32
    %c0_i32_0 = arith.constant 0 : i32
    %c0_i32_1 = arith.constant 0 : i32
    return %c0_i32, %c0_i32_0 : i32, i32
  }
}

</mosaic_0001>

<bundles_post_ra>
// kernel: gvb_resnet_forward.22
= control target key start
LH: loop header
LB: loop body
LE: loop exit
PB: predicated region body
PF: predicated region fallthrough
CT: control target
= control target key end

     0   :  { %s1709_s15 = smov 0   ;;  %s1711_s16 = smov 0   ;;  %s1955_s0 = inlined_call_operand.vmem [shape: bf16[512,256], index: 0, kind: input, shape index: {}]   ;;  %s1956_s1 = inlined_call_operand.vmem [shape: bf16[256,128], index: 1, kind: input, shape index: {}]   ;;  %s1957_s2 = inlined_call_operand.vmem [shape: f32[1,128], index: 2, kind: input, shape index: {}]   ;;  %s1958_s3 = inlined_call_operand.vmem [shape: f32[1,128], index: 3, kind: input, shape index: {}]   ;;  %s1959_s4 = inlined_call_operand.vmem [shape: bf16[512,128], index: 4, kind: output, shape index: {}]  }
   0x1   :  { %s1713_s17 = smov 0  }
   0x2 LB: > { %s33_s18 = sadd.s32 1, %s1678_s16  ;;  %p1274_p0 = scmp.ge.s32.totalorder %s1682_s17, 1  ;;  %s1682_s17 = sphi %s1713_s17, %s14_s17   ;;  %s1678_s16 = sphi %s1711_s16, %s1961_s16   ;;  %s1674_s15 = sphi %s1709_s15, %s1960_s15  }
   0x3   : > { %p35_p1 = scmp.ge.s32.totalorder %s33_s18, 2  ;;  %p224_p2 = scmp.lt.s32.totalorder %s1682_s17, 3 }
   0x5   : > { %s1963_s18 = smov (%p35_p1, %s33_s18), 0  ;;  %p225_p3 = pnand %p1274_p0, %p224_p2 }
   0x6   : > { %s1275_s5 = sshll.u32 (!%p225_p3), %s1674_s15, 5 }
   0x7   : > { %228 = sbr.rel (%p225_p3) target bundleno = 308 (0x134), region = 36  ;;  %p274_p4 = scmp.lt.s32.totalorder (!%p225_p3), %s1275_s5, 63 }
   0xc   : > { %v1514_v0 = vld [vmem:[%s1956_s1 + $0x38] sm:$0xff]  ;;  %v1513_v2 = vld [vmem:[%s1956_s1 + $0x30] sm:$0xff]  ;;  %v1512_v4 = vld [vmem:[%s1956_s1 + $0x28] sm:$0xff]  ;;  %s1965_s5 = smov (!%p274_p4, %s1275_s5), 63 }
   0xd   : > { %v1522_v1 = vld [vmem:[%s1956_s1 + $0x78] sm:$0xff]  ;;  %696 = vmatpush.bf16.msra.mxu0 %v1514_v0  ;;  %1618 = vmatpush.bf16.msra.mxu2 %v1514_v0  ;;  %v1521_v3 = vld [vmem:[%s1956_s1 + $0x70] sm:$0xff]  ;;  %v1520_v5 = vld [vmem:[%s1956_s1 + $0x68] sm:$0xff]  ;;  %s1474_s21 = sshll.u32 %s1965_s5, 3  ;;  %s1279_s12 = sshll.u32 %s1965_s5, 2 }
   0xe   : > { %785 = vmatpush.bf16.msra.mxu1 %v1522_v1  ;;  %1626 = vmatpush.bf16.msra.mxu3 %v1522_v1  ;;  %v1511_v6 = vld [vmem:[%s1956_s1 + $0x20] sm:$0xff]  ;;  %v1510_v8 = vld [vmem:[%s1956_s1 + $0x18] sm:$0xff]  ;;  %v1509_v10 = vld [vmem:[%s1956_s1 + $0x10] sm:$0xff]  ;;  %s1775_s26 = scalar_lea.vmem %s1955_s0, %s1474_s21  ;;  %s1869_s15 = scalar_lea.vmem %s1959_s4, %s1279_s12 }
   0xf   : > { %v1519_v7 = vld [vmem:[%s1956_s1 + $0x60] sm:$0xff]  ;;  %v1518_v9 = vld [vmem:[%s1956_s1 + $0x58] sm:$0xff]  ;;  %v1517_v11 = vld [vmem:[%s1956_s1 + $0x50] sm:$0xff] }
  0x10   : > { %v1508_v12 = vld [vmem:[%s1956_s1 + $0x8] sm:$0xff]  ;;  %v1507_v14 = vld [vmem:[%s1956_s1] sm:$0xff]  ;;  %v1290_v28 = vld [vmem:[%s1775_s26 + $0x10] sm:$0xf] }
  0x11   : > { %697 = vmatpush.bf16.msra.mxu0 %v1513_v2  ;;  %1619 = vmatpush.bf16.msra.mxu2 %v1513_v2  ;;  %v1516_v13 = vld [vmem:[%s1956_s1 + $0x48] sm:$0xff]  ;;  %v1515_v15 = vld [vmem:[%s1956_s1 + $0x40] sm:$0xff]  ;;  %v1478_v29 = vld [vmem:[%s1775_s26 + $0x14] sm:$0xf0] }
  0x12   : > { %786 = vmatpush.bf16.msra.mxu1 %v1521_v3  ;;  %1627 = vmatpush.bf16.msra.mxu3 %v1521_v3  ;;  %v1282_v16 = vld [vmem:[%s1775_s26] sm:$0xf]  ;;  %v1476_v17 = vld [vmem:[%s1775_s26 + $0x4] sm:$0xf0]  ;;  %v1475_v20 = vld [vmem:[%s1775_s26 + $0x4] sm:$0xf]  ;;  %v1291_v36 = vor.u32 %v1478_v29, %v1290_v28 }
  0x13   : > { %v1346_v18 = vld [vmem:[%s1775_s26 + $0x80] sm:$0xf]  ;;  %v1492_v19 = vld [vmem:[%s1775_s26 + $0x84] sm:$0xf0]  ;;  %v1284_v21 = vld [vmem:[%s1775_s26 + $0x8] sm:$0xf0]  ;;  %v1283_v24 = vor.u32 %v1476_v17, %v1282_v16 }
  0x14   : > { %v1491_v22 = vld [vmem:[%s1775_s26 + $0x84] sm:$0xf]  ;;  %v1348_v23 = vld [vmem:[%s1775_s26 + $0x88] sm:$0xf0]  ;;  %v1347_v25 = vor.u32 %v1492_v19, %v1346_v18  ;;  %v1287_v26 = vor.u32 %v1475_v20, %v1284_v21  ;;  %v1354_v30 = vld [vmem:[%s1775_s26 + $0x90] sm:$0xf] }
  0x15   : > { %698 = vmatpush.bf16.msra.mxu0 %v1512_v4  ;;  %1620 = vmatpush.bf16.msra.mxu2 %v1512_v4  ;;  %v1351_v27 = vor.u32 %v1491_v22, %v1348_v23  ;;  %v1494_v31 = vld [vmem:[%s1775_s26 + $0x94] sm:$0xf0]  ;;  %v1477_v32 = vld [vmem:[%s1775_s26 + $0x14] sm:$0xf]  ;;  %v1292_v33 = vld [vmem:[%s1775_s26 + $0x18] sm:$0xf0] }
  0x16   : > { %787 = vmatpush.bf16.msra.mxu1 %v1520_v5  ;;  %1628 = vmatpush.bf16.msra.mxu3 %v1520_v5  ;;  %v1493_v34 = vld [vmem:[%s1775_s26 + $0x94] sm:$0xf]  ;;  %v1356_v35 = vld [vmem:[%s1775_s26 + $0x98] sm:$0xf0]  ;;  %v1355_v37 = vor.u32 %v1494_v31, %v1354_v30  ;;  %v1295_v38 = vor.u32 %v1477_v32, %v1292_v33  ;;  %v1298_v40 = vld [vmem:[%s1775_s26 + $0x20] sm:$0xf] }
  0x17   : > { %v1359_v39 = vor.u32 %v1493_v34, %v1356_v35  ;;  %v1480_v41 = vld [vmem:[%s1775_s26 + $0x24] sm:$0xf0]  ;;  %v1362_v42 = vld [vmem:[%s1775_s26 + $0xa0] sm:$0xf]  ;;  %v1479_v44 = vld [vmem:[%s1775_s26 + $0x24] sm:$0xf] }
  0x18   : > { %v1496_v43 = vld [vmem:[%s1775_s26 + $0xa4] sm:$0xf0]  ;;  %v1300_v45 = vld [vmem:[%s1775_s26 + $0x28] sm:$0xf0]  ;;  %v1495_v46 = vld [vmem:[%s1775_s26 + $0xa4] sm:$0xf]  ;;  %v1299_v48 = vor.u32 %v1480_v41, %v1298_v40 }
  0x19   : > { %699 = vmatpush.bf16.msra.mxu0 %v1511_v6  ;;  %1621 = vmatpush.bf16.msra.mxu2 %v1511_v6  ;;  %v1364_v47 = vld [vmem:[%s1775_s26 + $0xa8] sm:$0xf0]  ;;  %v1363_v49 = vor.u32 %v1496_v43, %v1362_v42  ;;  %v1303_v50 = vor.u32 %v1479_v44, %v1300_v45  ;;  %v1306_v52 = vld [vmem:[%s1775_s26 + $0x30] sm:$0xf]  ;;  %v1482_v53 = vld [vmem:[%s1775_s26 + $0x34] sm:$0xf0] }
  0x1a   : > { %788 = vmatpush.bf16.msra.mxu1 %v1519_v7  ;;  %1629 = vmatpush.bf16.msra.mxu3 %v1519_v7  ;;  %v1367_v51 = vor.u32 %v1495_v46, %v1364_v47  ;;  %v1370_v54 = vld [vmem:[%s1775_s26 + $0xb0] sm:$0xf]  ;;  %v1498_v55 = vld [vmem:[%s1775_s26 + $0xb4] sm:$0xf0]  ;;  %v1481_v56 = vld [vmem:[%s1775_s26 + $0x34] sm:$0xf]  ;;  %v1307_v60 = vor.u32 %v1482_v53, %v1306_v52 }
  0x1b   : > { %v1308_v57 = vld [vmem:[%s1775_s26 + $0x38] sm:$0xf0]  ;;  %v1497_v58 = vld [vmem:[%s1775_s26 + $0xb4] sm:$0xf]  ;;  %v1371_v61 = vor.u32 %v1498_v55, %v1370_v54  ;;  %v1314_v0 = vld [vmem:[%s1775_s26 + $0x40] sm:$0xf] }
  0x1c   : > { %v1372_v59 = vld [vmem:[%s1775_s26 + $0xb8] sm:$0xf0]  ;;  %v1311_v62 = vor.u32 %v1481_v56, %v1308_v57  ;;  %v1484_v1 = vld [vmem:[%s1775_s26 + $0x44] sm:$0xf0]  ;;  %v1378_v2 = vld [vmem:[%s1775_s26 + $0xc0] sm:$0xf] }
  0x1d   : > { %700 = vmatpush.bf16.msra.mxu0 %v1510_v8  ;;  %1622 = vmatpush.bf16.msra.mxu2 %v1510_v8  ;;  %v1375_v63 = vor.u32 %v1497_v58, %v1372_v59  ;;  %v1500_v3 = vld [vmem:[%s1775_s26 + $0xc4] sm:$0xf0]  ;;  %v1483_v4 = vld [vmem:[%s1775_s26 + $0x44] sm:$0xf]  ;;  %v1316_v5 = vld [vmem:[%s1775_s26 + $0x48] sm:$0xf0]  ;;  %v1315_v8 = vor.u32 %v1484_v1, %v1314_v0 }
  0x1e   : > { %789 = vmatpush.bf16.msra.mxu1 %v1518_v9  ;;  %1630 = vmatpush.bf16.msra.mxu3 %v1518_v9  ;;  %v1499_v6 = vld [vmem:[%s1775_s26 + $0xc4] sm:$0xf]  ;;  %v1380_v7 = vld [vmem:[%s1775_s26 + $0xc8] sm:$0xf0]  ;;  %v1379_v9 = vor.u32 %v1500_v3, %v1378_v2  ;;  %v1485_v16 = vld [vmem:[%s1775_s26 + $0x54] sm:$0xf] }
  0x1f   : > { %v1324_v17 = vld [vmem:[%s1775_s26 + $0x58] sm:$0xf0]  ;;  %v1501_v18 = vld [vmem:[%s1775_s26 + $0xd4] sm:$0xf]  ;;  %v1487_v28 = vld [vmem:[%s1775_s26 + $0x64] sm:$0xf] }
  0x20   : > { %v1388_v19 = vld [vmem:[%s1775_s26 + $0xd8] sm:$0xf0]  ;;  %v1327_v22 = vor.u32 %v1485_v16, %v1324_v17  ;;  %v1332_v29 = vld [vmem:[%s1775_s26 + $0x68] sm:$0xf0]  ;;  %v1503_v30 = vld [vmem:[%s1775_s26 + $0xe4] sm:$0xf] }
  0x21   : > { %701 = vmatpush.bf16.msra.mxu0 %v1509_v10  ;;  %1623 = vmatpush.bf16.msra.mxu2 %v1509_v10  ;;  %v1319_v10 = vor.u32 %v1483_v4, %v1316_v5  ;;  %v1391_v23 = vor.u32 %v1501_v18, %v1388_v19  ;;  %v1396_v31 = vld [vmem:[%s1775_s26 + $0xe8] sm:$0xf0]  ;;  %v1335_v34 = vor.u32 %v1487_v28, %v1332_v29  ;;  %v1489_v40 = vld [vmem:[%s1775_s26 + $0x74] sm:$0xf]  ;;  %v1340_v41 = vld [vmem:[%s1775_s26 + $0x78] sm:$0xf0] }
  0x22   : > { %790 = vmatpush.bf16.msra.mxu1 %v1517_v11  ;;  %1631 = vmatpush.bf16.msra.mxu3 %v1517_v11  ;;  %v1383_v11 = vor.u32 %v1499_v6, %v1380_v7  ;;  %v1399_v35 = vor.u32 %v1503_v30, %v1396_v31  ;;  %v1505_v42 = vld [vmem:[%s1775_s26 + $0xf4] sm:$0xf]  ;;  %v1404_v43 = vld [vmem:[%s1775_s26 + $0xf8] sm:$0xf0]  ;;  %v1343_v46 = vor.u32 %v1489_v40, %v1340_v41  ;;  %v1859_v55 = vld [vmem:[%s1958_s3] ss:$0 sm:$0xff] }
  0x23   : > { %v1407_v47 = vor.u32 %v1505_v42, %v1404_v43 }
  0x25   : > { %702 = vmatpush.bf16.msra.mxu0 %v1508_v12  ;;  %1624 = vmatpush.bf16.msra.mxu2 %v1508_v12  ;;  %v1322_v12 = vld [vmem:[%s1775_s26 + $0x50] sm:$0xf] }
  0x26   : > { %791 = vmatpush.bf16.msra.mxu1 %v1516_v13  ;;  %1632 = vmatpush.bf16.msra.mxu3 %v1516_v13  ;;  %v1486_v13 = vld [vmem:[%s1775_s26 + $0x54] sm:$0xf0] }
  0x27   : > { %v1323_v20 = vor.u32 %v1486_v13, %v1322_v12 }
  0x29   : > { %703 = vmatpush.bf16.msra.mxu0 %v1507_v14  ;;  %1625 = vmatpush.bf16.msra.mxu2 %v1507_v14  ;;  %v1386_v14 = vld [vmem:[%s1775_s26 + $0xd0] sm:$0xf] }
  0x2a   : > { %792 = vmatpush.bf16.msra.mxu1 %v1515_v15  ;;  %1633 = vmatpush.bf16.msra.mxu3 %v1515_v15  ;;  %v1502_v15 = vld [vmem:[%s1775_s26 + $0xd4] sm:$0xf0] }
  0x2b   : > { %v1387_v21 = vor.u32 %v1502_v15, %v1386_v14 }
  0x2c   : > { %704 = vmatmul.bf16.vlgmr.msra.gmra.mxu0 %v1283_v24  ;;  %744 = vmatmul.bf16.vlgmr.msra.gmra.mxu2 %v1347_v25  ;;  %v1330_v24 = vld [vmem:[%s1775_s26 + $0x60] sm:$0xf]  ;;  %v1488_v25 = vld [vmem:[%s1775_s26 + $0x64] sm:$0xf0] }
  0x2d   : > { %793 = vmatmul.bf16.vlgmr.msra.gmra.mxu1 %v1287_v26  ;;  %833 = vmatmul.bf16.vlgmr.msra.gmra.mxu3 %v1351_v27  ;;  %v1394_v26 = vld [vmem:[%s1775_s26 + $0xe0] sm:$0xf]  ;;  %v1504_v27 = vld [vmem:[%s1775_s26 + $0xe4] sm:$0xf0]  ;;  %v1331_v32 = vor.u32 %v1488_v25, %v1330_v24 }
  0x2e   : > { %v1395_v33 = vor.u32 %v1504_v27, %v1394_v26 }
  0x3c   : > { %709 = vmatmul.bf16.gmra.mxu0 %v1291_v36  ;;  %749 = vmatmul.bf16.gmra.mxu2 %v1355_v37  ;;  %v1338_v36 = vld [vmem:[%s1775_s26 + $0x70] sm:$0xf]  ;;  %v1490_v37 = vld [vmem:[%s1775_s26 + $0x74] sm:$0xf0] }
  0x3d   : > { %798 = vmatmul.bf16.gmra.mxu1 %v1295_v38  ;;  %838 = vmatmul.bf16.gmra.mxu3 %v1359_v39  ;;  %v1402_v38 = vld [vmem:[%s1775_s26 + $0xf0] sm:$0xf]  ;;  %v1506_v39 = vld [vmem:[%s1775_s26 + $0xf4] sm:$0xf0]  ;;  %v1339_v44 = vor.u32 %v1490_v37, %v1338_v36 }
  0x3e   : > { %v1403_v45 = vor.u32 %v1506_v39, %v1402_v38 }
  0x4c   : > { %714 = vmatmul.bf16.gmra.mxu0 %v1299_v48  ;;  %754 = vmatmul.bf16.gmra.mxu2 %v1363_v49 }
  0x4d   : > { %803 = vmatmul.bf16.gmra.mxu1 %v1303_v50  ;;  %843 = vmatmul.bf16.gmra.mxu3 %v1367_v51  ;;  %v1853_v51 = vld [vmem:[%s1957_s2] ss:$0 sm:$0xff] }
  0x5c   : > { %719 = vmatmul.bf16.gmra.mxu0 %v1307_v60  ;;  %759 = vmatmul.bf16.gmra.mxu2 %v1371_v61 }
  0x5d   : > { %808 = vmatmul.bf16.gmra.mxu1 %v1311_v62  ;;  %848 = vmatmul.bf16.gmra.mxu3 %v1375_v63 }
  0x6c   : > { %724 = vmatmul.bf16.gmra.mxu0 %v1315_v8  ;;  %764 = vmatmul.bf16.gmra.mxu2 %v1379_v9 }
  0x6d   : > { %813 = vmatmul.bf16.gmra.mxu1 %v1319_v10  ;;  %853 = vmatmul.bf16.gmra.mxu3 %v1383_v11 }
  0x7c   : > { %729 = vmatmul.bf16.gmra.mxu0 %v1323_v20  ;;  %769 = vmatmul.bf16.gmra.mxu2 %v1387_v21 }
  0x7d   : > { %818 = vmatmul.bf16.gmra.mxu1 %v1327_v22  ;;  %858 = vmatmul.bf16.gmra.mxu3 %v1391_v23 }
  0x8c   : > { %734 = vmatmul.bf16.gmra.mxu0 %v1331_v32  ;;  %774 = vmatmul.bf16.gmra.mxu2 %v1395_v33 }
  0x8d   : > { %823 = vmatmul.bf16.gmra.mxu1 %v1335_v34  ;;  %863 = vmatmul.bf16.gmra.mxu3 %v1399_v35 }
  0x9c   : > { %739 = vmatmul.bf16.gmra.mxu0 %v1339_v44  ;;  %779 = vmatmul.bf16.gmra.mxu2 %v1403_v45 }
  0x9d   : > { %828 = vmatmul.bf16.gmra.mxu1 %v1343_v46  ;;  %868 = vmatmul.bf16.gmra.mxu3 %v1407_v47 }
  0xa9   : > { %v705_v48 = vpop.f32.mrf.mxu0 }
  0xaa   : > { %v794_v49 = vpop.f32.mrf.mxu1 }
  0xab   : > { %v795_v50 = vadd.f32 %v794_v49, %v705_v48 }
  0xad   : > { %v977_v54 = vmul.f32 %v1853_v51, %v795_v50 }
  0xaf   : > { %v745_v52 = vpop.f32.mrf.mxu2  ;;  %v1013_v60 = vadd.f32 %v1859_v55, %v977_v54 }
  0xb0   : > { %v834_v53 = vpop.f32.mrf.mxu3 }
  0xb1   : > { %v707_v56 = vpop.f32.mrf.mxu0  ;;  %v835_v58 = vadd.f32 %v834_v53, %v745_v52  ;;  %v1045_v2 = vmax.f32 %v1013_v60, 0.0 }
  0xb2   : > { %v796_v57 = vpop.f32.mrf.mxu1 }
  0xb3   : > { %v797_v59 = vadd.f32 %v796_v57, %v707_v56  ;;  %v993_v62 = vmul.f32 %v1853_v51, %v835_v58 }
  0xb5   : > { %v978_v61 = vmul.f32 %v1853_v51, %v797_v59  ;;  %v1029_v7 = vadd.f32 %v1859_v55, %v993_v62 }
  0xb7   : > { %v1014_v63 = vadd.f32 %v1859_v55, %v978_v61  ;;  %v747_v0 = vpop.f32.mrf.mxu2  ;;  %v1061_v12 = vmax.f32 %v1029_v7, 0.0 }
  0xb8   : > { %v836_v1 = vpop.f32.mrf.mxu3 }
  0xb9   : > { %v1046_v3 = vmax.f32 %v1014_v63, 0.0  ;;  %v837_v4 = vadd.f32 %v836_v1, %v747_v0  ;;  %v710_v5 = vpop.f32.mrf.mxu0 }
  0xba   : > { %v799_v6 = vpop.f32.mrf.mxu1 }
  0xbb   : > { %v1526_v8 = vpack.c.bf16 %v1046_v3, %v1045_v2  ;;  %v994_v9 = vmul.f32 %v1853_v51, %v837_v4  ;;  %v800_v11 = vadd.f32 %v799_v6, %v710_v5 }
  0xbd   : > { %1527 = vst [vmem:[%s1869_s15] sm:$0xff] %v1526_v8   ;;  %v1030_v10 = vadd.f32 %v1859_v55, %v994_v9  ;;  %v979_v17 = vmul.f32 %v1853_v51, %v800_v11 }
  0xbf   : > { %v1062_v13 = vmax.f32 %v1030_v10, 0.0  ;;  %v750_v14 = vpop.f32.mrf.mxu2  ;;  %v1015_v22 = vadd.f32 %v1859_v55, %v979_v17 }
  0xc0   : > { %v839_v15 = vpop.f32.mrf.mxu3 }
  0xc1   : > { %v1566_v16 = vpack.c.bf16 %v1062_v13, %v1061_v12  ;;  %v712_v18 = vpop.f32.mrf.mxu0  ;;  %v840_v20 = vadd.f32 %v839_v15, %v750_v14  ;;  %v1047_v28 = vmax.f32 %v1015_v22, 0.0 }
  0xc2   : > { %v801_v19 = vpop.f32.mrf.mxu1 }
  0xc3   : > { %1610 = vst [vmem:[%s1869_s15 + $0x40] sm:$0xff] %v1566_v16   ;;  %v802_v21 = vadd.f32 %v801_v19, %v712_v18  ;;  %v995_v24 = vmul.f32 %v1853_v51, %v840_v20 }
  0xc5   : > { %v980_v23 = vmul.f32 %v1853_v51, %v802_v21  ;;  %v1031_v33 = vadd.f32 %v1859_v55, %v995_v24 }
  0xc7   : > { %v1016_v25 = vadd.f32 %v1859_v55, %v980_v23  ;;  %v752_v26 = vpop.f32.mrf.mxu2  ;;  %v1063_v38 = vmax.f32 %v1031_v33, 0.0 }
  0xc8   : > { %v841_v27 = vpop.f32.mrf.mxu3 }
  0xc9   : > { %v1048_v29 = vmax.f32 %v1016_v25, 0.0  ;;  %v842_v30 = vadd.f32 %v841_v27, %v752_v26  ;;  %v715_v31 = vpop.f32.mrf.mxu0 }
  0xca   : > { %v804_v32 = vpop.f32.mrf.mxu1 }
  0xcb   : > { %v1531_v34 = vpack.c.bf16 %v1048_v29, %v1047_v28  ;;  %v996_v35 = vmul.f32 %v1853_v51, %v842_v30  ;;  %v805_v37 = vadd.f32 %v804_v32, %v715_v31 }
  0xcd   : > { %1603 = vst [vmem:[%s1869_s15 + $0x8] sm:$0xff] %v1531_v34   ;;  %v1032_v36 = vadd.f32 %v1859_v55, %v996_v35  ;;  %v981_v43 = vmul.f32 %v1853_v51, %v805_v37 }
  0xcf   : > { %v1064_v39 = vmax.f32 %v1032_v36, 0.0  ;;  %v755_v40 = vpop.f32.mrf.mxu2  ;;  %v1017_v48 = vadd.f32 %v1859_v55, %v981_v43 }
  0xd0   : > { %v844_v41 = vpop.f32.mrf.mxu3 }
  0xd1   : > { %v1571_v42 = vpack.c.bf16 %v1064_v39, %v1063_v38  ;;  %v717_v44 = vpop.f32.mrf.mxu0  ;;  %v845_v46 = vadd.f32 %v844_v41, %v755_v40  ;;  %v1049_v56 = vmax.f32 %v1017_v48, 0.0 }
  0xd2   : > { %v806_v45 = vpop.f32.mrf.mxu1 }
  0xd3   : > { %1611 = vst [vmem:[%s1869_s15 + $0x48] sm:$0xff] %v1571_v42   ;;  %v807_v47 = vadd.f32 %v806_v45, %v717_v44  ;;  %v997_v50 = vmul.f32 %v1853_v51, %v845_v46 }
  0xd5   : > { %v982_v49 = vmul.f32 %v1853_v51, %v807_v47  ;;  %v1033_v61 = vadd.f32 %v1859_v55, %v997_v50 }
  0xd7   : > { %v1018_v52 = vadd.f32 %v1859_v55, %v982_v49  ;;  %v757_v53 = vpop.f32.mrf.mxu2  ;;  %v1065_v2 = vmax.f32 %v1033_v61, 0.0 }
  0xd8   : > { %v846_v54 = vpop.f32.mrf.mxu3 }
  0xd9   : > { %v1050_v57 = vmax.f32 %v1018_v52, 0.0  ;;  %v847_v58 = vadd.f32 %v846_v54, %v757_v53  ;;  %v720_v59 = vpop.f32.mrf.mxu0 }
  0xda   : > { %v809_v60 = vpop.f32.mrf.mxu1 }
  0xdb   : > { %v1536_v62 = vpack.c.bf16 %v1050_v57, %v1049_v56  ;;  %v998_v63 = vmul.f32 %v1853_v51, %v847_v58  ;;  %v810_v1 = vadd.f32 %v809_v60, %v720_v59 }
  0xdd   : > { %1604 = vst [vmem:[%s1869_s15 + $0x10] sm:$0xff] %v1536_v62   ;;  %v1034_v0 = vadd.f32 %v1859_v55, %v998_v63  ;;  %v983_v7 = vmul.f32 %v1853_v51, %v810_v1 }
  0xdf   : > { %v1066_v3 = vmax.f32 %v1034_v0, 0.0  ;;  %v760_v4 = vpop.f32.mrf.mxu2  ;;  %v1019_v12 = vadd.f32 %v1859_v55, %v983_v7 }
  0xe0   : > { %v849_v5 = vpop.f32.mrf.mxu3 }
  0xe1   : > { %v1576_v6 = vpack.c.bf16 %v1066_v3, %v1065_v2  ;;  %v722_v8 = vpop.f32.mrf.mxu0  ;;  %v850_v10 = vadd.f32 %v849_v5, %v760_v4  ;;  %v1051_v18 = vmax.f32 %v1019_v12, 0.0 }
  0xe2   : > { %v811_v9 = vpop.f32.mrf.mxu1 }
  0xe3   : > { %1612 = vst [vmem:[%s1869_s15 + $0x50] sm:$0xff] %v1576_v6   ;;  %v812_v11 = vadd.f32 %v811_v9, %v722_v8  ;;  %v999_v14 = vmul.f32 %v1853_v51, %v850_v10 }
  0xe5   : > { %v984_v13 = vmul.f32 %v1853_v51, %v812_v11  ;;  %v1035_v23 = vadd.f32 %v1859_v55, %v999_v14 }
  0xe7   : > { %v1020_v15 = vadd.f32 %v1859_v55, %v984_v13  ;;  %v762_v16 = vpop.f32.mrf.mxu2  ;;  %v1067_v28 = vmax.f32 %v1035_v23, 0.0 }
  0xe8   : > { %v851_v17 = vpop.f32.mrf.mxu3 }
  0xe9   : > { %v1052_v19 = vmax.f32 %v1020_v15, 0.0  ;;  %v852_v20 = vadd.f32 %v851_v17, %v762_v16  ;;  %v725_v21 = vpop.f32.mrf.mxu0 }
  0xea   : > { %v814_v22 = vpop.f32.mrf.mxu1 }
  0xeb   : > { %v1541_v24 = vpack.c.bf16 %v1052_v19, %v1051_v18  ;;  %v1000_v25 = vmul.f32 %v1853_v51, %v852_v20  ;;  %v815_v27 = vadd.f32 %v814_v22, %v725_v21 }
  0xed   : > { %1605 = vst [vmem:[%s1869_s15 + $0x18] sm:$0xff] %v1541_v24   ;;  %v1036_v26 = vadd.f32 %v1859_v55, %v1000_v25  ;;  %v985_v33 = vmul.f32 %v1853_v51, %v815_v27 }
  0xef   : > { %v1068_v29 = vmax.f32 %v1036_v26, 0.0  ;;  %v765_v30 = vpop.f32.mrf.mxu2  ;;  %v1021_v38 = vadd.f32 %v1859_v55, %v985_v33 }
  0xf0   : > { %v854_v31 = vpop.f32.mrf.mxu3 }
  0xf1   : > { %v1581_v32 = vpack.c.bf16 %v1068_v29, %v1067_v28  ;;  %v727_v34 = vpop.f32.mrf.mxu0  ;;  %v855_v36 = vadd.f32 %v854_v31, %v765_v30  ;;  %v1053_v44 = vmax.f32 %v1021_v38, 0.0 }
  0xf2   : > { %v816_v35 = vpop.f32.mrf.mxu1 }
  0xf3   : > { %1613 = vst [vmem:[%s1869_s15 + $0x58] sm:$0xff] %v1581_v32   ;;  %v817_v37 = vadd.f32 %v816_v35, %v727_v34  ;;  %v1001_v40 = vmul.f32 %v1853_v51, %v855_v36 }
  0xf5   : > { %v986_v39 = vmul.f32 %v1853_v51, %v817_v37  ;;  %v1037_v49 = vadd.f32 %v1859_v55, %v1001_v40 }
  0xf7   : > { %v1022_v41 = vadd.f32 %v1859_v55, %v986_v39  ;;  %v767_v42 = vpop.f32.mrf.mxu2  ;;  %v1069_v56 = vmax.f32 %v1037_v49, 0.0 }
  0xf8   : > { %v856_v43 = vpop.f32.mrf.mxu3 }
  0xf9   : > { %v1054_v45 = vmax.f32 %v1022_v41, 0.0  ;;  %v857_v46 = vadd.f32 %v856_v43, %v767_v42  ;;  %v730_v47 = vpop.f32.mrf.mxu0 }
  0xfa   : > { %v819_v48 = vpop.f32.mrf.mxu1 }
  0xfb   : > { %v1546_v50 = vpack.c.bf16 %v1054_v45, %v1053_v44  ;;  %v1002_v52 = vmul.f32 %v1853_v51, %v857_v46  ;;  %v820_v54 = vadd.f32 %v819_v48, %v730_v47 }
  0xfd   : > { %1606 = vst [vmem:[%s1869_s15 + $0x20] sm:$0xff] %v1546_v50   ;;  %v1038_v53 = vadd.f32 %v1859_v55, %v1002_v52  ;;  %v987_v61 = vmul.f32 %v1853_v51, %v820_v54 }
  0xff   : > { %v1070_v57 = vmax.f32 %v1038_v53, 0.0  ;;  %v770_v58 = vpop.f32.mrf.mxu2  ;;  %v1023_v2 = vadd.f32 %v1859_v55, %v987_v61 }
 0x100   : > { %v859_v59 = vpop.f32.mrf.mxu3 }
 0x101   : > { %v1586_v60 = vpack.c.bf16 %v1070_v57, %v1069_v56  ;;  %v732_v62 = vpop.f32.mrf.mxu0  ;;  %v860_v0 = vadd.f32 %v859_v59, %v770_v58  ;;  %v1055_v8 = vmax.f32 %v1023_v2, 0.0 }
 0x102   : > { %v821_v63 = vpop.f32.mrf.mxu1 }
 0x103   : > { %1614 = vst [vmem:[%s1869_s15 + $0x60] sm:$0xff] %v1586_v60   ;;  %v822_v1 = vadd.f32 %v821_v63, %v732_v62  ;;  %v1003_v4 = vmul.f32 %v1853_v51, %v860_v0 }
 0x105   : > { %v988_v3 = vmul.f32 %v1853_v51, %v822_v1  ;;  %v1039_v13 = vadd.f32 %v1859_v55, %v1003_v4 }
 0x107   : > { %v1024_v5 = vadd.f32 %v1859_v55, %v988_v3  ;;  %v772_v6 = vpop.f32.mrf.mxu2  ;;  %v1071_v18 = vmax.f32 %v1039_v13, 0.0 }
 0x108   : > { %v861_v7 = vpop.f32.mrf.mxu3 }
 0x109   : > { %v1056_v9 = vmax.f32 %v1024_v5, 0.0  ;;  %v862_v10 = vadd.f32 %v861_v7, %v772_v6  ;;  %v735_v11 = vpop.f32.mrf.mxu0 }
 0x10a   : > { %v824_v12 = vpop.f32.mrf.mxu1 }
 0x10b   : > { %v1551_v14 = vpack.c.bf16 %v1056_v9, %v1055_v8  ;;  %v1004_v15 = vmul.f32 %v1853_v51, %v862_v10  ;;  %v825_v17 = vadd.f32 %v824_v12, %v735_v11 }
 0x10d   : > { %1607 = vst [vmem:[%s1869_s15 + $0x28] sm:$0xff] %v1551_v14   ;;  %v1040_v16 = vadd.f32 %v1859_v55, %v1004_v15  ;;  %v989_v23 = vmul.f32 %v1853_v51, %v825_v17 }
 0x10f   : > { %v1072_v19 = vmax.f32 %v1040_v16, 0.0  ;;  %v775_v20 = vpop.f32.mrf.mxu2  ;;  %v1025_v28 = vadd.f32 %v1859_v55, %v989_v23 }
 0x110   : > { %v864_v21 = vpop.f32.mrf.mxu3 }
 0x111   : > { %v1591_v22 = vpack.c.bf16 %v1072_v19, %v1071_v18  ;;  %v737_v24 = vpop.f32.mrf.mxu0  ;;  %v865_v26 = vadd.f32 %v864_v21, %v775_v20  ;;  %v1057_v34 = vmax.f32 %v1025_v28, 0.0 }
 0x112   : > { %v826_v25 = vpop.f32.mrf.mxu1 }
 0x113   : > { %1615 = vst [vmem:[%s1869_s15 + $0x68] sm:$0xff] %v1591_v22   ;;  %v827_v27 = vadd.f32 %v826_v25, %v737_v24  ;;  %v1005_v30 = vmul.f32 %v1853_v51, %v865_v26 }
 0x115   : > { %v990_v29 = vmul.f32 %v1853_v51, %v827_v27  ;;  %v1041_v39 = vadd.f32 %v1859_v55, %v1005_v30 }
 0x117   : > { %v1026_v31 = vadd.f32 %v1859_v55, %v990_v29  ;;  %v777_v32 = vpop.f32.mrf.mxu2  ;;  %v1073_v44 = vmax.f32 %v1041_v39, 0.0 }
 0x118   : > { %v866_v33 = vpop.f32.mrf.mxu3 }
 0x119   : > { %v1058_v35 = vmax.f32 %v1026_v31, 0.0  ;;  %v867_v36 = vadd.f32 %v866_v33, %v777_v32  ;;  %v740_v37 = vpop.f32.mrf.mxu0 }
 0x11a   : > { %v829_v38 = vpop.f32.mrf.mxu1 }
 0x11b   : > { %v1556_v40 = vpack.c.bf16 %v1058_v35, %v1057_v34  ;;  %v1006_v41 = vmul.f32 %v1853_v51, %v867_v36  ;;  %v830_v43 = vadd.f32 %v829_v38, %v740_v37 }
 0x11d   : > { %1608 = vst [vmem:[%s1869_s15 + $0x30] sm:$0xff] %v1556_v40   ;;  %v1042_v42 = vadd.f32 %v1859_v55, %v1006_v41  ;;  %v991_v49 = vmul.f32 %v1853_v51, %v830_v43 }
 0x11f   : > { %v1074_v45 = vmax.f32 %v1042_v42, 0.0  ;;  %v780_v46 = vpop.f32.mrf.mxu2  ;;  %v1027_v56 = vadd.f32 %v1859_v55, %v991_v49 }
 0x120   : > { %v869_v47 = vpop.f32.mrf.mxu3 }
 0x121   : > { %v1596_v48 = vpack.c.bf16 %v1074_v45, %v1073_v44  ;;  %v742_v50 = vpop.f32.mrf.mxu0  ;;  %v870_v53 = vadd.f32 %v869_v47, %v780_v46  ;;  %v1059_v62 = vmax.f32 %v1027_v56, 0.0 }
 0x122   : > { %v831_v52 = vpop.f32.mrf.mxu1 }
 0x123   : > { %1616 = vst [vmem:[%s1869_s15 + $0x70] sm:$0xff] %v1596_v48   ;;  %v832_v54 = vadd.f32 %v831_v52, %v742_v50  ;;  %v1007_v58 = vmul.f32 %v1853_v51, %v870_v53 }
 0x125   : > { %v992_v57 = vmul.f32 %v1853_v51, %v832_v54  ;;  %v1043_v1 = vadd.f32 %v1859_v55, %v1007_v58 }
 0x127   : > { %v1028_v59 = vadd.f32 %v1859_v55, %v992_v57  ;;  %v782_v60 = vpop.f32.mrf.mxu2  ;;  %v1075_v5 = vmax.f32 %v1043_v1, 0.0 }
 0x128   : > { %v871_v61 = vpop.f32.mrf.mxu3 }
 0x129   : > { %v1060_v63 = vmax.f32 %v1028_v59, 0.0  ;;  %v872_v0 = vadd.f32 %v871_v61, %v782_v60 }
 0x12b   : > { %v1561_v2 = vpack.c.bf16 %v1060_v63, %v1059_v62  ;;  %v1008_v3 = vmul.f32 %v1853_v51, %v872_v0 }
 0x12d   : > { %1609 = vst [vmem:[%s1869_s15 + $0x38] sm:$0xff] %v1561_v2   ;;  %v1044_v4 = vadd.f32 %v1859_v55, %v1008_v3 }
 0x12f   : > { %v1076_v6 = vmax.f32 %v1044_v4, 0.0 }
 0x131   : > { %v1601_v7 = vpack.c.bf16 %v1076_v6, %v1075_v5 }
 0x133   : > { %1617 = vst [vmem:[%s1869_s15 + $0x78] sm:$0xff] %v1601_v7  }
 0x134 PF: > { %s14_s17 = sadd.s32 1, %s1682_s17   ;;  %s1960_s15 = smov %s1678_s16 }
 0x135   : > { %p11_p5 = scmp.ge.s32.totalorder %s14_s17, 4   ;;  %s1961_s16 = smov %s1963_s18 }
 0x137   :  { %13 = sbr.rel (!%p11_p5) target bundleno = 2 (0x2), region = 83 }

// kernel: gvb_resnet_forward.23
= control target key start
LH: loop header
LB: loop body
LE: loop exit
PB: predicated region body
PF: predicated region fallthrough
CT: control target
= control target key end

     0   :  { %s1404_s0 = inlined_call_operand.vmem [shape: bf16[128,128], index: 0, kind: input, shape index: {}]   ;;  %s1405_s1 = inlined_call_operand.vmem [shape: bf16[128,128], index: 1, kind: input, shape index: {}]   ;;  %s1406_s2 = inlined_call_operand.vmem [shape: bf16[128,128], index: 2, kind: input, shape index: {}]   ;;  %s1407_s3 = inlined_call_operand.vmem [shape: bf16[128,128], index: 3, kind: input, shape index: {}]   ;;  %s1408_s4 = inlined_call_operand.vmem [shape: bf16[128,128], index: 4, kind: input, shape index: {}]   ;;  %s1409_s5 = inlined_call_operand.vmem [shape: bf16[128,128], index: 5, kind: input, shape index: {}]   ;;  %s1410_s6 = inlined_call_operand.vmem [shape: bf16[128,128], index: 6, kind: input, shape index: {}]   ;;  %s1411_s7 = inlined_call_operand.vmem [shape: bf16[128,128], index: 7, kind: input, shape index: {}]   ;;  %s1412_s8 = inlined_call_operand.vmem [shape: bf16[128,128], index: 8, kind: input, shape index: {}]   ;;  %s1413_s9 = inlined_call_operand.vmem [shape: bf16[128,128], index: 9, kind: output, shape index: {}]  }
   0x1   :  { %v709_v0 = vld [vmem:[%s1404_s0] sm:$0xff]   ;;  %v1036_v20 = vld [vmem:[%s1404_s0 + $0x8] sm:$0xff]   ;;  %v1037_v61 = vld [vmem:[%s1404_s0 + $0x10] sm:$0xff]  }
   0x2   :  { %v741_v1 = vld [vmem:[%s1405_s1] sm:$0xff]   ;;  %v710_v3 = vunpack.c.l.bf16 %v709_v0  ;;  %v711_v4 = vunpack.c.h.bf16 %v709_v0  ;;  %v1043_v25 = vld [vmem:[%s1405_s1 + $0x8] sm:$0xff]   ;;  %v714_v34 = vunpack.c.l.bf16 %v1036_v20  ;;  %v715_v35 = vunpack.c.h.bf16 %v1036_v20 }
   0x3   :  { %v773_v2 = vld [vmem:[%s1406_s2] sm:$0xff]   ;;  %v742_v5 = vunpack.c.l.bf16 %v741_v1  ;;  %v743_v6 = vunpack.c.h.bf16 %v741_v1  ;;  %v1050_v30 = vld [vmem:[%s1406_s2 + $0x8] sm:$0xff]   ;;  %v746_v38 = vunpack.c.l.bf16 %v1043_v25  ;;  %v747_v39 = vunpack.c.h.bf16 %v1043_v25  ;;  %v1065_v25 = vld [vmem:[%s1408_s4 + $0x10] sm:$0xff]  }
   0x4   :  { %v805_v7 = vld [vmem:[%s1407_s3] sm:$0xff]   ;;  %v774_v10 = vunpack.c.l.bf16 %v773_v2  ;;  %v775_v11 = vunpack.c.h.bf16 %v773_v2  ;;  %v1057_v31 = vld [vmem:[%s1407_s3 + $0x8] sm:$0xff]   ;;  %v778_v42 = vunpack.c.l.bf16 %v1050_v30  ;;  %v779_v43 = vunpack.c.h.bf16 %v1050_v30  ;;  %v1072_v30 = vld [vmem:[%s1409_s5 + $0x10] sm:$0xff]  }
   0x5   :  { %v837_v8 = vld [vmem:[%s1408_s4] sm:$0xff]   ;;  %v806_v12 = vunpack.c.l.bf16 %v805_v7  ;;  %v96_v15 = vmax.f32 %v710_v3, %v742_v5  ;;  %v97_v16 = vmax.f32 %v711_v4, %v743_v6  ;;  %v807_v17 = vunpack.c.h.bf16 %v805_v7  ;;  %v1064_v40 = vld [vmem:[%s1408_s4 + $0x8] sm:$0xff]   ;;  %v1044_v6 = vld [vmem:[%s1405_s1 + $0x10] sm:$0xff]  }
   0x6   :  { %v869_v9 = vld [vmem:[%s1409_s5] sm:$0xff]   ;;  %v838_v18 = vunpack.c.l.bf16 %v837_v8  ;;  %v839_v21 = vunpack.c.h.bf16 %v837_v8  ;;  %v1071_v41 = vld [vmem:[%s1409_s5 + $0x8] sm:$0xff]   ;;  %v810_v44 = vunpack.c.l.bf16 %v1057_v31  ;;  %v811_v45 = vunpack.c.h.bf16 %v1057_v31  ;;  %v1051_v7 = vld [vmem:[%s1406_s2 + $0x10] sm:$0xff]  }
   0x7   :  { %v901_v13 = vld [vmem:[%s1410_s6] sm:$0xff]   ;;  %v870_v22 = vunpack.c.l.bf16 %v869_v9  ;;  %v871_v23 = vunpack.c.h.bf16 %v869_v9  ;;  %v176_v26 = vmax.f32 %v96_v15, %v774_v10  ;;  %v177_v27 = vmax.f32 %v97_v16, %v775_v11  ;;  %v1078_v50 = vld [vmem:[%s1410_s6 + $0x8] sm:$0xff]   ;;  %v1058_v16 = vld [vmem:[%s1407_s3 + $0x10] sm:$0xff]  }
   0x8   :  { %v1180_v14 = vld [vmem:[%s1411_s7] sm:$0xff]   ;;  %v902_v24 = vunpack.c.l.bf16 %v901_v13  ;;  %v903_v28 = vunpack.c.h.bf16 %v901_v13  ;;  %v98_v48 = vmax.f32 %v714_v34, %v746_v38  ;;  %v99_v49 = vmax.f32 %v715_v35, %v747_v39  ;;  %v1085_v51 = vld [vmem:[%s1411_s7 + $0x8] sm:$0xff]  }
   0x9   :  { %v1185_v19 = vld [vmem:[%s1412_s8] sm:$0xff]   ;;  %v934_v29 = vunpack.c.l.bf16 %v1180_v14  ;;  %v935_v32 = vunpack.c.h.bf16 %v1180_v14  ;;  %v256_v36 = vmax.f32 %v176_v26, %v806_v12  ;;  %v257_v37 = vmax.f32 %v177_v27, %v807_v17  ;;  %v1092_v60 = vld [vmem:[%s1412_s8 + $0x8] sm:$0xff]  }
   0xa   :  { %v966_v33 = vunpack.c.l.bf16 %v1185_v19  ;;  %v967_v52 = vunpack.c.h.bf16 %v1185_v19  ;;  %v842_v53 = vunpack.c.l.bf16 %v1064_v40  ;;  %v843_v54 = vunpack.c.h.bf16 %v1064_v40  ;;  %v1086_v40 = vld [vmem:[%s1411_s7 + $0x10] sm:$0xff]  }
   0xb   :  { %v336_v46 = vmax.f32 %v256_v36, %v838_v18  ;;  %v337_v47 = vmax.f32 %v257_v37, %v839_v21  ;;  %v874_v55 = vunpack.c.l.bf16 %v1071_v41  ;;  %v178_v58 = vmax.f32 %v98_v48, %v778_v42 }
   0xc   :  { %v179_v59 = vmax.f32 %v99_v49, %v779_v43  ;;  %v875_v62 = vunpack.c.h.bf16 %v1071_v41  ;;  %v906_v63 = vunpack.c.l.bf16 %v1078_v50  ;;  %v907_v0 = vunpack.c.h.bf16 %v1078_v50 }
   0xd   :  { %v416_v56 = vmax.f32 %v336_v46, %v870_v22  ;;  %v417_v57 = vmax.f32 %v337_v47, %v871_v23  ;;  %v938_v1 = vunpack.c.l.bf16 %v1085_v51  ;;  %v258_v4 = vmax.f32 %v178_v58, %v810_v44  ;;  %v1038_v46 = vld [vmem:[%s1404_s0 + $0x18] sm:$0xff]  }
   0xe   :  { %v259_v5 = vmax.f32 %v179_v59, %v811_v45  ;;  %v939_v8 = vunpack.c.h.bf16 %v1085_v51  ;;  %v970_v9 = vunpack.c.l.bf16 %v1092_v60  ;;  %v718_v10 = vunpack.c.l.bf16 %v1037_v61  ;;  %v1093_v45 = vld [vmem:[%s1412_s8 + $0x10] sm:$0xff]   ;;  %v1045_v51 = vld [vmem:[%s1405_s1 + $0x18] sm:$0xff]  }
   0xf   :  { %v496_v2 = vmax.f32 %v416_v56, %v902_v24  ;;  %v497_v3 = vmax.f32 %v417_v57, %v903_v28  ;;  %v719_v11 = vunpack.c.h.bf16 %v1037_v61  ;;  %v338_v14 = vmax.f32 %v258_v4, %v842_v53  ;;  %v1052_v56 = vld [vmem:[%s1406_s2 + $0x18] sm:$0xff]  }
  0x10   :  { %v339_v15 = vmax.f32 %v259_v5, %v843_v54  ;;  %v750_v17 = vunpack.c.l.bf16 %v1044_v6  ;;  %v751_v18 = vunpack.c.h.bf16 %v1044_v6  ;;  %v782_v19 = vunpack.c.l.bf16 %v1051_v7  ;;  %v1059_v61 = vld [vmem:[%s1407_s3 + $0x18] sm:$0xff]  }
  0x11   :  { %v576_v12 = vmax.f32 %v496_v2, %v934_v29  ;;  %v577_v13 = vmax.f32 %v497_v3, %v935_v32  ;;  %v783_v20 = vunpack.c.h.bf16 %v1051_v7  ;;  %v418_v23 = vmax.f32 %v338_v14, %v874_v55  ;;  %v1066_v2 = vld [vmem:[%s1408_s4 + $0x18] sm:$0xff]  }
  0x12   :  { %v419_v24 = vmax.f32 %v339_v15, %v875_v62  ;;  %v100_v26 = vmax.f32 %v718_v10, %v750_v17  ;;  %v101_v27 = vmax.f32 %v719_v11, %v751_v18  ;;  %v814_v28 = vunpack.c.l.bf16 %v1058_v16  ;;  %v1073_v7 = vld [vmem:[%s1409_s5 + $0x18] sm:$0xff]  }
  0x13   :  { %v656_v21 = vmax.f32 %v576_v12, %v966_v33  ;;  %v657_v22 = vmax.f32 %v577_v13, %v967_v52  ;;  %v815_v29 = vunpack.c.h.bf16 %v1058_v16  ;;  %v498_v32 = vmax.f32 %v418_v23, %v906_v63  ;;  %v1079_v33 = vld [vmem:[%s1410_s6 + $0x10] sm:$0xff]   ;;  %v1080_v12 = vld [vmem:[%s1410_s6 + $0x18] sm:$0xff]  }
  0x14   :  { %v499_v34 = vmax.f32 %v419_v24, %v907_v0  ;;  %v971_v35 = vunpack.c.h.bf16 %v1092_v60  ;;  %v180_v36 = vmax.f32 %v100_v26, %v782_v19  ;;  %v181_v37 = vmax.f32 %v101_v27, %v783_v20  ;;  %v1087_v17 = vld [vmem:[%s1411_s7 + $0x18] sm:$0xff]   ;;  %v1039_v27 = vld [vmem:[%s1404_s0 + $0x20] sm:$0xff]  }
  0x15   :  { %v999_v31 = vpack.c.bf16 %v657_v22, %v656_v21  ;;  %v846_v38 = vunpack.c.l.bf16 %v1065_v25  ;;  %v847_v39 = vunpack.c.h.bf16 %v1065_v25  ;;  %v578_v41 = vmax.f32 %v498_v32, %v938_v1  ;;  %v1094_v22 = vld [vmem:[%s1412_s8 + $0x18] sm:$0xff]   ;;  %v1046_v32 = vld [vmem:[%s1405_s1 + $0x20] sm:$0xff]  }
  0x16   :  { %v579_v42 = vmax.f32 %v499_v34, %v939_v8  ;;  %v878_v43 = vunpack.c.l.bf16 %v1072_v30  ;;  %v879_v44 = vunpack.c.h.bf16 %v1072_v30  ;;  %v260_v47 = vmax.f32 %v180_v36, %v814_v28  ;;  %v1053_v34 = vld [vmem:[%s1406_s2 + $0x20] sm:$0xff]  }
  0x17   :  { %1000 = vst [vmem:[%s1413_s9] sm:$0xff] %v999_v31   ;;  %v261_v48 = vmax.f32 %v181_v37, %v815_v29  ;;  %v910_v49 = vunpack.c.l.bf16 %v1079_v33  ;;  %v911_v50 = vunpack.c.h.bf16 %v1079_v33  ;;  %v658_v52 = vmax.f32 %v578_v41, %v970_v9 }
  0x18   :  { %v659_v53 = vmax.f32 %v579_v42, %v971_v35  ;;  %v942_v54 = vunpack.c.l.bf16 %v1086_v40  ;;  %v943_v55 = vunpack.c.h.bf16 %v1086_v40  ;;  %v340_v57 = vmax.f32 %v260_v47, %v846_v38  ;;  %v1060_v42 = vld [vmem:[%s1407_s3 + $0x20] sm:$0xff]  }
  0x19   :  { %v341_v58 = vmax.f32 %v261_v48, %v847_v39  ;;  %v974_v59 = vunpack.c.l.bf16 %v1093_v45  ;;  %v722_v60 = vunpack.c.l.bf16 %v1038_v46  ;;  %v723_v63 = vunpack.c.h.bf16 %v1038_v46  ;;  %v1067_v47 = vld [vmem:[%s1408_s4 + $0x20] sm:$0xff]  }
  0x1a   :  { %v1004_v62 = vpack.c.bf16 %v659_v53, %v658_v52  ;;  %v754_v0 = vunpack.c.l.bf16 %v1045_v51  ;;  %v755_v1 = vunpack.c.h.bf16 %v1045_v51  ;;  %v420_v3 = vmax.f32 %v340_v57, %v878_v43  ;;  %v1074_v52 = vld [vmem:[%s1409_s5 + $0x20] sm:$0xff]  }
  0x1b   :  { %v421_v4 = vmax.f32 %v341_v58, %v879_v44  ;;  %v786_v5 = vunpack.c.l.bf16 %v1052_v56  ;;  %v787_v6 = vunpack.c.h.bf16 %v1052_v56  ;;  %v818_v10 = vunpack.c.l.bf16 %v1059_v61  ;;  %v1081_v57 = vld [vmem:[%s1410_s6 + $0x20] sm:$0xff]  }
  0x1c   :  { %1099 = vst [vmem:[%s1413_s9 + $0x8] sm:$0xff] %v1004_v62   ;;  %v102_v8 = vmax.f32 %v722_v60, %v754_v0  ;;  %v103_v9 = vmax.f32 %v723_v63, %v755_v1  ;;  %v819_v11 = vunpack.c.h.bf16 %v1059_v61  ;;  %v500_v13 = vmax.f32 %v420_v3, %v910_v49  ;;  %v1088_v62 = vld [vmem:[%s1411_s7 + $0x20] sm:$0xff]  }
  0x1d   :  { %v501_v14 = vmax.f32 %v421_v4, %v911_v50  ;;  %v975_v15 = vunpack.c.h.bf16 %v1093_v45  ;;  %v850_v16 = vunpack.c.l.bf16 %v1066_v2  ;;  %v851_v20 = vunpack.c.h.bf16 %v1066_v2  ;;  %v1095_v3 = vld [vmem:[%s1412_s8 + $0x20] sm:$0xff]   ;;  %v1040_v4 = vld [vmem:[%s1404_s0 + $0x28] sm:$0xff]  }
  0x1e   :  { %v182_v18 = vmax.f32 %v102_v8, %v786_v5  ;;  %v183_v19 = vmax.f32 %v103_v9, %v787_v6  ;;  %v882_v21 = vunpack.c.l.bf16 %v1073_v7  ;;  %v580_v23 = vmax.f32 %v500_v13, %v942_v54  ;;  %v1047_v9 = vld [vmem:[%s1405_s1 + $0x28] sm:$0xff]  }
  0x1f   :  { %v581_v24 = vmax.f32 %v501_v14, %v943_v55  ;;  %v883_v25 = vunpack.c.h.bf16 %v1073_v7  ;;  %v914_v26 = vunpack.c.l.bf16 %v1080_v12  ;;  %v915_v30 = vunpack.c.h.bf16 %v1080_v12  ;;  %v1054_v14 = vld [vmem:[%s1406_s2 + $0x28] sm:$0xff]  }
  0x20   :  { %v262_v28 = vmax.f32 %v182_v18, %v818_v10  ;;  %v263_v29 = vmax.f32 %v183_v19, %v819_v11  ;;  %v946_v31 = vunpack.c.l.bf16 %v1087_v17  ;;  %v660_v35 = vmax.f32 %v580_v23, %v974_v59  ;;  %v1061_v19 = vld [vmem:[%s1407_s3 + $0x28] sm:$0xff]  }
  0x21   :  { %v661_v33 = vmax.f32 %v581_v24, %v975_v15  ;;  %v947_v36 = vunpack.c.h.bf16 %v1087_v17  ;;  %v978_v37 = vunpack.c.l.bf16 %v1094_v22  ;;  %v726_v40 = vunpack.c.l.bf16 %v1039_v27  ;;  %v1068_v24 = vld [vmem:[%s1408_s4 + $0x28] sm:$0xff]  }
  0x22   :  { %v342_v38 = vmax.f32 %v262_v28, %v850_v16  ;;  %v343_v39 = vmax.f32 %v263_v29, %v851_v20  ;;  %v727_v41 = vunpack.c.h.bf16 %v1039_v27  ;;  %v758_v44 = vunpack.c.l.bf16 %v1046_v32 }
  0x23   :  { %v1009_v43 = vpack.c.bf16 %v661_v33, %v660_v35  ;;  %v759_v45 = vunpack.c.h.bf16 %v1046_v32  ;;  %v790_v46 = vunpack.c.l.bf16 %v1053_v34  ;;  %v979_v50 = vunpack.c.h.bf16 %v1094_v22  ;;  %v1082_v35 = vld [vmem:[%s1410_s6 + $0x28] sm:$0xff]  }
  0x24   :  { %v422_v48 = vmax.f32 %v342_v38, %v882_v21  ;;  %v423_v49 = vmax.f32 %v343_v39, %v883_v25  ;;  %v791_v51 = vunpack.c.h.bf16 %v1053_v34  ;;  %v104_v53 = vmax.f32 %v726_v40, %v758_v44  ;;  %v1075_v34 = vld [vmem:[%s1409_s5 + $0x28] sm:$0xff]  }
  0x25   :  { %1100 = vst [vmem:[%s1413_s9 + $0x10] sm:$0xff] %v1009_v43   ;;  %v105_v54 = vmax.f32 %v727_v41, %v759_v45  ;;  %v822_v55 = vunpack.c.l.bf16 %v1060_v42  ;;  %v823_v56 = vunpack.c.h.bf16 %v1060_v42  ;;  %v854_v60 = vunpack.c.l.bf16 %v1067_v47  ;;  %v1089_v43 = vld [vmem:[%s1411_s7 + $0x28] sm:$0xff]  }
  0x26   :  { %v502_v58 = vmax.f32 %v422_v48, %v914_v26  ;;  %v503_v59 = vmax.f32 %v423_v49, %v915_v30  ;;  %v855_v61 = vunpack.c.h.bf16 %v1067_v47  ;;  %v184_v63 = vmax.f32 %v104_v53, %v790_v46  ;;  %v1096_v44 = vld [vmem:[%s1412_s8 + $0x28] sm:$0xff]   ;;  %v1041_v49 = vld [vmem:[%s1404_s0 + $0x30] sm:$0xff]  }
  0x27   :  { %v185_v0 = vmax.f32 %v105_v54, %v791_v51  ;;  %v886_v1 = vunpack.c.l.bf16 %v1074_v52  ;;  %v887_v2 = vunpack.c.h.bf16 %v1074_v52  ;;  %v918_v7 = vunpack.c.l.bf16 %v1081_v57  ;;  %v1048_v54 = vld [vmem:[%s1405_s1 + $0x30] sm:$0xff]  }
  0x28   :  { %v582_v5 = vmax.f32 %v502_v58, %v946_v31  ;;  %v583_v6 = vmax.f32 %v503_v59, %v947_v36  ;;  %v919_v8 = vunpack.c.h.bf16 %v1081_v57  ;;  %v264_v10 = vmax.f32 %v184_v63, %v822_v55  ;;  %v1055_v59 = vld [vmem:[%s1406_s2 + $0x30] sm:$0xff]  }
  0x29   :  { %v265_v11 = vmax.f32 %v185_v0, %v823_v56  ;;  %v950_v12 = vunpack.c.l.bf16 %v1088_v62  ;;  %v951_v13 = vunpack.c.h.bf16 %v1088_v62  ;;  %v982_v17 = vunpack.c.l.bf16 %v1095_v3  ;;  %v1062_v0 = vld [vmem:[%s1407_s3 + $0x30] sm:$0xff]  }
  0x2a   :  { %v662_v15 = vmax.f32 %v582_v5, %v978_v37  ;;  %v663_v16 = vmax.f32 %v583_v6, %v979_v50  ;;  %v730_v18 = vunpack.c.l.bf16 %v1040_v4  ;;  %v344_v20 = vmax.f32 %v264_v10, %v854_v60  ;;  %v1069_v5 = vld [vmem:[%s1408_s4 + $0x30] sm:$0xff]  }
  0x2b   :  { %v345_v21 = vmax.f32 %v265_v11, %v855_v61  ;;  %v731_v22 = vunpack.c.h.bf16 %v1040_v4  ;;  %v762_v23 = vunpack.c.l.bf16 %v1047_v9  ;;  %v763_v26 = vunpack.c.h.bf16 %v1047_v9 }
  0x2c   :  { %v1014_v25 = vpack.c.bf16 %v663_v16, %v662_v15  ;;  %v794_v27 = vunpack.c.l.bf16 %v1054_v14  ;;  %v795_v28 = vunpack.c.h.bf16 %v1054_v14  ;;  %v424_v29 = vmax.f32 %v344_v20, %v886_v1  ;;  %v1076_v14 = vld [vmem:[%s1409_s5 + $0x30] sm:$0xff]  }
  0x2d   :  { %v425_v30 = vmax.f32 %v345_v21, %v887_v2  ;;  %v106_v31 = vmax.f32 %v730_v18, %v762_v23  ;;  %v826_v32 = vunpack.c.l.bf16 %v1061_v19  ;;  %v983_v33 = vunpack.c.h.bf16 %v1095_v3 }
  0x2e   :  { %1101 = vst [vmem:[%s1413_s9 + $0x18] sm:$0xff] %v1014_v25   ;;  %v107_v36 = vmax.f32 %v731_v22, %v763_v26  ;;  %v827_v37 = vunpack.c.h.bf16 %v1061_v19  ;;  %v858_v38 = vunpack.c.l.bf16 %v1068_v24  ;;  %v504_v39 = vmax.f32 %v424_v29, %v918_v7  ;;  %v1083_v19 = vld [vmem:[%s1410_s6 + $0x30] sm:$0xff]  }
  0x2f   :  { %v505_v40 = vmax.f32 %v425_v30, %v919_v8  ;;  %v186_v41 = vmax.f32 %v106_v31, %v794_v27  ;;  %v859_v42 = vunpack.c.h.bf16 %v1068_v24  ;;  %v890_v46 = vunpack.c.l.bf16 %v1075_v34  ;;  %v1090_v24 = vld [vmem:[%s1411_s7 + $0x30] sm:$0xff]  }
  0x30   :  { %v187_v45 = vmax.f32 %v107_v36, %v795_v28  ;;  %v891_v47 = vunpack.c.h.bf16 %v1075_v34  ;;  %v922_v48 = vunpack.c.l.bf16 %v1082_v35  ;;  %v584_v50 = vmax.f32 %v504_v39, %v950_v12  ;;  %v1042_v28 = vld [vmem:[%s1404_s0 + $0x38] sm:$0xff]  }
  0x31   :  { %v585_v51 = vmax.f32 %v505_v40, %v951_v13  ;;  %v266_v52 = vmax.f32 %v186_v41, %v826_v32  ;;  %v923_v53 = vunpack.c.h.bf16 %v1082_v35  ;;  %v954_v56 = vunpack.c.l.bf16 %v1089_v43  ;;  %v1049_v34 = vld [vmem:[%s1405_s1 + $0x38] sm:$0xff]  }
  0x32   :  { %v267_v55 = vmax.f32 %v187_v45, %v827_v37  ;;  %v955_v57 = vunpack.c.h.bf16 %v1089_v43  ;;  %v986_v58 = vunpack.c.l.bf16 %v1096_v44  ;;  %v664_v60 = vmax.f32 %v584_v50, %v982_v17  ;;  %v1056_v35 = vld [vmem:[%s1406_s2 + $0x38] sm:$0xff]  }
  0x33   :  { %v665_v61 = vmax.f32 %v585_v51, %v983_v33  ;;  %v346_v62 = vmax.f32 %v266_v52, %v858_v38  ;;  %v734_v63 = vunpack.c.l.bf16 %v1041_v49  ;;  %v735_v2 = vunpack.c.h.bf16 %v1041_v49  ;;  %v1063_v43 = vld [vmem:[%s1407_s3 + $0x38] sm:$0xff]  }
  0x34   :  { %v347_v1 = vmax.f32 %v267_v55, %v859_v42  ;;  %v766_v3 = vunpack.c.l.bf16 %v1048_v54  ;;  %v767_v4 = vunpack.c.h.bf16 %v1048_v54  ;;  %v798_v8 = vunpack.c.l.bf16 %v1055_v59 }
  0x35   :  { %v1019_v6 = vpack.c.bf16 %v665_v61, %v664_v60  ;;  %v426_v7 = vmax.f32 %v346_v62, %v890_v46  ;;  %v799_v9 = vunpack.c.h.bf16 %v1055_v59  ;;  %v830_v13 = vunpack.c.l.bf16 %v1062_v0  ;;  %v1077_v62 = vld [vmem:[%s1409_s5 + $0x38] sm:$0xff]  }
  0x36   :  { %v427_v10 = vmax.f32 %v347_v1, %v891_v47  ;;  %v108_v11 = vmax.f32 %v734_v63, %v766_v3  ;;  %v109_v12 = vmax.f32 %v735_v2, %v767_v4  ;;  %v987_v16 = vunpack.c.h.bf16 %v1096_v44  ;;  %v1097_v44 = vld [vmem:[%s1412_s8 + $0x30] sm:$0xff]  }
  0x37   :  { %1102 = vst [vmem:[%s1413_s9 + $0x20] sm:$0xff] %v1019_v6   ;;  %v506_v15 = vmax.f32 %v426_v7, %v922_v48  ;;  %v831_v17 = vunpack.c.h.bf16 %v1062_v0  ;;  %v862_v18 = vunpack.c.l.bf16 %v1069_v5  ;;  %v863_v23 = vunpack.c.h.bf16 %v1069_v5  ;;  %v1084_v5 = vld [vmem:[%s1410_s6 + $0x38] sm:$0xff]  }
  0x38   :  { %v507_v20 = vmax.f32 %v427_v10, %v923_v53  ;;  %v188_v21 = vmax.f32 %v108_v11, %v798_v8  ;;  %v189_v22 = vmax.f32 %v109_v12, %v799_v9  ;;  %v894_v26 = vunpack.c.l.bf16 %v1076_v14  ;;  %v1070_v53 = vld [vmem:[%s1408_s4 + $0x38] sm:$0xff]  }
  0x39   :  { %v586_v25 = vmax.f32 %v506_v15, %v954_v56  ;;  %v895_v27 = vunpack.c.h.bf16 %v1076_v14  ;;  %v926_v32 = vunpack.c.l.bf16 %v1083_v19  ;;  %v927_v36 = vunpack.c.h.bf16 %v1083_v19  ;;  %v1091_v12 = vld [vmem:[%s1411_s7 + $0x38] sm:$0xff]  }
  0x3a   :  { %v587_v29 = vmax.f32 %v507_v20, %v955_v57  ;;  %v268_v30 = vmax.f32 %v188_v21, %v830_v13  ;;  %v269_v31 = vmax.f32 %v189_v22, %v831_v17  ;;  %v958_v37 = vunpack.c.l.bf16 %v1090_v24 }
  0x3b   :  { %v666_v33 = vmax.f32 %v586_v25, %v986_v58  ;;  %v959_v38 = vunpack.c.h.bf16 %v1090_v24  ;;  %v738_v42 = vunpack.c.l.bf16 %v1042_v28  ;;  %v739_v45 = vunpack.c.h.bf16 %v1042_v28 }
  0x3c   :  { %v667_v39 = vmax.f32 %v587_v29, %v987_v16  ;;  %v348_v40 = vmax.f32 %v268_v30, %v862_v18  ;;  %v349_v41 = vmax.f32 %v269_v31, %v863_v23  ;;  %v770_v46 = vunpack.c.l.bf16 %v1049_v34  ;;  %v1098_v18 = vld [vmem:[%s1412_s8 + $0x38] sm:$0xff]  }
  0x3d   :  { %v771_v47 = vunpack.c.h.bf16 %v1049_v34  ;;  %v802_v48 = vunpack.c.l.bf16 %v1056_v35  ;;  %v803_v52 = vunpack.c.h.bf16 %v1056_v35  ;;  %v834_v56 = vunpack.c.l.bf16 %v1063_v43 }
  0x3e   :  { %v1024_v49 = vpack.c.bf16 %v667_v39, %v666_v33  ;;  %v428_v50 = vmax.f32 %v348_v40, %v894_v26  ;;  %v429_v51 = vmax.f32 %v349_v41, %v895_v27  ;;  %v110_v54 = vmax.f32 %v738_v42, %v770_v46 }
  0x3f   :  { %v111_v55 = vmax.f32 %v739_v45, %v771_v47  ;;  %v835_v57 = vunpack.c.h.bf16 %v1063_v43  ;;  %v990_v60 = vunpack.c.l.bf16 %v1097_v44  ;;  %v991_v61 = vunpack.c.h.bf16 %v1097_v44 }
  0x40   :  { %1103 = vst [vmem:[%s1413_s9 + $0x28] sm:$0xff] %v1024_v49   ;;  %v508_v58 = vmax.f32 %v428_v50, %v926_v32  ;;  %v509_v59 = vmax.f32 %v429_v51, %v927_v36  ;;  %v190_v63 = vmax.f32 %v110_v54, %v802_v48  ;;  %v866_v1 = vunpack.c.l.bf16 %v1070_v53 }
  0x41   :  { %v191_v0 = vmax.f32 %v111_v55, %v803_v52  ;;  %v867_v2 = vunpack.c.h.bf16 %v1070_v53  ;;  %v898_v8 = vunpack.c.l.bf16 %v1077_v62  ;;  %v899_v9 = vunpack.c.h.bf16 %v1077_v62 }
  0x42   :  { %v588_v3 = vmax.f32 %v508_v58, %v958_v37  ;;  %v589_v4 = vmax.f32 %v509_v59, %v959_v38  ;;  %v270_v6 = vmax.f32 %v190_v63, %v834_v56  ;;  %v930_v15 = vunpack.c.l.bf16 %v1084_v5 }
  0x43   :  { %v271_v7 = vmax.f32 %v191_v0, %v835_v57  ;;  %v931_v16 = vunpack.c.h.bf16 %v1084_v5  ;;  %v962_v21 = vunpack.c.l.bf16 %v1091_v12  ;;  %v963_v22 = vunpack.c.h.bf16 %v1091_v12 }
  0x44   :  { %v668_v10 = vmax.f32 %v588_v3, %v990_v60  ;;  %v669_v11 = vmax.f32 %v589_v4, %v991_v61  ;;  %v350_v13 = vmax.f32 %v270_v6, %v866_v1  ;;  %v994_v25 = vunpack.c.l.bf16 %v1098_v18 }
  0x45   :  { %v351_v14 = vmax.f32 %v271_v7, %v867_v2  ;;  %v995_v26 = vunpack.c.h.bf16 %v1098_v18 }
  0x46   :  { %v1029_v17 = vpack.c.bf16 %v669_v11, %v668_v10  ;;  %v430_v19 = vmax.f32 %v350_v13, %v898_v8 }
  0x47   :  { %v431_v20 = vmax.f32 %v351_v14, %v899_v9 }
  0x48   :  { %1104 = vst [vmem:[%s1413_s9 + $0x30] sm:$0xff] %v1029_v17   ;;  %v510_v23 = vmax.f32 %v430_v19, %v930_v15 }
  0x49   :  { %v511_v24 = vmax.f32 %v431_v20, %v931_v16 }
  0x4a   :  { %v590_v27 = vmax.f32 %v510_v23, %v962_v21 }
  0x4b   :  { %v591_v28 = vmax.f32 %v511_v24, %v963_v22 }
  0x4c   :  { %v670_v29 = vmax.f32 %v590_v27, %v994_v25 }
  0x4d   :  { %v671_v30 = vmax.f32 %v591_v28, %v995_v26 }
  0x4f   :  { %v1034_v31 = vpack.c.bf16 %v671_v30, %v670_v29 }
  0x51   :  { %1105 = vst [vmem:[%s1413_s9 + $0x38] sm:$0xff] %v1034_v31  }

// kernel: gvb_resnet_forward.24
= control target key start
LH: loop header
LB: loop body
LE: loop exit
PB: predicated region body
PF: predicated region fallthrough
CT: control target
= control target key end

     0   :  { %s1657_s15 = smov 0   ;;  %s1659_s16 = smov 0   ;;  %s1968_s0 = inlined_call_operand.vmem [shape: bf16[128,1152], index: 0, kind: input, shape index: {}]   ;;  %s1969_s1 = inlined_call_operand.vmem [shape: bf16[1152,128], index: 1, kind: input, shape index: {}]   ;;  %s1970_s2 = inlined_call_operand.vmem [shape: f32[1,128], index: 2, kind: input, shape index: {}]   ;;  %s1971_s3 = inlined_call_operand.vmem [shape: f32[1,128], index: 3, kind: input, shape index: {}]   ;;  %s1972_s4 = inlined_call_operand.vmem [shape: bf16[128,128], index: 4, kind: output, shape index: {}]  }
   0x1   :  { %s1661_s17 = smov 0   ;;  %s1663_s18 = smov 0  }
   0x2   :  { %s1665_s19 = smov 0  }
   0x3 LB: > { %s26_s20 = sadd.s32 1, %s1625_s18  ;;  %p49_p1 = scmp.ne.s32.totalorder %s1617_s16, %s1613_s15  ;;  %s1629_s19 = sphi %s1665_s19, %s14_s19   ;;  %s1625_s18 = sphi %s1663_s18, %s1976_s18   ;;  %s1621_s17 = sphi %s1661_s17, %s1975_s17   ;;  %s1617_s16 = sphi %s1659_s16, %s1974_s16   ;;  %s1613_s15 = sphi %s1657_s15, %s1973_s15  }
   0x4   : > { %p27_p0 = scmp.ge.s32.totalorder %s26_s20, 3  ;;  %p50_p2 = scmp.eq.s32.totalorder %s1629_s19, 0 }
   0x5   : > { %s42_s22 = sadd.s32 1, %s1617_s16  ;;  %p1192_p5 = scmp.ge.s32.totalorder %s1629_s19, 3 }
   0x6   : > { %s1978_s20 = smov (%p27_p0, %s26_s20), 0  ;;  %p51_p3 = por %p50_p2, %p49_p1 }
   0x7   : > { %s38_s21 = ssub.s32 %s1625_s18, %s1978_s20  ;;  %195 = sbr.rel (%p1192_p5) target bundleno = 49 (0x31), region = 24 }
   0x8   : > { %p40_p4 = scmp.eq.s32.totalorder %s38_s21, 0 }
   0xa   : > { %s1692_s23 = scalar_select %p40_p4, %s1617_s16, %s42_s22  }
   0xc   : > { %198 = sbr.rel (!%p51_p3) target bundleno = 49 (0x31), region = 28  ;;  %s200_s24 = sand.u32 (%p51_p3), 1, %s1617_s16  }
   0xd   : > { %s1426_s25 = smul.u32 (%p51_p3), 12, %s1625_s18 }
   0xe   : > { %s1546_s26 = smul.u32 (%p51_p3), 192, %s200_s24 }
   0xf   : > { %s1700_s29 = scalar_lea.vmem (%p51_p3), %s1968_s0, %s1426_s25 }
  0x10   : > { %v223_v0 = vld [vmem:[%s1700_s29] sm:$0xff] (%p51_p3)  ;;  %v227_v2 = vld [vmem:[%s1700_s29 + $0x48] sm:$0xff] (%p51_p3)  ;;  %s1705_s30 = scalar_lea.vmem (%p51_p3), [#allocation3], %s1546_s26  ;;  %v231_v4 = vld [vmem:[%s1700_s29 + $0x90] sm:$0xff] (%p51_p3) }
  0x11   : > { %v225_v1 = vld [vmem:[%s1700_s29 + $0x24] sm:$0xff]  ;;  %224 = vst [vmem:[%s1705_s30] sm:$0xff] %v223_v0  ;;  %v229_v3 = vld [vmem:[%s1700_s29 + $0x6c] sm:$0xff]  ;;  %v233_v5 = vld [vmem:[%s1700_s29 + $0xb4] sm:$0xff] }
  0x12   : > { %226 = vst [vmem:[%s1705_s30 + $0xc] sm:$0xff] %v225_v1  ;;  %v235_v6 = vld [vmem:[%s1700_s29 + $0xd8] sm:$0xff]  ;;  %v239_v8 = vld [vmem:[%s1700_s29 + $0x120] sm:$0xff]  ;;  %v243_v10 = vld [vmem:[%s1700_s29 + $0x168] sm:$0xff] }
  0x13   : > { %228 = vst [vmem:[%s1705_s30 + $0x18] sm:$0xff] %v227_v2  ;;  %v237_v7 = vld [vmem:[%s1700_s29 + $0xfc] sm:$0xff]  ;;  %v241_v9 = vld [vmem:[%s1700_s29 + $0x144] sm:$0xff]  ;;  %v245_v11 = vld [vmem:[%s1700_s29 + $0x18c] sm:$0xff] }
  0x14   : > { %230 = vst [vmem:[%s1705_s30 + $0x24] sm:$0xff] %v229_v3  ;;  %v247_v12 = vld [vmem:[%s1700_s29 + $0x1b0] sm:$0xff]  ;;  %v251_v14 = vld [vmem:[%s1700_s29 + $0x1f8] sm:$0xff]  ;;  %v1194_v16 = vld [vmem:[%s1700_s29 + $0x8] sm:$0xf] }
  0x15   : > { %232 = vst [vmem:[%s1705_s30 + $0x30] sm:$0xff] %v231_v4  ;;  %v249_v13 = vld [vmem:[%s1700_s29 + $0x1d4] sm:$0xff]  ;;  %v253_v15 = vld [vmem:[%s1700_s29 + $0x21c] sm:$0xff]  ;;  %v1196_v17 = vld [vmem:[%s1700_s29 + $0x2c] sm:$0xf] }
  0x16   : > { %234 = vst [vmem:[%s1705_s30 + $0x3c] sm:$0xff] %v233_v5  ;;  %v1198_v18 = vld [vmem:[%s1700_s29 + $0x50] sm:$0xf]  ;;  %v1200_v19 = vld [vmem:[%s1700_s29 + $0x74] sm:$0xf] }
  0x17   : > { %236 = vst [vmem:[%s1705_s30 + $0x48] sm:$0xff] %v235_v6  ;;  %v1202_v20 = vld [vmem:[%s1700_s29 + $0x98] sm:$0xf]  ;;  %v1204_v21 = vld [vmem:[%s1700_s29 + $0xbc] sm:$0xf] }
  0x18   : > { %238 = vst [vmem:[%s1705_s30 + $0x54] sm:$0xff] %v237_v7  ;;  %v1206_v22 = vld [vmem:[%s1700_s29 + $0xe0] sm:$0xf]  ;;  %v1208_v23 = vld [vmem:[%s1700_s29 + $0x104] sm:$0xf] }
  0x19   : > { %240 = vst [vmem:[%s1705_s30 + $0x60] sm:$0xff] %v239_v8  ;;  %v1210_v24 = vld [vmem:[%s1700_s29 + $0x128] sm:$0xf]  ;;  %v1212_v25 = vld [vmem:[%s1700_s29 + $0x14c] sm:$0xf] }
  0x1a   : > { %242 = vst [vmem:[%s1705_s30 + $0x6c] sm:$0xff] %v241_v9  ;;  %v1214_v26 = vld [vmem:[%s1700_s29 + $0x170] sm:$0xf]  ;;  %v1216_v27 = vld [vmem:[%s1700_s29 + $0x194] sm:$0xf] }
  0x1b   : > { %244 = vst [vmem:[%s1705_s30 + $0x78] sm:$0xff] %v243_v10  ;;  %v1218_v28 = vld [vmem:[%s1700_s29 + $0x1b8] sm:$0xf]  ;;  %v1220_v29 = vld [vmem:[%s1700_s29 + $0x1dc] sm:$0xf] }
  0x1c   : > { %246 = vst [vmem:[%s1705_s30 + $0x84] sm:$0xff] %v245_v11  ;;  %v1222_v30 = vld [vmem:[%s1700_s29 + $0x200] sm:$0xf]  ;;  %v1224_v31 = vld [vmem:[%s1700_s29 + $0x224] sm:$0xf] }
  0x1d   : > { %248 = vst [vmem:[%s1705_s30 + $0x90] sm:$0xff] %v247_v12 }
  0x1e   : > { %250 = vst [vmem:[%s1705_s30 + $0x9c] sm:$0xff] %v249_v13 }
  0x1f   : > { %252 = vst [vmem:[%s1705_s30 + $0xa8] sm:$0xff] %v251_v14 }
  0x20   : > { %254 = vst [vmem:[%s1705_s30 + $0xb4] sm:$0xff] %v253_v15 }
  0x21   : > { %1195 = vst [vmem:[%s1705_s30 + $0x8] sm:$0xf] %v1194_v16 }
  0x22   : > { %1197 = vst [vmem:[%s1705_s30 + $0x14] sm:$0xf] %v1196_v17 }
  0x23   : > { %1199 = vst [vmem:[%s1705_s30 + $0x20] sm:$0xf] %v1198_v18 }
  0x24   : > { %1201 = vst [vmem:[%s1705_s30 + $0x2c] sm:$0xf] %v1200_v19 }
  0x25   : > { %1203 = vst [vmem:[%s1705_s30 + $0x38] sm:$0xf] %v1202_v20 }
  0x26   : > { %1205 = vst [vmem:[%s1705_s30 + $0x44] sm:$0xf] %v1204_v21 }
  0x27   : > { %1207 = vst [vmem:[%s1705_s30 + $0x50] sm:$0xf] %v1206_v22 }
  0x28   : > { %1209 = vst [vmem:[%s1705_s30 + $0x5c] sm:$0xf] %v1208_v23 }
  0x29   : > { %1211 = vst [vmem:[%s1705_s30 + $0x68] sm:$0xf] %v1210_v24 }
  0x2a   : > { %1213 = vst [vmem:[%s1705_s30 + $0x74] sm:$0xf] %v1212_v25 }
  0x2b   : > { %1215 = vst [vmem:[%s1705_s30 + $0x80] sm:$0xf] %v1214_v26 }
  0x2c   : > { %1217 = vst [vmem:[%s1705_s30 + $0x8c] sm:$0xf] %v1216_v27 }
  0x2d   : > { %1219 = vst [vmem:[%s1705_s30 + $0x98] sm:$0xf] %v1218_v28 }
  0x2e   : > { %1221 = vst [vmem:[%s1705_s30 + $0xa4] sm:$0xf] %v1220_v29 }
  0x2f   : > { %1223 = vst [vmem:[%s1705_s30 + $0xb0] sm:$0xf] %v1222_v30 }
  0x30   : > { %1225 = vst [vmem:[%s1705_s30 + $0xbc] sm:$0xf] %v1224_v31 }
  0x31 PF: > { %p1226_p6 = scmp.ge.s32.totalorder %s1629_s19, 1  ;;  %p311_p7 = scmp.lt.s32.totalorder %s1629_s19, 4 }
  0x33   : > { %p312_p8 = pnand %p1226_p6, %p311_p7 }
  0x34   : > { %s318_s5 = sand.u32 (!%p312_p8), 1, %s1613_s15   ;;  %s362_s6 = smul.u32 (!%p312_p8), 48, %s1621_s17 }
  0x35   : > { %315 = sbr.rel (%p312_p8) target bundleno = 360 (0x168), region = 58  ;;  %p1228_p10 = scmp.ne.s32.totalorder (!%p312_p8), %s1621_s17, 0 }
  0x36   : > { %s1547_s7 = smul.u32 (!%p312_p8), 192, %s318_s5  ;;  %p363_p9 = scmp.lt.s32.totalorder (!%p312_p8), %s362_s6, 143 }
  0x38   : > { %s1777_s12 = scalar_lea.vmem (!%p312_p8), [#allocation3], %s1547_s7 }
  0x3a   : > { %s1980_s6 = smov (!%p363_p9, %s362_s6), 143  ;;  %389 = sbr.rel (%p1228_p10) target bundleno = 80 (0x50), region = 66 }
  0x3b   : > { %s1227_s8 = sshll.u32 %s1980_s6, 2 }
  0x3c   : > { %s1775_s11 = scalar_lea.vmem %s1969_s1, %s1227_s8 }
  0x3f   : > { %v1631_v32 = vmov 0.0  }
  0x40   : > { %390 = vst [vmem:[#allocation2 + $0x30] sm:$0xff] %v1631_v32 }
  0x41   : > { %391 = vst [vmem:[#allocation2] sm:$0xff] %v1631_v32 }
  0x42   : > { %392 = vst [vmem:[#allocation2 + $0x58] sm:$0xff] %v1631_v32 }
  0x43   : > { %393 = vst [vmem:[#allocation2 + $0x18] sm:$0xff] %v1631_v32 }
  0x44   : > { %394 = vst [vmem:[#allocation2 + $0x50] sm:$0xff] %v1631_v32 }
  0x45   : > { %395 = vst [vmem:[#allocation2 + $0x68] sm:$0xff] %v1631_v32 }
  0x46   : > { %396 = vst [vmem:[#allocation2 + $0x8] sm:$0xff] %v1631_v32 }
  0x47   : > { %397 = vst [vmem:[#allocation2 + $0x48] sm:$0xff] %v1631_v32 }
  0x48   : > { %398 = vst [vmem:[#allocation2 + $0x40] sm:$0xff] %v1631_v32 }
  0x49   : > { %399 = vst [vmem:[#allocation2 + $0x20] sm:$0xff] %v1631_v32 }
  0x4a   : > { %400 = vst [vmem:[#allocation2 + $0x10] sm:$0xff] %v1631_v32 }
  0x4b   : > { %401 = vst [vmem:[#allocation2 + $0x38] sm:$0xff] %v1631_v32 }
  0x4c   : > { %402 = vst [vmem:[#allocation2 + $0x60] sm:$0xff] %v1631_v32 }
  0x4d   : > { %403 = vst [vmem:[#allocation2 + $0x70] sm:$0xff] %v1631_v32 }
  0x4e   : > { %404 = vst [vmem:[#allocation2 + $0x78] sm:$0xff] %v1631_v32 }
  0x4f   : > { %405 = vst [vmem:[#allocation2 + $0x28] sm:$0xff] %v1631_v32 }
  0x50 PF: > { %v1458_v33 = vld [vmem:[%s1775_s11 + $0x38] sm:$0xff]  ;;  %v1457_v36 = vld [vmem:[%s1775_s11 + $0x30] sm:$0xff]  ;;  %v1456_v39 = vld [vmem:[%s1775_s11 + $0x28] sm:$0xff]  ;;  %p1421_p11 = scmp.ne.s32.totalorder %s1621_s17, 2 }
  0x51   : > { %v1782_v34 = vld [vmem:[%s1775_s11 + $0x78] sm:$0xff]  ;;  %774 = vmatpush.bf16.msra.mxu0 %v1458_v33  ;;  %1522 = vmatpush.bf16.msra.mxu3 %v1458_v33  ;;  %v1791_v37 = vld [vmem:[%s1775_s11 + $0x70] sm:$0xff]  ;;  %v1464_v40 = vld [vmem:[%s1775_s11 + $0x68] sm:$0xff] }
  0x52   : > { %v1785_v35 = vld [vmem:[%s1775_s11 + $0xb8] sm:$0xff]  ;;  %823 = vmatpush.bf16.msra.mxu1 %v1782_v34  ;;  %v1794_v38 = vld [vmem:[%s1775_s11 + $0xb0] sm:$0xff]  ;;  %v1801_v41 = vld [vmem:[%s1775_s11 + $0xa8] sm:$0xff] }
  0x53   : > { %872 = vmatpush.bf16.msra.mxu2 %v1785_v35  ;;  %v1455_v42 = vld [vmem:[%s1775_s11 + $0x20] sm:$0xff]  ;;  %v1454_v45 = vld [vmem:[%s1775_s11 + $0x18] sm:$0xff]  ;;  %v1453_v48 = vld [vmem:[%s1775_s11 + $0x10] sm:$0xff] }
  0x54   : > { %v1463_v43 = vld [vmem:[%s1775_s11 + $0x60] sm:$0xff]  ;;  %v1462_v46 = vld [vmem:[%s1775_s11 + $0x58] sm:$0xff]  ;;  %v1461_v49 = vld [vmem:[%s1775_s11 + $0x50] sm:$0xff] }
  0x55   : > { %775 = vmatpush.bf16.msra.mxu0 %v1457_v36  ;;  %1523 = vmatpush.bf16.msra.mxu3 %v1457_v36  ;;  %v1807_v44 = vld [vmem:[%s1775_s11 + $0xa0] sm:$0xff]  ;;  %v1813_v47 = vld [vmem:[%s1775_s11 + $0x98] sm:$0xff]  ;;  %v1819_v50 = vld [vmem:[%s1775_s11 + $0x90] sm:$0xff] }
  0x56   : > { %824 = vmatpush.bf16.msra.mxu1 %v1791_v37  ;;  %v1452_v51 = vld [vmem:[%s1775_s11 + $0x8] sm:$0xff]  ;;  %v1451_v54 = vld [vmem:[%s1775_s11] sm:$0xff]  ;;  %v1303_v59 = vld [vmem:[%s1777_s12 + $0x90] sm:$0xf] }
  0x57   : > { %873 = vmatpush.bf16.msra.mxu2 %v1794_v38  ;;  %v1460_v52 = vld [vmem:[%s1775_s11 + $0x48] sm:$0xff]  ;;  %v1459_v55 = vld [vmem:[%s1775_s11 + $0x40] sm:$0xff]  ;;  %v1446_v60 = vld [vmem:[%s1777_s12 + $0x98] sm:$0xf0] }
  0x58   : > { %v1825_v53 = vld [vmem:[%s1775_s11 + $0x88] sm:$0xff]  ;;  %v1830_v56 = vld [vmem:[%s1775_s11 + $0x80] sm:$0xff]  ;;  %v1233_v62 = vld [vmem:[%s1777_s12 + $0xc] sm:$0xf0]  ;;  %v1304_v2 = vor.u32 %v1446_v60, %v1303_v59 }
  0x59   : > { %776 = vmatpush.bf16.msra.mxu0 %v1456_v39  ;;  %1524 = vmatpush.bf16.msra.mxu3 %v1456_v39  ;;  %v1231_v57 = vld [vmem:[%s1777_s12] sm:$0xf]  ;;  %v1428_v58 = vld [vmem:[%s1777_s12 + $0x8] sm:$0xf0]  ;;  %v1427_v61 = vld [vmem:[%s1777_s12 + $0x4] sm:$0xf] }
  0x5a   : > { %825 = vmatpush.bf16.msra.mxu1 %v1464_v40  ;;  %v1239_v63 = vld [vmem:[%s1777_s12 + $0x8] sm:$0xf]  ;;  %v1429_v0 = vld [vmem:[%s1777_s12 + $0x10] sm:$0xf0]  ;;  %v1232_v1 = vor.u32 %v1428_v58, %v1231_v57  ;;  %v1236_v3 = vor.u32 %v1427_v61, %v1233_v62  ;;  %v1243_v5 = vld [vmem:[%s1777_s12 + $0x18] sm:$0xf] }
  0x5b   : > { %874 = vmatpush.bf16.msra.mxu2 %v1801_v41  ;;  %v1240_v4 = vor.u32 %v1429_v0, %v1239_v63  ;;  %v1431_v6 = vld [vmem:[%s1777_s12 + $0x20] sm:$0xf0]  ;;  %v1315_v7 = vld [vmem:[%s1777_s12 + $0xa8] sm:$0xf]  ;;  %v1449_v8 = vld [vmem:[%s1777_s12 + $0xb0] sm:$0xf0] }
  0x5c   : > { %v1430_v9 = vld [vmem:[%s1777_s12 + $0x1c] sm:$0xf]  ;;  %v1245_v10 = vld [vmem:[%s1777_s12 + $0x24] sm:$0xf0]  ;;  %v1251_v11 = vld [vmem:[%s1777_s12 + $0x20] sm:$0xf]  ;;  %v1244_v13 = vor.u32 %v1431_v6, %v1243_v5  ;;  %v1316_v14 = vor.u32 %v1449_v8, %v1315_v7 }
  0x5d   : > { %777 = vmatpush.bf16.msra.mxu0 %v1455_v42  ;;  %1525 = vmatpush.bf16.msra.mxu3 %v1455_v42  ;;  %v1432_v12 = vld [vmem:[%s1777_s12 + $0x28] sm:$0xf0]  ;;  %v1248_v15 = vor.u32 %v1430_v9, %v1245_v10  ;;  %v1255_v17 = vld [vmem:[%s1777_s12 + $0x30] sm:$0xf]  ;;  %v1434_v18 = vld [vmem:[%s1777_s12 + $0x38] sm:$0xf0] }
  0x5e   : > { %826 = vmatpush.bf16.msra.mxu1 %v1463_v43  ;;  %v1252_v16 = vor.u32 %v1432_v12, %v1251_v11  ;;  %v1433_v19 = vld [vmem:[%s1777_s12 + $0x34] sm:$0xf]  ;;  %v1305_v21 = vld [vmem:[%s1777_s12 + $0x9c] sm:$0xf0]  ;;  %v1263_v23 = vld [vmem:[%s1777_s12 + $0x38] sm:$0xf]  ;;  %v1256_v25 = vor.u32 %v1434_v18, %v1255_v17 }
  0x5f   : > { %875 = vmatpush.bf16.msra.mxu2 %v1807_v44  ;;  %v1445_v20 = vld [vmem:[%s1777_s12 + $0x94] sm:$0xf]  ;;  %v1257_v22 = vld [vmem:[%s1777_s12 + $0x3c] sm:$0xf0]  ;;  %v1435_v24 = vld [vmem:[%s1777_s12 + $0x40] sm:$0xf0] }
  0x60   : > { %v1308_v26 = vor.u32 %v1445_v20, %v1305_v21  ;;  %v1260_v27 = vor.u32 %v1433_v19, %v1257_v22  ;;  %v1264_v28 = vor.u32 %v1435_v24, %v1263_v23  ;;  %v1267_v29 = vld [vmem:[%s1777_s12 + $0x48] sm:$0xf]  ;;  %v1437_v30 = vld [vmem:[%s1777_s12 + $0x50] sm:$0xf0]  ;;  %v1436_v31 = vld [vmem:[%s1777_s12 + $0x4c] sm:$0xf] }
  0x61   : > { %778 = vmatpush.bf16.msra.mxu0 %v1454_v45  ;;  %1526 = vmatpush.bf16.msra.mxu3 %v1454_v45  ;;  %v1448_v32 = vld [vmem:[%s1777_s12 + $0xac] sm:$0xf]  ;;  %v1317_v33 = vld [vmem:[%s1777_s12 + $0xb4] sm:$0xf0]  ;;  %v1438_v36 = vld [vmem:[%s1777_s12 + $0x58] sm:$0xf0] }
  0x62   : > { %827 = vmatpush.bf16.msra.mxu1 %v1462_v46  ;;  %v1320_v39 = vor.u32 %v1448_v32, %v1317_v33  ;;  %v1440_v42 = vld [vmem:[%s1777_s12 + $0x68] sm:$0xf0]  ;;  %v1447_v45 = vld [vmem:[%s1777_s12 + $0xa0] sm:$0xf0]  ;;  %v1323_v57 = vld [vmem:[%s1777_s12 + $0xb0] sm:$0xf] }
  0x63   : > { %876 = vmatpush.bf16.msra.mxu2 %v1813_v47  ;;  %v1293_v58 = vld [vmem:[%s1777_s12 + $0x84] sm:$0xf0]  ;;  %v1299_v59 = vld [vmem:[%s1777_s12 + $0x80] sm:$0xf]  ;;  %v1444_v60 = vld [vmem:[%s1777_s12 + $0x88] sm:$0xf0] }
  0x64   : > { %v1300_v0 = vor.u32 %v1444_v60, %v1299_v59  ;;  %v406_v5 = vld [vmem:[#allocation2 + $0x30] sm:$0xff]  ;;  %v408_v21 = vld [vmem:[#allocation2 + $0x58] sm:$0xff] }
  0x65   : > { %779 = vmatpush.bf16.msra.mxu0 %v1453_v48  ;;  %1527 = vmatpush.bf16.msra.mxu3 %v1453_v48  ;;  %v1441_v48 = vld [vmem:[%s1777_s12 + $0x70] sm:$0xf0] }
  0x66   : > { %828 = vmatpush.bf16.msra.mxu1 %v1461_v49 }
  0x67   : > { %877 = vmatpush.bf16.msra.mxu2 %v1819_v50 }
  0x69   : > { %780 = vmatpush.bf16.msra.mxu0 %v1452_v51  ;;  %1528 = vmatpush.bf16.msra.mxu3 %v1452_v51 }
  0x6a   : > { %829 = vmatpush.bf16.msra.mxu1 %v1460_v52 }
  0x6b   : > { %878 = vmatpush.bf16.msra.mxu2 %v1825_v53 }
  0x6d   : > { %781 = vmatpush.bf16.msra.mxu0 %v1451_v54  ;;  %1529 = vmatpush.bf16.msra.mxu3 %v1451_v54  ;;  %v1443_v54 = vld [vmem:[%s1777_s12 + $0x80] sm:$0xf0] }
  0x6e   : > { %830 = vmatpush.bf16.msra.mxu1 %v1459_v55 }
  0x6f   : > { %879 = vmatpush.bf16.msra.mxu2 %v1830_v56 }
  0x70   : > { %782 = vmatmul.bf16.vlgmr.msra.gmra.mxu0 %v1232_v1  ;;  %812 = vmatmul.bf16.vlgmr.msra.gmra.mxu3 %v1304_v2 }
  0x71   : > { %1530 = vmatpush.bf16.msrb.mxu3 %v1782_v34  ;;  %831 = vmatmul.bf16.vlgmr.msra.gmra.mxu1 %v1236_v3  ;;  %v1269_v34 = vld [vmem:[%s1777_s12 + $0x54] sm:$0xf0] }
  0x72   : > { %880 = vmatmul.bf16.vlgmr.msra.gmra.mxu2 %v1240_v4 }
  0x75   : > { %1531 = vmatpush.bf16.msrb.mxu3 %v1791_v37  ;;  %v1268_v37 = vor.u32 %v1437_v30, %v1267_v29  ;;  %v409_v29 = vld [vmem:[#allocation2 + $0x18] sm:$0xff] }
  0x79   : > { %1532 = vmatpush.bf16.msrb.mxu3 %v1464_v40 }
  0x7d   : > { %1533 = vmatpush.bf16.msrb.mxu3 %v1463_v43  ;;  %v1439_v43 = vld [vmem:[%s1777_s12 + $0x64] sm:$0xf] }
  0x80   : > { %787 = vmatmul.bf16.gmra.mxu0 %v1244_v13  ;;  %817 = vmatmul.bf16.gmra.mxu3 %v1316_v14  ;;  %v407_v13 = vld [vmem:[#allocation2] sm:$0xff] }
  0x81   : > { %1534 = vmatpush.bf16.msrb.mxu3 %v1462_v46  ;;  %836 = vmatmul.bf16.gmra.mxu1 %v1248_v15  ;;  %v1281_v46 = vld [vmem:[%s1777_s12 + $0x6c] sm:$0xf0] }
  0x82   : > { %885 = vmatmul.bf16.gmra.mxu2 %v1252_v16  ;;  %v1284_v51 = vor.u32 %v1439_v43, %v1281_v46 }
  0x85   : > { %1535 = vmatpush.bf16.msrb.mxu3 %v1461_v49 }
  0x89   : > { %1536 = vmatpush.bf16.msrb.mxu3 %v1460_v52 }
  0x8d   : > { %1537 = vmatpush.bf16.msrb.mxu3 %v1459_v55  ;;  %v1442_v55 = vld [vmem:[%s1777_s12 + $0x7c] sm:$0xf] }
  0x8e   : > { %v1296_v63 = vor.u32 %v1442_v55, %v1293_v58 }
  0x90   : > { %792 = vmatmul.bf16.gmra.mxu0 %v1256_v25  ;;  %861 = vmatmul.bf16.vlgmr.msrb.gmra.mxu3 %v1308_v26 }
  0x91   : > { %1538 = vmatpush.bf16.msra.mxu3 %v1785_v35  ;;  %841 = vmatmul.bf16.gmra.mxu1 %v1260_v27  ;;  %v1275_v35 = vld [vmem:[%s1777_s12 + $0x50] sm:$0xf] }
  0x92   : > { %890 = vmatmul.bf16.gmra.mxu2 %v1264_v28  ;;  %v1276_v40 = vor.u32 %v1438_v36, %v1275_v35 }
  0x95   : > { %1539 = vmatpush.bf16.msra.mxu3 %v1794_v38  ;;  %v1272_v38 = vor.u32 %v1436_v31, %v1269_v34 }
  0x99   : > { %1540 = vmatpush.bf16.msra.mxu3 %v1801_v41  ;;  %v1279_v41 = vld [vmem:[%s1777_s12 + $0x60] sm:$0xf] }
  0x9a   : > { %v1280_v49 = vor.u32 %v1440_v42, %v1279_v41 }
  0x9d   : > { %1541 = vmatpush.bf16.msra.mxu3 %v1807_v44  ;;  %v1311_v44 = vld [vmem:[%s1777_s12 + $0x98] sm:$0xf] }
  0xa0   : > { %797 = vmatmul.bf16.gmra.mxu0 %v1268_v37  ;;  %866 = vmatmul.bf16.gmra.mxu3 %v1320_v39  ;;  %v410_v37 = vld [vmem:[#allocation2 + $0x50] sm:$0xff] }
  0xa1   : > { %1542 = vmatpush.bf16.msra.mxu3 %v1813_v47  ;;  %846 = vmatmul.bf16.gmra.mxu1 %v1272_v38  ;;  %v1287_v47 = vld [vmem:[%s1777_s12 + $0x68] sm:$0xf] }
  0xa2   : > { %895 = vmatmul.bf16.gmra.mxu2 %v1276_v40  ;;  %v1288_v52 = vor.u32 %v1441_v48, %v1287_v47 }
  0xa5   : > { %1543 = vmatpush.bf16.msra.mxu3 %v1819_v50  ;;  %v1312_v50 = vor.u32 %v1447_v45, %v1311_v44  ;;  %v411_v45 = vld [vmem:[#allocation2 + $0x68] sm:$0xff] }
  0xa9   : > { %1544 = vmatpush.bf16.msra.mxu3 %v1825_v53  ;;  %v1291_v53 = vld [vmem:[%s1777_s12 + $0x78] sm:$0xf] }
  0xaa   : > { %v1292_v61 = vor.u32 %v1443_v54, %v1291_v53  ;;  %v412_v53 = vld [vmem:[#allocation2 + $0x8] sm:$0xff] }
  0xad   : > { %1545 = vmatpush.bf16.msra.mxu3 %v1830_v56  ;;  %v1450_v56 = vld [vmem:[%s1777_s12 + $0xb8] sm:$0xf0] }
  0xae   : > { %v1324_v62 = vor.u32 %v1450_v56, %v1323_v57 }
  0xb0   : > { %802 = vmatmul.bf16.gmra.mxu0 %v1280_v49  ;;  %910 = vmatmul.bf16.vlgmr.msra.gmra.mxu3 %v1312_v50 }
  0xb1   : > { %851 = vmatmul.bf16.gmra.mxu1 %v1284_v51 }
  0xb2   : > { %900 = vmatmul.bf16.gmra.mxu2 %v1288_v52 }
  0xc0   : > { %807 = vmatmul.bf16.gmra.mxu0 %v1292_v61  ;;  %915 = vmatmul.bf16.gmra.mxu3 %v1324_v62  ;;  %v413_v61 = vld [vmem:[#allocation2 + $0x48] sm:$0xff] }
  0xc1   : > { %856 = vmatmul.bf16.gmra.mxu1 %v1296_v63 }
  0xc2   : > { %905 = vmatmul.bf16.gmra.mxu2 %v1300_v0 }
  0xed   : > { %v783_v1 = vpop.f32.mrf.mxu0 }
  0xee   : > { %v832_v2 = vpop.f32.mrf.mxu1 }
  0xef   : > { %v833_v3 = vadd.f32 %v832_v2, %v783_v1 }
  0xf3   : > { %v1892_v4 = vpop.f32.mrf.mxu3 }
  0xf5   : > { %v881_v6 = vpop.f32.mrf.mxu2  ;;  %v785_v8 = vpop.f32.mrf.mxu0 }
  0xf6   : > { %v882_v7 = vadd.f32 %v881_v6, %v833_v3  ;;  %v834_v9 = vpop.f32.mrf.mxu1  ;;  %v418_v6 = vld [vmem:[#allocation2 + $0x60] sm:$0xff] }
  0xf7   : > { %v835_v11 = vadd.f32 %v834_v9, %v785_v8  ;;  %v414_v8 = vld [vmem:[#allocation2 + $0x40] sm:$0xff] }
  0xf8   : > { %v921_v10 = vadd.f32 %v882_v7, %v406_v5 }
  0xfa   : > { %937 = vst [vmem:[#allocation2 + $0x30] sm:$0xff] %v921_v10 }
  0xfb   : > { %v1894_v12 = vpop.f32.mrf.mxu3 }
  0xfd   : > { %v883_v14 = vpop.f32.mrf.mxu2  ;;  %v788_v16 = vpop.f32.mrf.mxu0 }
  0xfe   : > { %v884_v15 = vadd.f32 %v883_v14, %v835_v11  ;;  %v837_v17 = vpop.f32.mrf.mxu1 }
  0xff   : > { %v838_v19 = vadd.f32 %v837_v17, %v788_v16 }
 0x100   : > { %v922_v18 = vadd.f32 %v884_v15, %v407_v13 }
 0x102   : > { %938 = vst [vmem:[#allocation2] sm:$0xff] %v922_v18 }
 0x103   : > { %v1896_v20 = vpop.f32.mrf.mxu3 }
 0x105   : > { %v886_v22 = vpop.f32.mrf.mxu2  ;;  %v790_v24 = vpop.f32.mrf.mxu0 }
 0x106   : > { %v887_v23 = vadd.f32 %v886_v22, %v838_v19  ;;  %v839_v25 = vpop.f32.mrf.mxu1  ;;  %v419_v19 = vld [vmem:[#allocation2 + $0x70] sm:$0xff]  ;;  %v415_v22 = vld [vmem:[#allocation2 + $0x20] sm:$0xff] }
 0x107   : > { %v840_v27 = vadd.f32 %v839_v25, %v790_v24 }
 0x108   : > { %v923_v26 = vadd.f32 %v887_v23, %v408_v21 }
 0x10a   : > { %939 = vst [vmem:[#allocation2 + $0x58] sm:$0xff] %v923_v26 }
 0x10b   : > { %v1898_v28 = vpop.f32.mrf.mxu3 }
 0x10d   : > { %v888_v30 = vpop.f32.mrf.mxu2  ;;  %v793_v32 = vpop.f32.mrf.mxu0 }
 0x10e   : > { %v889_v31 = vadd.f32 %v888_v30, %v840_v27  ;;  %v842_v33 = vpop.f32.mrf.mxu1 }
 0x10f   : > { %v843_v35 = vadd.f32 %v842_v33, %v793_v32  ;;  %v420_v32 = vld [vmem:[#allocation2 + $0x78] sm:$0xff] }
 0x110   : > { %v924_v34 = vadd.f32 %v889_v31, %v409_v29 }
 0x112   : > { %940 = vst [vmem:[#allocation2 + $0x18] sm:$0xff] %v924_v34  ;;  %v416_v34 = vld [vmem:[#allocation2 + $0x10] sm:$0xff] }
 0x113   : > { %v862_v36 = vpop.f32.mrf.mxu3 }
 0x114   : > { %v863_v5 = vadd.f32 %v862_v36, %v1892_v4 }
 0x115   : > { %v891_v39 = vpop.f32.mrf.mxu2  ;;  %v795_v40 = vpop.f32.mrf.mxu0 }
 0x116   : > { %v892_v38 = vadd.f32 %v891_v39, %v843_v35  ;;  %v844_v41 = vpop.f32.mrf.mxu1 }
 0x117   : > { %v845_v43 = vadd.f32 %v844_v41, %v795_v40 }
 0x118   : > { %v925_v42 = vadd.f32 %v892_v38, %v410_v37 }
 0x11a   : > { %941 = vst [vmem:[#allocation2 + $0x50] sm:$0xff] %v925_v42 }
 0x11b   : > { %v864_v44 = vpop.f32.mrf.mxu3 }
 0x11c   : > { %v865_v17 = vadd.f32 %v864_v44, %v1894_v12 }
 0x11d   : > { %v893_v46 = vpop.f32.mrf.mxu2  ;;  %v798_v48 = vpop.f32.mrf.mxu0 }
 0x11e   : > { %v894_v47 = vadd.f32 %v893_v46, %v845_v43  ;;  %v847_v49 = vpop.f32.mrf.mxu1  ;;  %v421_v43 = vld [vmem:[#allocation2 + $0x28] sm:$0xff] }
 0x11f   : > { %v848_v51 = vadd.f32 %v847_v49, %v798_v48 }
 0x120   : > { %v926_v50 = vadd.f32 %v894_v47, %v411_v45  ;;  %v417_v45 = vld [vmem:[#allocation2 + $0x38] sm:$0xff] }
 0x122   : > { %942 = vst [vmem:[#allocation2 + $0x68] sm:$0xff] %v926_v50 }
 0x123   : > { %v867_v52 = vpop.f32.mrf.mxu3 }
 0x124   : > { %v868_v31 = vadd.f32 %v867_v52, %v1896_v20 }
 0x125   : > { %v896_v54 = vpop.f32.mrf.mxu2  ;;  %v800_v57 = vpop.f32.mrf.mxu0 }
 0x126   : > { %v897_v55 = vadd.f32 %v896_v54, %v848_v51  ;;  %v849_v56 = vpop.f32.mrf.mxu1 }
 0x127   : > { %v850_v59 = vadd.f32 %v849_v56, %v800_v57 }
 0x128   : > { %v927_v58 = vadd.f32 %v897_v55, %v412_v53 }
 0x12a   : > { %943 = vst [vmem:[#allocation2 + $0x8] sm:$0xff] %v927_v58 }
 0x12b   : > { %v869_v60 = vpop.f32.mrf.mxu3 }
 0x12c   : > { %v870_v41 = vadd.f32 %v869_v60, %v1898_v28 }
 0x12d   : > { %v898_v62 = vpop.f32.mrf.mxu2  ;;  %v803_v0 = vpop.f32.mrf.mxu0 }
 0x12e   : > { %v899_v63 = vadd.f32 %v898_v62, %v850_v59  ;;  %v852_v1 = vpop.f32.mrf.mxu1 }
 0x12f   : > { %v853_v3 = vadd.f32 %v852_v1, %v803_v0 }
 0x130   : > { %v928_v2 = vadd.f32 %v899_v63, %v413_v61 }
 0x132   : > { %944 = vst [vmem:[#allocation2 + $0x48] sm:$0xff] %v928_v2 }
 0x133   : > { %v911_v7 = vpop.f32.mrf.mxu3 }
 0x134   : > { %v912_v10 = vadd.f32 %v911_v7, %v863_v5 }
 0x135   : > { %v901_v9 = vpop.f32.mrf.mxu2  ;;  %v805_v13 = vpop.f32.mrf.mxu0 }
 0x136   : > { %v902_v11 = vadd.f32 %v901_v9, %v853_v3  ;;  %v933_v14 = vadd.f32 %v912_v10, %v418_v6  ;;  %v854_v15 = vpop.f32.mrf.mxu1 }
 0x137   : > { %v855_v18 = vadd.f32 %v854_v15, %v805_v13 }
 0x138   : > { %v929_v16 = vadd.f32 %v902_v11, %v414_v8  ;;  %949 = vst [vmem:[#allocation2 + $0x60] sm:$0xff] %v933_v14 }
 0x13a   : > { %945 = vst [vmem:[#allocation2 + $0x40] sm:$0xff] %v929_v16 }
 0x13b   : > { %v913_v21 = vpop.f32.mrf.mxu3 }
 0x13c   : > { %v914_v4 = vadd.f32 %v913_v21, %v865_v17 }
 0x13d   : > { %v903_v23 = vpop.f32.mrf.mxu2  ;;  %v808_v26 = vpop.f32.mrf.mxu0 }
 0x13e   : > { %v904_v24 = vadd.f32 %v903_v23, %v855_v18  ;;  %v934_v25 = vadd.f32 %v914_v4, %v419_v19  ;;  %v857_v27 = vpop.f32.mrf.mxu1 }
 0x13f   : > { %v858_v30 = vadd.f32 %v857_v27, %v808_v26 }
 0x140   : > { %v930_v29 = vadd.f32 %v904_v24, %v415_v22  ;;  %950 = vst [vmem:[#allocation2 + $0x70] sm:$0xff] %v934_v25 }
 0x142   : > { %946 = vst [vmem:[#allocation2 + $0x20] sm:$0xff] %v930_v29 }
 0x143   : > { %v916_v33 = vpop.f32.mrf.mxu3 }
 0x144   : > { %v917_v35 = vadd.f32 %v916_v33, %v868_v31 }
 0x145   : > { %v906_v12 = vpop.f32.mrf.mxu2  ;;  %v810_v38 = vpop.f32.mrf.mxu0 }
 0x146   : > { %v907_v36 = vadd.f32 %v906_v12, %v858_v30  ;;  %v935_v37 = vadd.f32 %v917_v35, %v420_v32  ;;  %v859_v40 = vpop.f32.mrf.mxu1 }
 0x147   : > { %v860_v42 = vadd.f32 %v859_v40, %v810_v38 }
 0x148   : > { %v931_v39 = vadd.f32 %v907_v36, %v416_v34  ;;  %951 = vst [vmem:[#allocation2 + $0x78] sm:$0xff] %v935_v37 }
 0x14a   : > { %947 = vst [vmem:[#allocation2 + $0x10] sm:$0xff] %v931_v39 }
 0x14b   : > { %v918_v44 = vpop.f32.mrf.mxu3 }
 0x14c   : > { %v919_v20 = vadd.f32 %v918_v44, %v870_v41 }
 0x14d   : > { %v908_v46 = vpop.f32.mrf.mxu2 }
 0x14e   : > { %v909_v47 = vadd.f32 %v908_v46, %v860_v42  ;;  %v936_v48 = vadd.f32 %v919_v20, %v421_v43  ;;  %956 = sbr.rel (%p1421_p11) target bundleno = 360 (0x168), region = 70 }
 0x150   : > { %v932_v49 = vadd.f32 %v909_v47, %v417_v45  ;;  %952 = vst [vmem:[#allocation2 + $0x28] sm:$0xff] %v936_v48 }
 0x152   : > { %948 = vst [vmem:[#allocation2 + $0x38] sm:$0xff] %v932_v49 }
 0x153   : > { %v957_v50 = vld [vmem:[#allocation2 + $0x30] sm:$0xff]  ;;  %v958_v51 = vld [vmem:[#allocation2] sm:$0xff]  ;;  %v959_v53 = vld [vmem:[#allocation2 + $0x58] sm:$0xff] }
 0x154   : > { %v1589_v28 = vld [vmem:[%s1970_s2] ss:$0 sm:$0xff]  ;;  %v960_v54 = vld [vmem:[#allocation2 + $0x18] sm:$0xff]  ;;  %v961_v55 = vld [vmem:[#allocation2 + $0x50] sm:$0xff] }
 0x155   : > { %v1911_v52 = vld [vmem:[%s1971_s3] ss:$0 sm:$0xff]  ;;  %v977_v57 = vmul.f32 %v1589_v28, %v957_v50  ;;  %v978_v56 = vmul.f32 %v1589_v28, %v958_v51  ;;  %v979_v58 = vmul.f32 %v1589_v28, %v959_v53  ;;  %v980_v59 = vmul.f32 %v1589_v28, %v960_v54  ;;  %v962_v60 = vld [vmem:[#allocation2 + $0x68] sm:$0xff]  ;;  %v967_v19 = vld [vmem:[#allocation2 + $0x10] sm:$0xff] }
 0x156   : > { %v963_v61 = vld [vmem:[#allocation2 + $0x8] sm:$0xff]  ;;  %v981_v63 = vmul.f32 %v1589_v28, %v961_v55  ;;  %v982_v0 = vmul.f32 %v1589_v28, %v962_v60  ;;  %v965_v13 = vld [vmem:[#allocation2 + $0x40] sm:$0xff]  ;;  %v970_v26 = vld [vmem:[#allocation2 + $0x70] sm:$0xff]  ;;  %v987_v35 = vmul.f32 %v1589_v28, %v967_v19 }
 0x157   : > { %v964_v62 = vld [vmem:[#allocation2 + $0x48] sm:$0xff]  ;;  %v983_v1 = vmul.f32 %v1589_v28, %v963_v61  ;;  %v997_v3 = vadd.f32 %v1911_v52, %v977_v57  ;;  %v998_v5 = vadd.f32 %v1911_v52, %v978_v56  ;;  %v999_v6 = vadd.f32 %v1911_v52, %v979_v58  ;;  %v966_v14 = vld [vmem:[#allocation2 + $0x20] sm:$0xff]  ;;  %v971_v32 = vld [vmem:[#allocation2 + $0x78] sm:$0xff] }
 0x158   : > { %v984_v2 = vmul.f32 %v1589_v28, %v964_v62  ;;  %v1000_v7 = vadd.f32 %v1911_v52, %v980_v59  ;;  %v1001_v8 = vadd.f32 %v1911_v52, %v981_v63  ;;  %v1002_v9 = vadd.f32 %v1911_v52, %v982_v0  ;;  %v969_v25 = vld [vmem:[#allocation2 + $0x60] sm:$0xff]  ;;  %v972_v33 = vld [vmem:[#allocation2 + $0x28] sm:$0xff] }
 0x159   : > { %v1003_v10 = vadd.f32 %v1911_v52, %v983_v1  ;;  %v1013_v15 = vmax.f32 %v997_v3, 0.0  ;;  %v1014_v16 = vmax.f32 %v998_v5, 0.0  ;;  %v1015_v17 = vmax.f32 %v999_v6, 0.0  ;;  %v968_v21 = vld [vmem:[#allocation2 + $0x38] sm:$0xff] }
 0x15a   : > { %v1004_v11 = vadd.f32 %v1911_v52, %v984_v2  ;;  %v1016_v18 = vmax.f32 %v1000_v7, 0.0  ;;  %v1017_v22 = vmax.f32 %v1001_v8, 0.0  ;;  %v1018_v23 = vmax.f32 %v1002_v9, 0.0 }
 0x15b   : > { %v1019_v4 = vmax.f32 %v1003_v10, 0.0  ;;  %v1478_v27 = vpack.c.bf16 %v1014_v16, %v1013_v15  ;;  %v985_v30 = vmul.f32 %v1589_v28, %v965_v13  ;;  %v986_v31 = vmul.f32 %v1589_v28, %v966_v14 }
 0x15c   : > { %v1020_v24 = vmax.f32 %v1004_v11, 0.0  ;;  %v1483_v29 = vpack.c.bf16 %v1016_v18, %v1015_v17  ;;  %v1488_v34 = vpack.c.bf16 %v1018_v23, %v1017_v22  ;;  %v988_v36 = vmul.f32 %v1589_v28, %v968_v21 }
 0x15d   : > { %1479 = vst [vmem:[%s1972_s4] sm:$0xff] %v1478_v27   ;;  %v1005_v37 = vadd.f32 %v1911_v52, %v985_v30  ;;  %v1006_v39 = vadd.f32 %v1911_v52, %v986_v31  ;;  %v989_v38 = vmul.f32 %v1589_v28, %v969_v25  ;;  %v990_v40 = vmul.f32 %v1589_v28, %v970_v26 }
 0x15e   : > { %v1493_v12 = vpack.c.bf16 %v1020_v24, %v1019_v4  ;;  %1515 = vst [vmem:[%s1972_s4 + $0x8] sm:$0xff] %v1483_v29   ;;  %v1007_v41 = vadd.f32 %v1911_v52, %v987_v35  ;;  %v1008_v42 = vadd.f32 %v1911_v52, %v988_v36  ;;  %v991_v43 = vmul.f32 %v1589_v28, %v971_v32 }
 0x15f   : > { %v992_v44 = vmul.f32 %v1589_v28, %v972_v33  ;;  %1516 = vst [vmem:[%s1972_s4 + $0x10] sm:$0xff] %v1488_v34   ;;  %v1021_v45 = vmax.f32 %v1005_v37, 0.0  ;;  %v1022_v46 = vmax.f32 %v1006_v39, 0.0  ;;  %v1009_v20 = vadd.f32 %v1911_v52, %v989_v38 }
 0x160   : > { %v1010_v47 = vadd.f32 %v1911_v52, %v990_v40  ;;  %1517 = vst [vmem:[%s1972_s4 + $0x18] sm:$0xff] %v1493_v12   ;;  %v1023_v48 = vmax.f32 %v1007_v41, 0.0  ;;  %v1024_v49 = vmax.f32 %v1008_v42, 0.0  ;;  %v1011_v50 = vadd.f32 %v1911_v52, %v991_v43 }
 0x161   : > { %v1012_v51 = vadd.f32 %v1911_v52, %v992_v44  ;;  %v1498_v28 = vpack.c.bf16 %v1022_v46, %v1021_v45  ;;  %v1025_v53 = vmax.f32 %v1009_v20, 0.0 }
 0x162   : > { %v1026_v54 = vmax.f32 %v1010_v47, 0.0  ;;  %v1503_v55 = vpack.c.bf16 %v1024_v49, %v1023_v48  ;;  %v1027_v57 = vmax.f32 %v1011_v50, 0.0 }
 0x163   : > { %v1028_v56 = vmax.f32 %v1012_v51, 0.0  ;;  %1518 = vst [vmem:[%s1972_s4 + $0x20] sm:$0xff] %v1498_v28  }
 0x164   : > { %v1508_v58 = vpack.c.bf16 %v1026_v54, %v1025_v53  ;;  %1519 = vst [vmem:[%s1972_s4 + $0x28] sm:$0xff] %v1503_v55  }
 0x165   : > { %v1513_v59 = vpack.c.bf16 %v1028_v56, %v1027_v57 }
 0x166   : > { %1520 = vst [vmem:[%s1972_s4 + $0x30] sm:$0xff] %v1508_v58  }
 0x167   : > { %1521 = vst [vmem:[%s1972_s4 + $0x38] sm:$0xff] %v1513_v59  }
 0x168 PF: > { %s14_s19 = sadd.s32 1, %s1629_s19   ;;  %s1973_s15 = smov %s1617_s16 }
 0x169   : > { %p11_p12 = scmp.ge.s32.totalorder %s14_s19, 5   ;;  %s1974_s16 = smov %s1692_s23 }
 0x16a   : > { %s1975_s17 = smov %s1625_s18  ;;  %s1976_s18 = smov %s1978_s20 }
 0x16b   :  { %13 = sbr.rel (!%p11_p12) target bundleno = 3 (0x3), region = 120 }

// kernel: gvb_resnet_forward.25
= control target key start
LH: loop header
LB: loop body
LE: loop exit
PB: predicated region body
PF: predicated region fallthrough
CT: control target
= control target key end

     0   :  { %s1828_s18 = smov 0   ;;  %s1830_s19 = smov 0   ;;  %s2181_s0 = inlined_call_operand.vmem [shape: bf16[128,1152], index: 0, kind: input, shape index: {}]   ;;  %s2182_s1 = inlined_call_operand.vmem [shape: bf16[1152,128], index: 1, kind: input, shape index: {}]   ;;  %s2183_s2 = inlined_call_operand.vmem [shape: f32[1,128], index: 2, kind: input, shape index: {}]   ;;  %s2184_s3 = inlined_call_operand.vmem [shape: f32[1,128], index: 3, kind: input, shape index: {}]   ;;  %s2185_s4 = inlined_call_operand.vmem [shape: bf16[128,128], index: 4, kind: input, shape index: {}]   ;;  %s2186_s5 = inlined_call_operand.vmem [shape: bf16[128,128], index: 5, kind: output, shape index: {}]  }
   0x1   :  { %s1832_s20 = smov 0   ;;  %s1834_s21 = smov 0  }
   0x2   :  { %s1836_s22 = smov 0  }
   0x3 LB: > { %s27_s23 = sadd.s32 1, %s1791_s21  ;;  %p50_p1 = scmp.ne.s32.totalorder %s1783_s19, %s1779_s18  ;;  %s1795_s22 = sphi %s1836_s22, %s15_s22   ;;  %s1791_s21 = sphi %s1834_s21, %s2190_s21   ;;  %s1787_s20 = sphi %s1832_s20, %s2189_s20   ;;  %s1783_s19 = sphi %s1830_s19, %s2188_s19   ;;  %s1779_s18 = sphi %s1828_s18, %s2187_s18  }
   0x4   : > { %p28_p0 = scmp.ge.s32.totalorder %s27_s23, 3  ;;  %p51_p2 = scmp.eq.s32.totalorder %s1795_s22, 0 }
   0x5   : > { %s43_s25 = sadd.s32 1, %s1783_s19  ;;  %p1319_p5 = scmp.ge.s32.totalorder %s1795_s22, 3 }
   0x6   : > { %s2192_s23 = smov (%p28_p0, %s27_s23), 0  ;;  %p52_p3 = por %p51_p2, %p50_p1 }
   0x7   : > { %s39_s24 = ssub.s32 %s1791_s21, %s2192_s23  ;;  %236 = sbr.rel (%p1319_p5) target bundleno = 49 (0x31), region = 28 }
   0x8   : > { %p41_p4 = scmp.eq.s32.totalorder %s39_s24, 0 }
   0xa   : > { %s1863_s26 = scalar_select %p41_p4, %s1783_s19, %s43_s25  }
   0xc   : > { %239 = sbr.rel (!%p52_p3) target bundleno = 49 (0x31), region = 32  ;;  %s241_s27 = sand.u32 (%p52_p3), 1, %s1783_s19  }
   0xd   : > { %s1553_s28 = smul.u32 (%p52_p3), 12, %s1791_s21 }
   0xe   : > { %s1712_s29 = smul.u32 (%p52_p3), 192, %s241_s27 }
   0xf   : > { %s1871_s7 = scalar_lea.vmem (%p52_p3), %s2181_s0, %s1553_s28 }
  0x10   : > { %v264_v0 = vld [vmem:[%s1871_s7] sm:$0xff] (%p52_p3)  ;;  %v268_v2 = vld [vmem:[%s1871_s7 + $0x48] sm:$0xff] (%p52_p3)  ;;  %s1876_s8 = scalar_lea.vmem (%p52_p3), [#allocation3], %s1712_s29  ;;  %v272_v4 = vld [vmem:[%s1871_s7 + $0x90] sm:$0xff] (%p52_p3) }
  0x11   : > { %v266_v1 = vld [vmem:[%s1871_s7 + $0x24] sm:$0xff]  ;;  %265 = vst [vmem:[%s1876_s8] sm:$0xff] %v264_v0  ;;  %v270_v3 = vld [vmem:[%s1871_s7 + $0x6c] sm:$0xff]  ;;  %v274_v5 = vld [vmem:[%s1871_s7 + $0xb4] sm:$0xff] }
  0x12   : > { %267 = vst [vmem:[%s1876_s8 + $0xc] sm:$0xff] %v266_v1  ;;  %v276_v6 = vld [vmem:[%s1871_s7 + $0xd8] sm:$0xff]  ;;  %v280_v8 = vld [vmem:[%s1871_s7 + $0x120] sm:$0xff]  ;;  %v284_v10 = vld [vmem:[%s1871_s7 + $0x168] sm:$0xff] }
  0x13   : > { %269 = vst [vmem:[%s1876_s8 + $0x18] sm:$0xff] %v268_v2  ;;  %v278_v7 = vld [vmem:[%s1871_s7 + $0xfc] sm:$0xff]  ;;  %v282_v9 = vld [vmem:[%s1871_s7 + $0x144] sm:$0xff]  ;;  %v286_v11 = vld [vmem:[%s1871_s7 + $0x18c] sm:$0xff] }
  0x14   : > { %271 = vst [vmem:[%s1876_s8 + $0x24] sm:$0xff] %v270_v3  ;;  %v288_v12 = vld [vmem:[%s1871_s7 + $0x1b0] sm:$0xff]  ;;  %v292_v14 = vld [vmem:[%s1871_s7 + $0x1f8] sm:$0xff]  ;;  %v1321_v16 = vld [vmem:[%s1871_s7 + $0x8] sm:$0xf] }
  0x15   : > { %273 = vst [vmem:[%s1876_s8 + $0x30] sm:$0xff] %v272_v4  ;;  %v290_v13 = vld [vmem:[%s1871_s7 + $0x1d4] sm:$0xff]  ;;  %v294_v15 = vld [vmem:[%s1871_s7 + $0x21c] sm:$0xff]  ;;  %v1323_v17 = vld [vmem:[%s1871_s7 + $0x2c] sm:$0xf] }
  0x16   : > { %275 = vst [vmem:[%s1876_s8 + $0x3c] sm:$0xff] %v274_v5  ;;  %v1325_v18 = vld [vmem:[%s1871_s7 + $0x50] sm:$0xf]  ;;  %v1327_v19 = vld [vmem:[%s1871_s7 + $0x74] sm:$0xf] }
  0x17   : > { %277 = vst [vmem:[%s1876_s8 + $0x48] sm:$0xff] %v276_v6  ;;  %v1329_v20 = vld [vmem:[%s1871_s7 + $0x98] sm:$0xf]  ;;  %v1331_v21 = vld [vmem:[%s1871_s7 + $0xbc] sm:$0xf] }
  0x18   : > { %279 = vst [vmem:[%s1876_s8 + $0x54] sm:$0xff] %v278_v7  ;;  %v1333_v22 = vld [vmem:[%s1871_s7 + $0xe0] sm:$0xf]  ;;  %v1335_v23 = vld [vmem:[%s1871_s7 + $0x104] sm:$0xf] }
  0x19   : > { %281 = vst [vmem:[%s1876_s8 + $0x60] sm:$0xff] %v280_v8  ;;  %v1337_v24 = vld [vmem:[%s1871_s7 + $0x128] sm:$0xf]  ;;  %v1339_v25 = vld [vmem:[%s1871_s7 + $0x14c] sm:$0xf] }
  0x1a   : > { %283 = vst [vmem:[%s1876_s8 + $0x6c] sm:$0xff] %v282_v9  ;;  %v1341_v26 = vld [vmem:[%s1871_s7 + $0x170] sm:$0xf]  ;;  %v1343_v27 = vld [vmem:[%s1871_s7 + $0x194] sm:$0xf] }
  0x1b   : > { %285 = vst [vmem:[%s1876_s8 + $0x78] sm:$0xff] %v284_v10  ;;  %v1345_v28 = vld [vmem:[%s1871_s7 + $0x1b8] sm:$0xf]  ;;  %v1347_v29 = vld [vmem:[%s1871_s7 + $0x1dc] sm:$0xf] }
  0x1c   : > { %287 = vst [vmem:[%s1876_s8 + $0x84] sm:$0xff] %v286_v11  ;;  %v1349_v30 = vld [vmem:[%s1871_s7 + $0x200] sm:$0xf]  ;;  %v1351_v31 = vld [vmem:[%s1871_s7 + $0x224] sm:$0xf] }
  0x1d   : > { %289 = vst [vmem:[%s1876_s8 + $0x90] sm:$0xff] %v288_v12 }
  0x1e   : > { %291 = vst [vmem:[%s1876_s8 + $0x9c] sm:$0xff] %v290_v13 }
  0x1f   : > { %293 = vst [vmem:[%s1876_s8 + $0xa8] sm:$0xff] %v292_v14 }
  0x20   : > { %295 = vst [vmem:[%s1876_s8 + $0xb4] sm:$0xff] %v294_v15 }
  0x21   : > { %1322 = vst [vmem:[%s1876_s8 + $0x8] sm:$0xf] %v1321_v16 }
  0x22   : > { %1324 = vst [vmem:[%s1876_s8 + $0x14] sm:$0xf] %v1323_v17 }
  0x23   : > { %1326 = vst [vmem:[%s1876_s8 + $0x20] sm:$0xf] %v1325_v18 }
  0x24   : > { %1328 = vst [vmem:[%s1876_s8 + $0x2c] sm:$0xf] %v1327_v19 }
  0x25   : > { %1330 = vst [vmem:[%s1876_s8 + $0x38] sm:$0xf] %v1329_v20 }
  0x26   : > { %1332 = vst [vmem:[%s1876_s8 + $0x44] sm:$0xf] %v1331_v21 }
  0x27   : > { %1334 = vst [vmem:[%s1876_s8 + $0x50] sm:$0xf] %v1333_v22 }
  0x28   : > { %1336 = vst [vmem:[%s1876_s8 + $0x5c] sm:$0xf] %v1335_v23 }
  0x29   : > { %1338 = vst [vmem:[%s1876_s8 + $0x68] sm:$0xf] %v1337_v24 }
  0x2a   : > { %1340 = vst [vmem:[%s1876_s8 + $0x74] sm:$0xf] %v1339_v25 }
  0x2b   : > { %1342 = vst [vmem:[%s1876_s8 + $0x80] sm:$0xf] %v1341_v26 }
  0x2c   : > { %1344 = vst [vmem:[%s1876_s8 + $0x8c] sm:$0xf] %v1343_v27 }
  0x2d   : > { %1346 = vst [vmem:[%s1876_s8 + $0x98] sm:$0xf] %v1345_v28 }
  0x2e   : > { %1348 = vst [vmem:[%s1876_s8 + $0xa4] sm:$0xf] %v1347_v29 }
  0x2f   : > { %1350 = vst [vmem:[%s1876_s8 + $0xb0] sm:$0xf] %v1349_v30 }
  0x30   : > { %1352 = vst [vmem:[%s1876_s8 + $0xbc] sm:$0xf] %v1351_v31 }
  0x31 PF: > { %p1353_p6 = scmp.ge.s32.totalorder %s1795_s22, 1  ;;  %p352_p7 = scmp.lt.s32.totalorder %s1795_s22, 4 }
  0x33   : > { %p353_p8 = pnand %p1353_p6, %p352_p7 }
  0x34   : > { %s359_s9 = sand.u32 (!%p353_p8), 1, %s1779_s18   ;;  %s413_s10 = smul.u32 (!%p353_p8), 48, %s1787_s20 }
  0x35   : > { %356 = sbr.rel (%p353_p8) target bundleno = 369 (0x171), region = 62  ;;  %p1355_p10 = scmp.ne.s32.totalorder (!%p353_p8), %s1787_s20, 0 }
  0x36   : > { %s1713_s11 = smul.u32 (!%p353_p8), 192, %s359_s9  ;;  %p414_p9 = scmp.lt.s32.totalorder (!%p353_p8), %s413_s10, 143 }
  0x38   : > { %s1948_s16 = scalar_lea.vmem (!%p353_p8), [#allocation3], %s1713_s11 }
  0x3a   : > { %s2194_s10 = smov (!%p414_p9, %s413_s10), 143  ;;  %449 = sbr.rel (%p1355_p10) target bundleno = 80 (0x50), region = 70 }
  0x3b   : > { %s1354_s12 = sshll.u32 %s2194_s10, 2 }
  0x3c   : > { %s1946_s15 = scalar_lea.vmem %s2182_s1, %s1354_s12 }
  0x3f   : > { %v1797_v32 = vmov 0.0  }
  0x40   : > { %450 = vst [vmem:[#allocation2 + $0x30] sm:$0xff] %v1797_v32 }
  0x41   : > { %451 = vst [vmem:[#allocation2] sm:$0xff] %v1797_v32 }
  0x42   : > { %452 = vst [vmem:[#allocation2 + $0x58] sm:$0xff] %v1797_v32 }
  0x43   : > { %453 = vst [vmem:[#allocation2 + $0x18] sm:$0xff] %v1797_v32 }
  0x44   : > { %454 = vst [vmem:[#allocation2 + $0x50] sm:$0xff] %v1797_v32 }
  0x45   : > { %455 = vst [vmem:[#allocation2 + $0x68] sm:$0xff] %v1797_v32 }
  0x46   : > { %456 = vst [vmem:[#allocation2 + $0x8] sm:$0xff] %v1797_v32 }
  0x47   : > { %457 = vst [vmem:[#allocation2 + $0x48] sm:$0xff] %v1797_v32 }
  0x48   : > { %458 = vst [vmem:[#allocation2 + $0x40] sm:$0xff] %v1797_v32 }
  0x49   : > { %459 = vst [vmem:[#allocation2 + $0x20] sm:$0xff] %v1797_v32 }
  0x4a   : > { %460 = vst [vmem:[#allocation2 + $0x10] sm:$0xff] %v1797_v32 }
  0x4b   : > { %461 = vst [vmem:[#allocation2 + $0x38] sm:$0xff] %v1797_v32 }
  0x4c   : > { %462 = vst [vmem:[#allocation2 + $0x60] sm:$0xff] %v1797_v32 }
  0x4d   : > { %463 = vst [vmem:[#allocation2 + $0x70] sm:$0xff] %v1797_v32 }
  0x4e   : > { %464 = vst [vmem:[#allocation2 + $0x78] sm:$0xff] %v1797_v32 }
  0x4f   : > { %465 = vst [vmem:[#allocation2 + $0x28] sm:$0xff] %v1797_v32 }
  0x50 PF: > { %v1585_v33 = vld [vmem:[%s1946_s15 + $0x38] sm:$0xff]  ;;  %v1584_v36 = vld [vmem:[%s1946_s15 + $0x30] sm:$0xff]  ;;  %v1583_v39 = vld [vmem:[%s1946_s15 + $0x28] sm:$0xff]  ;;  %p1548_p11 = scmp.ne.s32.totalorder %s1787_s20, 2 }
  0x51   : > { %v1953_v34 = vld [vmem:[%s1946_s15 + $0x78] sm:$0xff]  ;;  %834 = vmatpush.bf16.msra.mxu0 %v1585_v33  ;;  %1688 = vmatpush.bf16.msra.mxu3 %v1585_v33  ;;  %v1962_v37 = vld [vmem:[%s1946_s15 + $0x70] sm:$0xff]  ;;  %v1591_v40 = vld [vmem:[%s1946_s15 + $0x68] sm:$0xff] }
  0x52   : > { %v1956_v35 = vld [vmem:[%s1946_s15 + $0xb8] sm:$0xff]  ;;  %883 = vmatpush.bf16.msra.mxu1 %v1953_v34  ;;  %v1965_v38 = vld [vmem:[%s1946_s15 + $0xb0] sm:$0xff]  ;;  %v1972_v41 = vld [vmem:[%s1946_s15 + $0xa8] sm:$0xff] }
  0x53   : > { %932 = vmatpush.bf16.msra.mxu2 %v1956_v35  ;;  %v1582_v42 = vld [vmem:[%s1946_s15 + $0x20] sm:$0xff]  ;;  %v1581_v45 = vld [vmem:[%s1946_s15 + $0x18] sm:$0xff]  ;;  %v1580_v48 = vld [vmem:[%s1946_s15 + $0x10] sm:$0xff] }
  0x54   : > { %v1590_v43 = vld [vmem:[%s1946_s15 + $0x60] sm:$0xff]  ;;  %v1589_v46 = vld [vmem:[%s1946_s15 + $0x58] sm:$0xff]  ;;  %v1588_v49 = vld [vmem:[%s1946_s15 + $0x50] sm:$0xff] }
  0x55   : > { %835 = vmatpush.bf16.msra.mxu0 %v1584_v36  ;;  %1689 = vmatpush.bf16.msra.mxu3 %v1584_v36  ;;  %v1978_v44 = vld [vmem:[%s1946_s15 + $0xa0] sm:$0xff]  ;;  %v1984_v47 = vld [vmem:[%s1946_s15 + $0x98] sm:$0xff]  ;;  %v1990_v50 = vld [vmem:[%s1946_s15 + $0x90] sm:$0xff] }
  0x56   : > { %884 = vmatpush.bf16.msra.mxu1 %v1962_v37  ;;  %v1579_v51 = vld [vmem:[%s1946_s15 + $0x8] sm:$0xff]  ;;  %v1578_v54 = vld [vmem:[%s1946_s15] sm:$0xff]  ;;  %v1430_v59 = vld [vmem:[%s1948_s16 + $0x90] sm:$0xf] }
  0x57   : > { %933 = vmatpush.bf16.msra.mxu2 %v1965_v38  ;;  %v1587_v52 = vld [vmem:[%s1946_s15 + $0x48] sm:$0xff]  ;;  %v1586_v55 = vld [vmem:[%s1946_s15 + $0x40] sm:$0xff]  ;;  %v1573_v60 = vld [vmem:[%s1948_s16 + $0x98] sm:$0xf0] }
  0x58   : > { %v1996_v53 = vld [vmem:[%s1946_s15 + $0x88] sm:$0xff]  ;;  %v2001_v56 = vld [vmem:[%s1946_s15 + $0x80] sm:$0xff]  ;;  %v1360_v62 = vld [vmem:[%s1948_s16 + $0xc] sm:$0xf0]  ;;  %v1431_v2 = vor.u32 %v1573_v60, %v1430_v59 }
  0x59   : > { %836 = vmatpush.bf16.msra.mxu0 %v1583_v39  ;;  %1690 = vmatpush.bf16.msra.mxu3 %v1583_v39  ;;  %v1358_v57 = vld [vmem:[%s1948_s16] sm:$0xf]  ;;  %v1555_v58 = vld [vmem:[%s1948_s16 + $0x8] sm:$0xf0]  ;;  %v1554_v61 = vld [vmem:[%s1948_s16 + $0x4] sm:$0xf] }
  0x5a   : > { %885 = vmatpush.bf16.msra.mxu1 %v1591_v40  ;;  %v1366_v63 = vld [vmem:[%s1948_s16 + $0x8] sm:$0xf]  ;;  %v1556_v0 = vld [vmem:[%s1948_s16 + $0x10] sm:$0xf0]  ;;  %v1359_v1 = vor.u32 %v1555_v58, %v1358_v57  ;;  %v1363_v3 = vor.u32 %v1554_v61, %v1360_v62  ;;  %v1370_v5 = vld [vmem:[%s1948_s16 + $0x18] sm:$0xf] }
  0x5b   : > { %934 = vmatpush.bf16.msra.mxu2 %v1972_v41  ;;  %v1367_v4 = vor.u32 %v1556_v0, %v1366_v63  ;;  %v1558_v6 = vld [vmem:[%s1948_s16 + $0x20] sm:$0xf0]  ;;  %v1442_v7 = vld [vmem:[%s1948_s16 + $0xa8] sm:$0xf]  ;;  %v1576_v8 = vld [vmem:[%s1948_s16 + $0xb0] sm:$0xf0] }
  0x5c   : > { %v1557_v9 = vld [vmem:[%s1948_s16 + $0x1c] sm:$0xf]  ;;  %v1372_v10 = vld [vmem:[%s1948_s16 + $0x24] sm:$0xf0]  ;;  %v1378_v11 = vld [vmem:[%s1948_s16 + $0x20] sm:$0xf]  ;;  %v1371_v13 = vor.u32 %v1558_v6, %v1370_v5  ;;  %v1443_v14 = vor.u32 %v1576_v8, %v1442_v7 }
  0x5d   : > { %837 = vmatpush.bf16.msra.mxu0 %v1582_v42  ;;  %1691 = vmatpush.bf16.msra.mxu3 %v1582_v42  ;;  %v1559_v12 = vld [vmem:[%s1948_s16 + $0x28] sm:$0xf0]  ;;  %v1375_v15 = vor.u32 %v1557_v9, %v1372_v10  ;;  %v1382_v17 = vld [vmem:[%s1948_s16 + $0x30] sm:$0xf]  ;;  %v1561_v18 = vld [vmem:[%s1948_s16 + $0x38] sm:$0xf0] }
  0x5e   : > { %886 = vmatpush.bf16.msra.mxu1 %v1590_v43  ;;  %v1379_v16 = vor.u32 %v1559_v12, %v1378_v11  ;;  %v1560_v19 = vld [vmem:[%s1948_s16 + $0x34] sm:$0xf]  ;;  %v1432_v21 = vld [vmem:[%s1948_s16 + $0x9c] sm:$0xf0]  ;;  %v1390_v23 = vld [vmem:[%s1948_s16 + $0x38] sm:$0xf]  ;;  %v1383_v25 = vor.u32 %v1561_v18, %v1382_v17 }
  0x5f   : > { %935 = vmatpush.bf16.msra.mxu2 %v1978_v44  ;;  %v1572_v20 = vld [vmem:[%s1948_s16 + $0x94] sm:$0xf]  ;;  %v1384_v22 = vld [vmem:[%s1948_s16 + $0x3c] sm:$0xf0]  ;;  %v1562_v24 = vld [vmem:[%s1948_s16 + $0x40] sm:$0xf0] }
  0x60   : > { %v1435_v26 = vor.u32 %v1572_v20, %v1432_v21  ;;  %v1387_v27 = vor.u32 %v1560_v19, %v1384_v22  ;;  %v1391_v28 = vor.u32 %v1562_v24, %v1390_v23  ;;  %v1394_v29 = vld [vmem:[%s1948_s16 + $0x48] sm:$0xf]  ;;  %v1564_v30 = vld [vmem:[%s1948_s16 + $0x50] sm:$0xf0]  ;;  %v1563_v31 = vld [vmem:[%s1948_s16 + $0x4c] sm:$0xf] }
  0x61   : > { %838 = vmatpush.bf16.msra.mxu0 %v1581_v45  ;;  %1692 = vmatpush.bf16.msra.mxu3 %v1581_v45  ;;  %v1575_v32 = vld [vmem:[%s1948_s16 + $0xac] sm:$0xf]  ;;  %v1444_v33 = vld [vmem:[%s1948_s16 + $0xb4] sm:$0xf0]  ;;  %v1565_v36 = vld [vmem:[%s1948_s16 + $0x58] sm:$0xf0] }
  0x62   : > { %887 = vmatpush.bf16.msra.mxu1 %v1589_v46  ;;  %v1447_v39 = vor.u32 %v1575_v32, %v1444_v33  ;;  %v1567_v42 = vld [vmem:[%s1948_s16 + $0x68] sm:$0xf0]  ;;  %v1574_v45 = vld [vmem:[%s1948_s16 + $0xa0] sm:$0xf0]  ;;  %v1450_v57 = vld [vmem:[%s1948_s16 + $0xb0] sm:$0xf] }
  0x63   : > { %936 = vmatpush.bf16.msra.mxu2 %v1984_v47  ;;  %v1420_v58 = vld [vmem:[%s1948_s16 + $0x84] sm:$0xf0]  ;;  %v1426_v59 = vld [vmem:[%s1948_s16 + $0x80] sm:$0xf]  ;;  %v1571_v60 = vld [vmem:[%s1948_s16 + $0x88] sm:$0xf0] }
  0x64   : > { %v1427_v0 = vor.u32 %v1571_v60, %v1426_v59  ;;  %v466_v5 = vld [vmem:[#allocation2 + $0x30] sm:$0xff]  ;;  %v468_v21 = vld [vmem:[#allocation2 + $0x58] sm:$0xff] }
  0x65   : > { %839 = vmatpush.bf16.msra.mxu0 %v1580_v48  ;;  %1693 = vmatpush.bf16.msra.mxu3 %v1580_v48  ;;  %v1568_v48 = vld [vmem:[%s1948_s16 + $0x70] sm:$0xf0] }
  0x66   : > { %888 = vmatpush.bf16.msra.mxu1 %v1588_v49 }
  0x67   : > { %937 = vmatpush.bf16.msra.mxu2 %v1990_v50 }
  0x69   : > { %840 = vmatpush.bf16.msra.mxu0 %v1579_v51  ;;  %1694 = vmatpush.bf16.msra.mxu3 %v1579_v51 }
  0x6a   : > { %889 = vmatpush.bf16.msra.mxu1 %v1587_v52 }
  0x6b   : > { %938 = vmatpush.bf16.msra.mxu2 %v1996_v53 }
  0x6d   : > { %841 = vmatpush.bf16.msra.mxu0 %v1578_v54  ;;  %1695 = vmatpush.bf16.msra.mxu3 %v1578_v54  ;;  %v1570_v54 = vld [vmem:[%s1948_s16 + $0x80] sm:$0xf0] }
  0x6e   : > { %890 = vmatpush.bf16.msra.mxu1 %v1586_v55 }
  0x6f   : > { %939 = vmatpush.bf16.msra.mxu2 %v2001_v56 }
  0x70   : > { %842 = vmatmul.bf16.vlgmr.msra.gmra.mxu0 %v1359_v1  ;;  %872 = vmatmul.bf16.vlgmr.msra.gmra.mxu3 %v1431_v2 }
  0x71   : > { %1696 = vmatpush.bf16.msrb.mxu3 %v1953_v34  ;;  %891 = vmatmul.bf16.vlgmr.msra.gmra.mxu1 %v1363_v3  ;;  %v1396_v34 = vld [vmem:[%s1948_s16 + $0x54] sm:$0xf0] }
  0x72   : > { %940 = vmatmul.bf16.vlgmr.msra.gmra.mxu2 %v1367_v4 }
  0x75   : > { %1697 = vmatpush.bf16.msrb.mxu3 %v1962_v37  ;;  %v1395_v37 = vor.u32 %v1564_v30, %v1394_v29  ;;  %v469_v29 = vld [vmem:[#allocation2 + $0x18] sm:$0xff] }
  0x79   : > { %1698 = vmatpush.bf16.msrb.mxu3 %v1591_v40 }
  0x7d   : > { %1699 = vmatpush.bf16.msrb.mxu3 %v1590_v43  ;;  %v1566_v43 = vld [vmem:[%s1948_s16 + $0x64] sm:$0xf] }
  0x80   : > { %847 = vmatmul.bf16.gmra.mxu0 %v1371_v13  ;;  %877 = vmatmul.bf16.gmra.mxu3 %v1443_v14  ;;  %v467_v13 = vld [vmem:[#allocation2] sm:$0xff] }
  0x81   : > { %1700 = vmatpush.bf16.msrb.mxu3 %v1589_v46  ;;  %896 = vmatmul.bf16.gmra.mxu1 %v1375_v15  ;;  %v1408_v46 = vld [vmem:[%s1948_s16 + $0x6c] sm:$0xf0] }
  0x82   : > { %945 = vmatmul.bf16.gmra.mxu2 %v1379_v16  ;;  %v1411_v51 = vor.u32 %v1566_v43, %v1408_v46 }
  0x85   : > { %1701 = vmatpush.bf16.msrb.mxu3 %v1588_v49 }
  0x89   : > { %1702 = vmatpush.bf16.msrb.mxu3 %v1587_v52 }
  0x8d   : > { %1703 = vmatpush.bf16.msrb.mxu3 %v1586_v55  ;;  %v1569_v55 = vld [vmem:[%s1948_s16 + $0x7c] sm:$0xf] }
  0x8e   : > { %v1423_v63 = vor.u32 %v1569_v55, %v1420_v58 }
  0x90   : > { %852 = vmatmul.bf16.gmra.mxu0 %v1383_v25  ;;  %921 = vmatmul.bf16.vlgmr.msrb.gmra.mxu3 %v1435_v26 }
  0x91   : > { %1704 = vmatpush.bf16.msra.mxu3 %v1956_v35  ;;  %901 = vmatmul.bf16.gmra.mxu1 %v1387_v27  ;;  %v1402_v35 = vld [vmem:[%s1948_s16 + $0x50] sm:$0xf] }
  0x92   : > { %950 = vmatmul.bf16.gmra.mxu2 %v1391_v28  ;;  %v1403_v40 = vor.u32 %v1565_v36, %v1402_v35 }
  0x95   : > { %1705 = vmatpush.bf16.msra.mxu3 %v1965_v38  ;;  %v1399_v38 = vor.u32 %v1563_v31, %v1396_v34 }
  0x99   : > { %1706 = vmatpush.bf16.msra.mxu3 %v1972_v41  ;;  %v1406_v41 = vld [vmem:[%s1948_s16 + $0x60] sm:$0xf] }
  0x9a   : > { %v1407_v49 = vor.u32 %v1567_v42, %v1406_v41 }
  0x9d   : > { %1707 = vmatpush.bf16.msra.mxu3 %v1978_v44  ;;  %v1438_v44 = vld [vmem:[%s1948_s16 + $0x98] sm:$0xf] }
  0xa0   : > { %857 = vmatmul.bf16.gmra.mxu0 %v1395_v37  ;;  %926 = vmatmul.bf16.gmra.mxu3 %v1447_v39  ;;  %v470_v37 = vld [vmem:[#allocation2 + $0x50] sm:$0xff] }
  0xa1   : > { %1708 = vmatpush.bf16.msra.mxu3 %v1984_v47  ;;  %906 = vmatmul.bf16.gmra.mxu1 %v1399_v38  ;;  %v1414_v47 = vld [vmem:[%s1948_s16 + $0x68] sm:$0xf] }
  0xa2   : > { %955 = vmatmul.bf16.gmra.mxu2 %v1403_v40  ;;  %v1415_v52 = vor.u32 %v1568_v48, %v1414_v47 }
  0xa5   : > { %1709 = vmatpush.bf16.msra.mxu3 %v1990_v50  ;;  %v1439_v50 = vor.u32 %v1574_v45, %v1438_v44  ;;  %v471_v45 = vld [vmem:[#allocation2 + $0x68] sm:$0xff] }
  0xa9   : > { %1710 = vmatpush.bf16.msra.mxu3 %v1996_v53  ;;  %v1418_v53 = vld [vmem:[%s1948_s16 + $0x78] sm:$0xf] }
  0xaa   : > { %v1419_v61 = vor.u32 %v1570_v54, %v1418_v53  ;;  %v472_v53 = vld [vmem:[#allocation2 + $0x8] sm:$0xff] }
  0xad   : > { %1711 = vmatpush.bf16.msra.mxu3 %v2001_v56  ;;  %v1577_v56 = vld [vmem:[%s1948_s16 + $0xb8] sm:$0xf0] }
  0xae   : > { %v1451_v62 = vor.u32 %v1577_v56, %v1450_v57 }
  0xb0   : > { %862 = vmatmul.bf16.gmra.mxu0 %v1407_v49  ;;  %970 = vmatmul.bf16.vlgmr.msra.gmra.mxu3 %v1439_v50 }
  0xb1   : > { %911 = vmatmul.bf16.gmra.mxu1 %v1411_v51 }
  0xb2   : > { %960 = vmatmul.bf16.gmra.mxu2 %v1415_v52 }
  0xc0   : > { %867 = vmatmul.bf16.gmra.mxu0 %v1419_v61  ;;  %975 = vmatmul.bf16.gmra.mxu3 %v1451_v62  ;;  %v473_v61 = vld [vmem:[#allocation2 + $0x48] sm:$0xff] }
  0xc1   : > { %916 = vmatmul.bf16.gmra.mxu1 %v1423_v63 }
  0xc2   : > { %965 = vmatmul.bf16.gmra.mxu2 %v1427_v0 }
  0xed   : > { %v843_v1 = vpop.f32.mrf.mxu0 }
  0xee   : > { %v892_v2 = vpop.f32.mrf.mxu1 }
  0xef   : > { %v893_v3 = vadd.f32 %v892_v2, %v843_v1 }
  0xf3   : > { %v2063_v4 = vpop.f32.mrf.mxu3 }
  0xf5   : > { %v941_v6 = vpop.f32.mrf.mxu2  ;;  %v845_v8 = vpop.f32.mrf.mxu0 }
  0xf6   : > { %v942_v7 = vadd.f32 %v941_v6, %v893_v3  ;;  %v894_v9 = vpop.f32.mrf.mxu1  ;;  %v478_v6 = vld [vmem:[#allocation2 + $0x60] sm:$0xff] }
  0xf7   : > { %v895_v11 = vadd.f32 %v894_v9, %v845_v8  ;;  %v474_v8 = vld [vmem:[#allocation2 + $0x40] sm:$0xff] }
  0xf8   : > { %v981_v10 = vadd.f32 %v942_v7, %v466_v5 }
  0xfa   : > { %997 = vst [vmem:[#allocation2 + $0x30] sm:$0xff] %v981_v10 }
  0xfb   : > { %v2065_v12 = vpop.f32.mrf.mxu3 }
  0xfd   : > { %v943_v14 = vpop.f32.mrf.mxu2  ;;  %v848_v16 = vpop.f32.mrf.mxu0 }
  0xfe   : > { %v944_v15 = vadd.f32 %v943_v14, %v895_v11  ;;  %v897_v17 = vpop.f32.mrf.mxu1 }
  0xff   : > { %v898_v19 = vadd.f32 %v897_v17, %v848_v16 }
 0x100   : > { %v982_v18 = vadd.f32 %v944_v15, %v467_v13 }
 0x102   : > { %998 = vst [vmem:[#allocation2] sm:$0xff] %v982_v18 }
 0x103   : > { %v2067_v20 = vpop.f32.mrf.mxu3 }
 0x105   : > { %v946_v22 = vpop.f32.mrf.mxu2  ;;  %v850_v24 = vpop.f32.mrf.mxu0 }
 0x106   : > { %v947_v23 = vadd.f32 %v946_v22, %v898_v19  ;;  %v899_v25 = vpop.f32.mrf.mxu1  ;;  %v479_v19 = vld [vmem:[#allocation2 + $0x70] sm:$0xff]  ;;  %v475_v22 = vld [vmem:[#allocation2 + $0x20] sm:$0xff] }
 0x107   : > { %v900_v27 = vadd.f32 %v899_v25, %v850_v24 }
 0x108   : > { %v983_v26 = vadd.f32 %v947_v23, %v468_v21 }
 0x10a   : > { %999 = vst [vmem:[#allocation2 + $0x58] sm:$0xff] %v983_v26 }
 0x10b   : > { %v2069_v28 = vpop.f32.mrf.mxu3 }
 0x10d   : > { %v948_v30 = vpop.f32.mrf.mxu2  ;;  %v853_v32 = vpop.f32.mrf.mxu0 }
 0x10e   : > { %v949_v31 = vadd.f32 %v948_v30, %v900_v27  ;;  %v902_v33 = vpop.f32.mrf.mxu1 }
 0x10f   : > { %v903_v35 = vadd.f32 %v902_v33, %v853_v32  ;;  %v480_v32 = vld [vmem:[#allocation2 + $0x78] sm:$0xff] }
 0x110   : > { %v984_v34 = vadd.f32 %v949_v31, %v469_v29 }
 0x112   : > { %1000 = vst [vmem:[#allocation2 + $0x18] sm:$0xff] %v984_v34  ;;  %v476_v34 = vld [vmem:[#allocation2 + $0x10] sm:$0xff] }
 0x113   : > { %v922_v36 = vpop.f32.mrf.mxu3 }
 0x114   : > { %v923_v5 = vadd.f32 %v922_v36, %v2063_v4 }
 0x115   : > { %v951_v39 = vpop.f32.mrf.mxu2  ;;  %v855_v40 = vpop.f32.mrf.mxu0 }
 0x116   : > { %v952_v38 = vadd.f32 %v951_v39, %v903_v35  ;;  %v904_v41 = vpop.f32.mrf.mxu1 }
 0x117   : > { %v905_v43 = vadd.f32 %v904_v41, %v855_v40 }
 0x118   : > { %v985_v42 = vadd.f32 %v952_v38, %v470_v37 }
 0x11a   : > { %1001 = vst [vmem:[#allocation2 + $0x50] sm:$0xff] %v985_v42 }
 0x11b   : > { %v924_v44 = vpop.f32.mrf.mxu3 }
 0x11c   : > { %v925_v17 = vadd.f32 %v924_v44, %v2065_v12 }
 0x11d   : > { %v953_v46 = vpop.f32.mrf.mxu2  ;;  %v858_v48 = vpop.f32.mrf.mxu0 }
 0x11e   : > { %v954_v47 = vadd.f32 %v953_v46, %v905_v43  ;;  %v907_v49 = vpop.f32.mrf.mxu1  ;;  %v481_v43 = vld [vmem:[#allocation2 + $0x28] sm:$0xff] }
 0x11f   : > { %v908_v51 = vadd.f32 %v907_v49, %v858_v48 }
 0x120   : > { %v986_v50 = vadd.f32 %v954_v47, %v471_v45  ;;  %v477_v45 = vld [vmem:[#allocation2 + $0x38] sm:$0xff] }
 0x122   : > { %1002 = vst [vmem:[#allocation2 + $0x68] sm:$0xff] %v986_v50 }
 0x123   : > { %v927_v52 = vpop.f32.mrf.mxu3 }
 0x124   : > { %v928_v31 = vadd.f32 %v927_v52, %v2067_v20 }
 0x125   : > { %v956_v54 = vpop.f32.mrf.mxu2  ;;  %v860_v57 = vpop.f32.mrf.mxu0 }
 0x126   : > { %v957_v55 = vadd.f32 %v956_v54, %v908_v51  ;;  %v909_v56 = vpop.f32.mrf.mxu1 }
 0x127   : > { %v910_v59 = vadd.f32 %v909_v56, %v860_v57 }
 0x128   : > { %v987_v58 = vadd.f32 %v957_v55, %v472_v53 }
 0x12a   : > { %1003 = vst [vmem:[#allocation2 + $0x8] sm:$0xff] %v987_v58 }
 0x12b   : > { %v929_v60 = vpop.f32.mrf.mxu3 }
 0x12c   : > { %v930_v41 = vadd.f32 %v929_v60, %v2069_v28 }
 0x12d   : > { %v958_v62 = vpop.f32.mrf.mxu2  ;;  %v863_v0 = vpop.f32.mrf.mxu0 }
 0x12e   : > { %v959_v63 = vadd.f32 %v958_v62, %v910_v59  ;;  %v912_v1 = vpop.f32.mrf.mxu1 }
 0x12f   : > { %v913_v3 = vadd.f32 %v912_v1, %v863_v0 }
 0x130   : > { %v988_v2 = vadd.f32 %v959_v63, %v473_v61 }
 0x132   : > { %1004 = vst [vmem:[#allocation2 + $0x48] sm:$0xff] %v988_v2 }
 0x133   : > { %v971_v7 = vpop.f32.mrf.mxu3 }
 0x134   : > { %v972_v10 = vadd.f32 %v971_v7, %v923_v5 }
 0x135   : > { %v961_v9 = vpop.f32.mrf.mxu2  ;;  %v865_v13 = vpop.f32.mrf.mxu0 }
 0x136   : > { %v962_v11 = vadd.f32 %v961_v9, %v913_v3  ;;  %v993_v14 = vadd.f32 %v972_v10, %v478_v6  ;;  %v914_v15 = vpop.f32.mrf.mxu1 }
 0x137   : > { %v915_v18 = vadd.f32 %v914_v15, %v865_v13 }
 0x138   : > { %v989_v16 = vadd.f32 %v962_v11, %v474_v8  ;;  %1009 = vst [vmem:[#allocation2 + $0x60] sm:$0xff] %v993_v14 }
 0x13a   : > { %1005 = vst [vmem:[#allocation2 + $0x40] sm:$0xff] %v989_v16 }
 0x13b   : > { %v973_v21 = vpop.f32.mrf.mxu3 }
 0x13c   : > { %v974_v4 = vadd.f32 %v973_v21, %v925_v17 }
 0x13d   : > { %v963_v23 = vpop.f32.mrf.mxu2  ;;  %v868_v26 = vpop.f32.mrf.mxu0 }
 0x13e   : > { %v964_v24 = vadd.f32 %v963_v23, %v915_v18  ;;  %v994_v25 = vadd.f32 %v974_v4, %v479_v19  ;;  %v917_v27 = vpop.f32.mrf.mxu1 }
 0x13f   : > { %v918_v30 = vadd.f32 %v917_v27, %v868_v26 }
 0x140   : > { %v990_v29 = vadd.f32 %v964_v24, %v475_v22  ;;  %1010 = vst [vmem:[#allocation2 + $0x70] sm:$0xff] %v994_v25 }
 0x142   : > { %1006 = vst [vmem:[#allocation2 + $0x20] sm:$0xff] %v990_v29 }
 0x143   : > { %v976_v33 = vpop.f32.mrf.mxu3 }
 0x144   : > { %v977_v35 = vadd.f32 %v976_v33, %v928_v31 }
 0x145   : > { %v966_v12 = vpop.f32.mrf.mxu2  ;;  %v870_v38 = vpop.f32.mrf.mxu0 }
 0x146   : > { %v967_v36 = vadd.f32 %v966_v12, %v918_v30  ;;  %v995_v37 = vadd.f32 %v977_v35, %v480_v32  ;;  %v919_v40 = vpop.f32.mrf.mxu1 }
 0x147   : > { %v920_v42 = vadd.f32 %v919_v40, %v870_v38 }
 0x148   : > { %v991_v39 = vadd.f32 %v967_v36, %v476_v34  ;;  %1011 = vst [vmem:[#allocation2 + $0x78] sm:$0xff] %v995_v37 }
 0x14a   : > { %1007 = vst [vmem:[#allocation2 + $0x10] sm:$0xff] %v991_v39 }
 0x14b   : > { %v978_v44 = vpop.f32.mrf.mxu3 }
 0x14c   : > { %v979_v20 = vadd.f32 %v978_v44, %v930_v41 }
 0x14d   : > { %v968_v46 = vpop.f32.mrf.mxu2 }
 0x14e   : > { %v969_v47 = vadd.f32 %v968_v46, %v920_v42  ;;  %v996_v48 = vadd.f32 %v979_v20, %v481_v43  ;;  %1016 = sbr.rel (%p1548_p11) target bundleno = 369 (0x171), region = 74 }
 0x150   : > { %v992_v49 = vadd.f32 %v969_v47, %v477_v45  ;;  %1012 = vst [vmem:[#allocation2 + $0x28] sm:$0xff] %v996_v48 }
 0x152   : > { %1008 = vst [vmem:[#allocation2 + $0x38] sm:$0xff] %v992_v49 }
 0x153   : > { %v1017_v50 = vld [vmem:[#allocation2 + $0x30] sm:$0xff]  ;;  %v1018_v51 = vld [vmem:[#allocation2] sm:$0xff]  ;;  %v1019_v54 = vld [vmem:[#allocation2 + $0x58] sm:$0xff] }
 0x154   : > { %v2079_v28 = vld [vmem:[%s2183_s2] ss:$0 sm:$0xff]  ;;  %v1020_v55 = vld [vmem:[#allocation2 + $0x18] sm:$0xff]  ;;  %v1674_v60 = vld [vmem:[%s2185_s4 + $0x8] sm:$0xff]  }
 0x155   : > { %v2084_v52 = vld [vmem:[%s2184_s3] ss:$0 sm:$0xff]  ;;  %v1037_v57 = vmul.f32 %v2079_v28, %v1017_v50  ;;  %v1038_v56 = vmul.f32 %v2079_v28, %v1018_v51  ;;  %v1021_v61 = vld [vmem:[#allocation2 + $0x50] sm:$0xff]  ;;  %v1022_v62 = vld [vmem:[#allocation2 + $0x68] sm:$0xff]  ;;  %v1039_v63 = vmul.f32 %v2079_v28, %v1019_v54  ;;  %v1040_v0 = vmul.f32 %v2079_v28, %v1020_v55 }
 0x156   : > { %v1603_v53 = vld [vmem:[%s2185_s4] sm:$0xff]   ;;  %v1608_v1 = vunpack.c.l.bf16 %v1674_v60  ;;  %v1609_v2 = vunpack.c.h.bf16 %v1674_v60  ;;  %v1675_v3 = vld [vmem:[%s2185_s4 + $0x10] sm:$0xff]   ;;  %v1041_v7 = vmul.f32 %v2079_v28, %v1021_v61  ;;  %v1042_v8 = vmul.f32 %v2079_v28, %v1022_v62  ;;  %v1023_v9 = vld [vmem:[#allocation2 + $0x8] sm:$0xff] }
 0x157   : > { %v1604_v58 = vunpack.c.l.bf16 %v1603_v53  ;;  %v1605_v59 = vunpack.c.h.bf16 %v1603_v53  ;;  %v1057_v5 = vadd.f32 %v2084_v52, %v1037_v57  ;;  %v1058_v6 = vadd.f32 %v2084_v52, %v1038_v56  ;;  %v1024_v10 = vld [vmem:[#allocation2 + $0x48] sm:$0xff]  ;;  %v1676_v24 = vld [vmem:[%s2185_s4 + $0x18] sm:$0xff]   ;;  %v1025_v30 = vld [vmem:[#allocation2 + $0x40] sm:$0xff] }
 0x158   : > { %v1059_v11 = vadd.f32 %v2084_v52, %v1039_v63  ;;  %v1060_v13 = vadd.f32 %v2084_v52, %v1040_v0  ;;  %v1612_v14 = vunpack.c.l.bf16 %v1675_v3  ;;  %v1613_v15 = vunpack.c.h.bf16 %v1675_v3  ;;  %v1026_v31 = vld [vmem:[#allocation2 + $0x20] sm:$0xff]  ;;  %v1027_v40 = vld [vmem:[#allocation2 + $0x10] sm:$0xff]  ;;  %v1678_v46 = vld [vmem:[%s2185_s4 + $0x28] sm:$0xff]  }
 0x159   : > { %v1105_v16 = vadd.f32 %v1604_v58, %v1057_v5  ;;  %v1106_v17 = vadd.f32 %v1605_v59, %v1058_v6  ;;  %v1061_v18 = vadd.f32 %v2084_v52, %v1041_v7  ;;  %v1062_v19 = vadd.f32 %v2084_v52, %v1042_v8  ;;  %v1677_v35 = vld [vmem:[%s2185_s4 + $0x20] sm:$0xff]   ;;  %v1028_v45 = vld [vmem:[#allocation2 + $0x38] sm:$0xff]  ;;  %v1030_v57 = vld [vmem:[#allocation2 + $0x70] sm:$0xff] }
 0x15a   : > { %v1107_v21 = vadd.f32 %v1608_v1, %v1059_v11  ;;  %v1108_v22 = vadd.f32 %v1609_v2, %v1060_v13  ;;  %v1043_v23 = vmul.f32 %v2079_v28, %v1023_v9  ;;  %v1044_v4 = vmul.f32 %v2079_v28, %v1024_v10  ;;  %v1029_v55 = vld [vmem:[#allocation2 + $0x60] sm:$0xff]  ;;  %v1679_v56 = vld [vmem:[%s2185_s4 + $0x30] sm:$0xff]   ;;  %v1031_v7 = vld [vmem:[#allocation2 + $0x78] sm:$0xff] }
 0x15b   : > { %v1121_v25 = vmax.f32 %v1105_v16, 0.0  ;;  %v1122_v26 = vmax.f32 %v1106_v17, 0.0  ;;  %v1109_v27 = vadd.f32 %v1612_v14, %v1061_v18  ;;  %v1110_v29 = vadd.f32 %v1613_v15, %v1062_v19  ;;  %v1032_v8 = vld [vmem:[#allocation2 + $0x28] sm:$0xff]  ;;  %v1680_v14 = vld [vmem:[%s2185_s4 + $0x38] sm:$0xff]  }
 0x15c   : > { %v1123_v32 = vmax.f32 %v1107_v21, 0.0  ;;  %v1124_v33 = vmax.f32 %v1108_v22, 0.0  ;;  %v1063_v34 = vadd.f32 %v2084_v52, %v1043_v23  ;;  %v1064_v12 = vadd.f32 %v2084_v52, %v1044_v4 }
 0x15d   : > { %v1637_v36 = vpack.c.bf16 %v1122_v26, %v1121_v25  ;;  %v1125_v37 = vmax.f32 %v1109_v27, 0.0  ;;  %v1126_v39 = vmax.f32 %v1110_v29, 0.0  ;;  %v1616_v38 = vunpack.c.l.bf16 %v1676_v24 }
 0x15e   : > { %v1642_v41 = vpack.c.bf16 %v1124_v33, %v1123_v32  ;;  %v1617_v42 = vunpack.c.h.bf16 %v1676_v24  ;;  %v1045_v43 = vmul.f32 %v2079_v28, %v1025_v30  ;;  %v1046_v44 = vmul.f32 %v2079_v28, %v1026_v31 }
 0x15f   : > { %1638 = vst [vmem:[%s2186_s5] sm:$0xff] %v1637_v36   ;;  %v1647_v20 = vpack.c.bf16 %v1126_v39, %v1125_v37  ;;  %v1111_v47 = vadd.f32 %v1616_v38, %v1063_v34  ;;  %v1620_v48 = vunpack.c.l.bf16 %v1677_v35  ;;  %v1621_v49 = vunpack.c.h.bf16 %v1677_v35 }
 0x160   : > { %1681 = vst [vmem:[%s2186_s5 + $0x8] sm:$0xff] %v1642_v41   ;;  %v1112_v50 = vadd.f32 %v1617_v42, %v1064_v12  ;;  %v1065_v51 = vadd.f32 %v2084_v52, %v1045_v43  ;;  %v1066_v53 = vadd.f32 %v2084_v52, %v1046_v44  ;;  %v1047_v54 = vmul.f32 %v2079_v28, %v1027_v40 }
 0x161   : > { %1682 = vst [vmem:[%s2186_s5 + $0x10] sm:$0xff] %v1647_v20   ;;  %v1127_v58 = vmax.f32 %v1111_v47, 0.0  ;;  %v1048_v59 = vmul.f32 %v2079_v28, %v1028_v45  ;;  %v1624_v60 = vunpack.c.l.bf16 %v1678_v46  ;;  %v1625_v61 = vunpack.c.h.bf16 %v1678_v46 }
 0x162   : > { %v1128_v62 = vmax.f32 %v1112_v50, 0.0  ;;  %v1113_v63 = vadd.f32 %v1620_v48, %v1065_v51  ;;  %v1114_v0 = vadd.f32 %v1621_v49, %v1066_v53  ;;  %v1067_v1 = vadd.f32 %v2084_v52, %v1047_v54 }
 0x163   : > { %v1068_v2 = vadd.f32 %v2084_v52, %v1048_v59  ;;  %v1049_v3 = vmul.f32 %v2079_v28, %v1029_v55  ;;  %v1050_v5 = vmul.f32 %v2079_v28, %v1030_v57  ;;  %v1628_v6 = vunpack.c.l.bf16 %v1679_v56 }
 0x164   : > { %v1652_v9 = vpack.c.bf16 %v1128_v62, %v1127_v58  ;;  %v1129_v10 = vmax.f32 %v1113_v63, 0.0  ;;  %v1130_v11 = vmax.f32 %v1114_v0, 0.0  ;;  %v1115_v13 = vadd.f32 %v1624_v60, %v1067_v1 }
 0x165   : > { %v1116_v15 = vadd.f32 %v1625_v61, %v1068_v2  ;;  %v1069_v16 = vadd.f32 %v2084_v52, %v1049_v3  ;;  %v1070_v17 = vadd.f32 %v2084_v52, %v1050_v5  ;;  %v1629_v18 = vunpack.c.h.bf16 %v1679_v56 }
 0x166   : > { %1683 = vst [vmem:[%s2186_s5 + $0x18] sm:$0xff] %v1652_v9   ;;  %v1657_v19 = vpack.c.bf16 %v1130_v11, %v1129_v10  ;;  %v1131_v21 = vmax.f32 %v1115_v13, 0.0  ;;  %v1051_v22 = vmul.f32 %v2079_v28, %v1031_v7  ;;  %v1052_v23 = vmul.f32 %v2079_v28, %v1032_v8 }
 0x167   : > { %v1132_v4 = vmax.f32 %v1116_v15, 0.0  ;;  %v1117_v24 = vadd.f32 %v1628_v6, %v1069_v16  ;;  %v1118_v25 = vadd.f32 %v1629_v18, %v1070_v17  ;;  %v1632_v26 = vunpack.c.l.bf16 %v1680_v14 }
 0x168   : > { %1684 = vst [vmem:[%s2186_s5 + $0x20] sm:$0xff] %v1657_v19   ;;  %v1071_v27 = vadd.f32 %v2084_v52, %v1051_v22  ;;  %v1072_v29 = vadd.f32 %v2084_v52, %v1052_v23  ;;  %v1633_v30 = vunpack.c.h.bf16 %v1680_v14 }
 0x169   : > { %v1662_v31 = vpack.c.bf16 %v1132_v4, %v1131_v21  ;;  %v1133_v32 = vmax.f32 %v1117_v24, 0.0  ;;  %v1134_v33 = vmax.f32 %v1118_v25, 0.0 }
 0x16a   : > { %v1119_v34 = vadd.f32 %v1632_v26, %v1071_v27  ;;  %v1120_v12 = vadd.f32 %v1633_v30, %v1072_v29 }
 0x16b   : > { %1685 = vst [vmem:[%s2186_s5 + $0x28] sm:$0xff] %v1662_v31   ;;  %v1667_v28 = vpack.c.bf16 %v1134_v33, %v1133_v32 }
 0x16c   : > { %v1135_v35 = vmax.f32 %v1119_v34, 0.0  ;;  %v1136_v36 = vmax.f32 %v1120_v12, 0.0 }
 0x16d   : > { %1686 = vst [vmem:[%s2186_s5 + $0x30] sm:$0xff] %v1667_v28  }
 0x16e   : > { %v1672_v37 = vpack.c.bf16 %v1136_v36, %v1135_v35 }
 0x170   : > { %1687 = vst [vmem:[%s2186_s5 + $0x38] sm:$0xff] %v1672_v37  }
 0x171 PF: > { %s15_s22 = sadd.s32 1, %s1795_s22   ;;  %s2187_s18 = smov %s1783_s19 }
 0x172   : > { %p12_p12 = scmp.ge.s32.totalorder %s15_s22, 5   ;;  %s2188_s19 = smov %s1863_s26 }
 0x173   : > { %s2189_s20 = smov %s1791_s21  ;;  %s2190_s21 = smov %s2192_s23 }
 0x174   :  { %14 = sbr.rel (!%p12_p12) target bundleno = 3 (0x3), region = 127 }

// kernel: gvb_resnet_forward.28
= control target key start
LH: loop header
LB: loop body
LE: loop exit
PB: predicated region body
PF: predicated region fallthrough
CT: control target
= control target key end

     0   :  { %s1113_s15 = smov 0   ;;  %s1115_s16 = smov 0   ;;  %s1232_s0 = inlined_call_operand.vmem [shape: bf16[32,1152], index: 0, kind: input, shape index: {}]   ;;  %s1233_s1 = inlined_call_operand.vmem [shape: bf16[1152,128], index: 1, kind: input, shape index: {}]   ;;  %s1234_s2 = inlined_call_operand.vmem [shape: f32[1,128], index: 2, kind: input, shape index: {}]   ;;  %s1235_s3 = inlined_call_operand.vmem [shape: f32[1,128], index: 3, kind: input, shape index: {}]   ;;  %s1236_s4 = inlined_call_operand.vmem [shape: bf16[32,128], index: 4, kind: output, shape index: {}]  }
   0x1   :  { %s1117_s17 = smov 0   ;;  %s1119_s18 = smov 0  }
   0x2   :  { %s1121_s19 = smov 0  }
   0x3 LB: > { %s26_s20 = sadd.s32 1, %s1081_s18  ;;  %p49_p1 = scmp.ne.s32.totalorder %s1073_s16, %s1069_s15  ;;  %s1085_s19 = sphi %s1121_s19, %s14_s19   ;;  %s1081_s18 = sphi %s1119_s18, %s1240_s18   ;;  %s1077_s17 = sphi %s1117_s17, %s1239_s17   ;;  %s1073_s16 = sphi %s1115_s16, %s1238_s16   ;;  %s1069_s15 = sphi %s1113_s15, %s1237_s15  }
   0x4   : > { %p27_p0 = scmp.ge.s32.totalorder %s26_s20, 3  ;;  %p50_p2 = scmp.eq.s32.totalorder %s1085_s19, 0 }
   0x5   : > { %s42_s22 = sadd.s32 1, %s1073_s16  ;;  %p814_p5 = scmp.ge.s32.totalorder %s1085_s19, 3 }
   0x6   : > { %s1242_s20 = smov (%p27_p0, %s26_s20), 0  ;;  %p51_p3 = por %p50_p2, %p49_p1 }
   0x7   : > { %s38_s21 = ssub.s32 %s1081_s18, %s1242_s20  ;;  %195 = sbr.rel (%p814_p5) target bundleno = 25 (0x19), region = 24 }
   0x8   : > { %p40_p4 = scmp.eq.s32.totalorder %s38_s21, 0 }
   0xa   : > { %s1148_s23 = scalar_select %p40_p4, %s1073_s16, %s42_s22  }
   0xc   : > { %198 = sbr.rel (!%p51_p3) target bundleno = 25 (0x19), region = 28  ;;  %s200_s24 = sand.u32 (%p51_p3), 1, %s1073_s16  }
   0xd   : > { %s952_s25 = smul.u32 (%p51_p3), 12, %s1081_s18 }
   0xe   : > { %s1002_s26 = smul.u32 (%p51_p3), 48, %s200_s24 }
   0xf   : > { %s208_s29 = scalar_lea.vmem (%p51_p3), %s1232_s0, %s952_s25 }
  0x10   : > { %v223_v0 = vld [vmem:[%s208_s29] sm:$0xff] (%p51_p3)  ;;  %v227_v2 = vld [vmem:[%s208_s29 + $0x48] sm:$0xff] (%p51_p3)  ;;  %s202_s30 = scalar_lea.vmem (%p51_p3), [#allocation3], %s1002_s26  ;;  %v820_v6 = vld [vmem:[%s208_s29 + $0x50] sm:$0xf] (%p51_p3) }
  0x11   : > { %v225_v1 = vld [vmem:[%s208_s29 + $0x24] sm:$0xff]  ;;  %224 = vst [vmem:[%s202_s30] sm:$0xff] %v223_v0  ;;  %v229_v3 = vld [vmem:[%s208_s29 + $0x6c] sm:$0xff]  ;;  %v822_v7 = vld [vmem:[%s208_s29 + $0x74] sm:$0xf] }
  0x12   : > { %226 = vst [vmem:[%s202_s30 + $0xc] sm:$0xff] %v225_v1  ;;  %v816_v4 = vld [vmem:[%s208_s29 + $0x8] sm:$0xf]  ;;  %v818_v5 = vld [vmem:[%s208_s29 + $0x2c] sm:$0xf] }
  0x13   : > { %228 = vst [vmem:[%s202_s30 + $0x18] sm:$0xff] %v227_v2 }
  0x14   : > { %230 = vst [vmem:[%s202_s30 + $0x24] sm:$0xff] %v229_v3 }
  0x15   : > { %817 = vst [vmem:[%s202_s30 + $0x8] sm:$0xf] %v816_v4 }
  0x16   : > { %819 = vst [vmem:[%s202_s30 + $0x14] sm:$0xf] %v818_v5 }
  0x17   : > { %821 = vst [vmem:[%s202_s30 + $0x20] sm:$0xf] %v820_v6 }
  0x18   : > { %823 = vst [vmem:[%s202_s30 + $0x2c] sm:$0xf] %v822_v7 }
  0x19 PF: > { %p824_p6 = scmp.ge.s32.totalorder %s1085_s19, 1  ;;  %p263_p7 = scmp.lt.s32.totalorder %s1085_s19, 4 }
  0x1b   : > { %p264_p8 = pnand %p824_p6, %p263_p7 }
  0x1c   : > { %s270_s5 = sand.u32 (!%p264_p8), 1, %s1069_s15   ;;  %s314_s6 = smul.u32 (!%p264_p8), 48, %s1077_s17 }
  0x1d   : > { %267 = sbr.rel (%p264_p8) target bundleno = 255 (0xff), region = 58  ;;  %p826_p10 = scmp.ne.s32.totalorder (!%p264_p8), %s1077_s17, 0 }
  0x1e   : > { %s1003_s7 = smul.u32 (!%p264_p8), 48, %s270_s5  ;;  %p315_p9 = scmp.lt.s32.totalorder (!%p264_p8), %s314_s6, 143 }
  0x20   : > { %s1165_s12 = scalar_lea.vmem (!%p264_p8), [#allocation3], %s1003_s7 }
  0x22   : > { %s1244_s6 = smov (!%p315_p9, %s314_s6), 143  ;;  %341 = sbr.rel (%p826_p10) target bundleno = 44 (0x2c), region = 66 }
  0x23   : > { %s825_s8 = sshll.u32 %s1244_s6, 2 }
  0x24   : > { %s1163_s11 = scalar_lea.vmem %s1233_s1, %s825_s8 }
  0x27   : > { %v1087_v8 = vmov 0.0  }
  0x28   : > { %342 = vst [vmem:[#allocation2 + $0x10] sm:$0xff] %v1087_v8 }
  0x29   : > { %343 = vst [vmem:[#allocation2] sm:$0xff] %v1087_v8 }
  0x2a   : > { %344 = vst [vmem:[#allocation2 + $0x18] sm:$0xff] %v1087_v8 }
  0x2b   : > { %345 = vst [vmem:[#allocation2 + $0x8] sm:$0xff] %v1087_v8 }
  0x2c PF: > { %v966_v9 = vld [vmem:[%s1163_s11 + $0x38] sm:$0xff]  ;;  %v965_v12 = vld [vmem:[%s1163_s11 + $0x30] sm:$0xff]  ;;  %v964_v15 = vld [vmem:[%s1163_s11 + $0x28] sm:$0xff]  ;;  %p947_p11 = scmp.ne.s32.totalorder %s1077_s17, 2 }
  0x2d   : > { %v974_v10 = vld [vmem:[%s1163_s11 + $0x78] sm:$0xff]  ;;  %582 = vmatpush.bf16.msra.mxu0 %v966_v9  ;;  %v973_v13 = vld [vmem:[%s1163_s11 + $0x70] sm:$0xff]  ;;  %994 = vmatpush.bf16.msra.mxu3 %v966_v9  ;;  %v972_v16 = vld [vmem:[%s1163_s11 + $0x68] sm:$0xff] }
  0x2e   : > { %v982_v11 = vld [vmem:[%s1163_s11 + $0xb8] sm:$0xff]  ;;  %601 = vmatpush.bf16.msra.mxu1 %v974_v10  ;;  %v981_v14 = vld [vmem:[%s1163_s11 + $0xb0] sm:$0xff]  ;;  %v980_v17 = vld [vmem:[%s1163_s11 + $0xa8] sm:$0xff] }
  0x2f   : > { %620 = vmatpush.bf16.msra.mxu2 %v982_v11  ;;  %v963_v18 = vld [vmem:[%s1163_s11 + $0x20] sm:$0xff]  ;;  %v962_v21 = vld [vmem:[%s1163_s11 + $0x18] sm:$0xff]  ;;  %v961_v24 = vld [vmem:[%s1163_s11 + $0x10] sm:$0xff] }
  0x30   : > { %v971_v19 = vld [vmem:[%s1163_s11 + $0x60] sm:$0xff]  ;;  %v970_v22 = vld [vmem:[%s1163_s11 + $0x58] sm:$0xff]  ;;  %v969_v25 = vld [vmem:[%s1163_s11 + $0x50] sm:$0xff] }
  0x31   : > { %583 = vmatpush.bf16.msra.mxu0 %v965_v12  ;;  %995 = vmatpush.bf16.msra.mxu3 %v965_v12  ;;  %v979_v20 = vld [vmem:[%s1163_s11 + $0xa0] sm:$0xff]  ;;  %v978_v23 = vld [vmem:[%s1163_s11 + $0x98] sm:$0xff]  ;;  %v977_v26 = vld [vmem:[%s1163_s11 + $0x90] sm:$0xff] }
  0x32   : > { %602 = vmatpush.bf16.msra.mxu1 %v973_v13  ;;  %v960_v27 = vld [vmem:[%s1163_s11 + $0x8] sm:$0xff]  ;;  %v959_v30 = vld [vmem:[%s1163_s11] sm:$0xff]  ;;  %v346_v54 = vld [vmem:[#allocation2 + $0x10] sm:$0xff] }
  0x33   : > { %621 = vmatpush.bf16.msra.mxu2 %v981_v14  ;;  %v968_v28 = vld [vmem:[%s1163_s11 + $0x48] sm:$0xff]  ;;  %v967_v31 = vld [vmem:[%s1163_s11 + $0x40] sm:$0xff]  ;;  %v348_v4 = vld [vmem:[#allocation2 + $0x18] sm:$0xff] }
  0x34   : > { %v976_v29 = vld [vmem:[%s1163_s11 + $0x88] sm:$0xff]  ;;  %v975_v32 = vld [vmem:[%s1163_s11 + $0x80] sm:$0xff] }
  0x35   : > { %584 = vmatpush.bf16.msra.mxu0 %v964_v15  ;;  %996 = vmatpush.bf16.msra.mxu3 %v964_v15  ;;  %v829_v33 = vld [vmem:[%s1165_s12] sm:$0xf]  ;;  %v954_v34 = vld [vmem:[%s1165_s12 + $0x8] sm:$0xf0]  ;;  %v953_v35 = vld [vmem:[%s1165_s12 + $0x4] sm:$0xf] }
  0x36   : > { %603 = vmatpush.bf16.msra.mxu1 %v972_v16  ;;  %v831_v36 = vld [vmem:[%s1165_s12 + $0xc] sm:$0xf0]  ;;  %v837_v37 = vld [vmem:[%s1165_s12 + $0x8] sm:$0xf]  ;;  %v955_v38 = vld [vmem:[%s1165_s12 + $0x10] sm:$0xf0]  ;;  %v830_v41 = vor.u32 %v954_v34, %v829_v33 }
  0x37   : > { %622 = vmatpush.bf16.msra.mxu2 %v980_v17  ;;  %v841_v39 = vld [vmem:[%s1165_s12 + $0x18] sm:$0xf]  ;;  %v957_v40 = vld [vmem:[%s1165_s12 + $0x20] sm:$0xf0]  ;;  %v834_v42 = vor.u32 %v953_v35, %v831_v36  ;;  %v838_v43 = vor.u32 %v955_v38, %v837_v37  ;;  %v956_v45 = vld [vmem:[%s1165_s12 + $0x1c] sm:$0xf] }
  0x38   : > { %v842_v44 = vor.u32 %v957_v40, %v841_v39  ;;  %v843_v46 = vld [vmem:[%s1165_s12 + $0x24] sm:$0xf0]  ;;  %v849_v47 = vld [vmem:[%s1165_s12 + $0x20] sm:$0xf]  ;;  %v958_v48 = vld [vmem:[%s1165_s12 + $0x28] sm:$0xf0] }
  0x39   : > { %585 = vmatpush.bf16.msra.mxu0 %v963_v18  ;;  %997 = vmatpush.bf16.msra.mxu3 %v963_v18  ;;  %v846_v49 = vor.u32 %v956_v45, %v843_v46  ;;  %v850_v50 = vor.u32 %v958_v48, %v849_v47  ;;  %v347_v61 = vld [vmem:[#allocation2] sm:$0xff]  ;;  %v349_v11 = vld [vmem:[#allocation2 + $0x8] sm:$0xff] }
  0x3a   : > { %604 = vmatpush.bf16.msra.mxu1 %v971_v19 }
  0x3b   : > { %623 = vmatpush.bf16.msra.mxu2 %v979_v20 }
  0x3d   : > { %586 = vmatpush.bf16.msra.mxu0 %v962_v21  ;;  %998 = vmatpush.bf16.msra.mxu3 %v962_v21 }
  0x3e   : > { %605 = vmatpush.bf16.msra.mxu1 %v970_v22 }
  0x3f   : > { %624 = vmatpush.bf16.msra.mxu2 %v978_v23 }
  0x41   : > { %587 = vmatpush.bf16.msra.mxu0 %v961_v24  ;;  %999 = vmatpush.bf16.msra.mxu3 %v961_v24 }
  0x42   : > { %606 = vmatpush.bf16.msra.mxu1 %v969_v25 }
  0x43   : > { %625 = vmatpush.bf16.msra.mxu2 %v977_v26 }
  0x45   : > { %588 = vmatpush.bf16.msra.mxu0 %v960_v27  ;;  %1000 = vmatpush.bf16.msra.mxu3 %v960_v27 }
  0x46   : > { %607 = vmatpush.bf16.msra.mxu1 %v968_v28 }
  0x47   : > { %626 = vmatpush.bf16.msra.mxu2 %v976_v29 }
  0x49   : > { %589 = vmatpush.bf16.msra.mxu0 %v959_v30  ;;  %1001 = vmatpush.bf16.msra.mxu3 %v959_v30 }
  0x4a   : > { %608 = vmatpush.bf16.msra.mxu1 %v967_v31 }
  0x4b   : > { %627 = vmatpush.bf16.msra.mxu2 %v975_v32 }
  0x4c   : > { %590 = vmatmul.bf16.vlgmr.msra.gmra.mxu0 %v830_v41  ;;  %595 = vmatmul.bf16.vlgmr.msra.gmra.mxu3 %v842_v44 }
  0x4d   : > { %609 = vmatmul.bf16.vlgmr.msra.gmra.mxu1 %v834_v42 }
  0x4e   : > { %628 = vmatmul.bf16.vlgmr.msra.gmra.mxu2 %v838_v43 }
  0x5d   : > { %614 = vmatmul.bf16.gmra.mxu1 %v846_v49 }
  0x5e   : > { %633 = vmatmul.bf16.gmra.mxu2 %v850_v50 }
  0xc9   : > { %v591_v52 = vpop.f32.mrf.mxu0 }
  0xca   : > { %v610_v51 = vpop.f32.mrf.mxu1 }
  0xcb   : > { %v611_v53 = vadd.f32 %v610_v51, %v591_v52 }
  0xcf   : > { %v596_v2 = vpop.f32.mrf.mxu3 }
  0xd1   : > { %v629_v55 = vpop.f32.mrf.mxu2  ;;  %v593_v59 = vpop.f32.mrf.mxu0 }
  0xd2   : > { %v630_v56 = vadd.f32 %v629_v55, %v611_v53  ;;  %v612_v57 = vpop.f32.mrf.mxu1 }
  0xd3   : > { %v613_v60 = vadd.f32 %v612_v57, %v593_v59 }
  0xd4   : > { %v639_v58 = vadd.f32 %v630_v56, %v346_v54 }
  0xd6   : > { %643 = vst [vmem:[#allocation2 + $0x10] sm:$0xff] %v639_v58 }
  0xd7   : > { %v598_v9 = vpop.f32.mrf.mxu3 }
  0xd9   : > { %v631_v62 = vpop.f32.mrf.mxu2 }
  0xda   : > { %v632_v63 = vadd.f32 %v631_v62, %v613_v60  ;;  %v615_v0 = vpop.f32.mrf.mxu1 }
  0xdb   : > { %v616_v3 = vadd.f32 %v615_v0, %v596_v2 }
  0xdc   : > { %v640_v1 = vadd.f32 %v632_v63, %v347_v61 }
  0xde   : > { %644 = vst [vmem:[#allocation2] sm:$0xff] %v640_v1 }
  0xe1   : > { %v634_v5 = vpop.f32.mrf.mxu2 }
  0xe2   : > { %v635_v6 = vadd.f32 %v634_v5, %v616_v3  ;;  %v617_v8 = vpop.f32.mrf.mxu1 }
  0xe3   : > { %v618_v10 = vadd.f32 %v617_v8, %v598_v9 }
  0xe4   : > { %v641_v7 = vadd.f32 %v635_v6, %v348_v4 }
  0xe6   : > { %645 = vst [vmem:[#allocation2 + $0x18] sm:$0xff] %v641_v7 }
  0xe9   : > { %v636_v12 = vpop.f32.mrf.mxu2 }
  0xea   : > { %v637_v13 = vadd.f32 %v636_v12, %v618_v10  ;;  %650 = sbr.rel (%p947_p11) target bundleno = 255 (0xff), region = 70 }
  0xec   : > { %v642_v14 = vadd.f32 %v637_v13, %v349_v11 }
  0xee   : > { %646 = vst [vmem:[#allocation2 + $0x8] sm:$0xff] %v642_v14 }
  0xef   : > { %v651_v15 = vld [vmem:[#allocation2 + $0x10] sm:$0xff]  ;;  %v652_v16 = vld [vmem:[#allocation2] sm:$0xff]  ;;  %v653_v19 = vld [vmem:[#allocation2 + $0x18] sm:$0xff] }
  0xf0   : > { %v1045_v17 = vld [vmem:[%s1234_s2] ss:$0 sm:$0xff] }
  0xf1   : > { %v1046_v18 = vld [vmem:[%s1235_s3] ss:$0 sm:$0xff]  ;;  %v659_v21 = vmul.f32 %v1045_v17, %v651_v15  ;;  %v660_v22 = vmul.f32 %v1045_v17, %v652_v16  ;;  %v661_v23 = vmul.f32 %v1045_v17, %v653_v19 }
  0xf3   : > { %v667_v25 = vadd.f32 %v1046_v18, %v659_v21  ;;  %v668_v26 = vadd.f32 %v1046_v18, %v660_v22  ;;  %v669_v27 = vadd.f32 %v1046_v18, %v661_v23 }
  0xf5   : > { %v654_v20 = vld [vmem:[#allocation2 + $0x8] sm:$0xff]  ;;  %v671_v29 = vmax.f32 %v667_v25, 0.0  ;;  %v672_v30 = vmax.f32 %v668_v26, 0.0  ;;  %v673_v31 = vmax.f32 %v669_v27, 0.0 }
  0xf6   : > { %v662_v24 = vmul.f32 %v1045_v17, %v654_v20 }
  0xf7   : > { %v986_v33 = vpack.c.bf16 %v672_v30, %v671_v29 }
  0xf8   : > { %v670_v28 = vadd.f32 %v1046_v18, %v662_v24 }
  0xf9   : > { %987 = vst [vmem:[%s1236_s4] sm:$0xff] %v986_v33  }
  0xfa   : > { %v674_v32 = vmax.f32 %v670_v28, 0.0 }
  0xfc   : > { %v991_v34 = vpack.c.bf16 %v674_v32, %v673_v31 }
  0xfe   : > { %993 = vst [vmem:[%s1236_s4 + $0x8] sm:$0xff] %v991_v34  }
  0xff PF: > { %s14_s19 = sadd.s32 1, %s1085_s19   ;;  %s1237_s15 = smov %s1073_s16 }
 0x100   : > { %p11_p12 = scmp.ge.s32.totalorder %s14_s19, 5   ;;  %s1238_s16 = smov %s1148_s23 }
 0x101   : > { %s1239_s17 = smov %s1081_s18  ;;  %s1240_s18 = smov %s1242_s20 }
 0x102   :  { %13 = sbr.rel (!%p11_p12) target bundleno = 3 (0x3), region = 120 }

// kernel: gvb_resnet_forward.29
= control target key start
LH: loop header
LB: loop body
LE: loop exit
PB: predicated region body
PF: predicated region fallthrough
CT: control target
= control target key end

     0   :  { %s309_s1 = inlined_call_operand.vmem [shape: bf16[128,128], index: 1, kind: input, shape index: {}]   ;;  %s310_s2 = inlined_call_operand.vmem [shape: f32[1,128], index: 2, kind: input, shape index: {}]   ;;  %s311_s3 = inlined_call_operand.vmem [shape: f32[1,128], index: 3, kind: input, shape index: {}]   ;;  %s312_s0 = inlined_call_operand.vmem [shape: bf16[32,128], index: 0, kind: input, shape index: {}]   ;;  %s313_s4 = inlined_call_operand.vmem [shape: bf16[32,128], index: 4, kind: output, shape index: {}]  }
   0x1   :  { %v220_v0 = vld [vmem:[%s309_s1 + $0x38] sm:$0xff]  ;;  %v219_v1 = vld [vmem:[%s309_s1 + $0x30] sm:$0xff]  ;;  %v218_v2 = vld [vmem:[%s309_s1 + $0x28] sm:$0xff] }
   0x2   :  { %109 = vmatpush.bf16.msra.mxu0 %v220_v0  ;;  %232 = vmatpush.bf16.msra.mxu1 %v220_v0  ;;  %v217_v3 = vld [vmem:[%s309_s1 + $0x20] sm:$0xff]  ;;  %v216_v4 = vld [vmem:[%s309_s1 + $0x18] sm:$0xff]  ;;  %v215_v5 = vld [vmem:[%s309_s1 + $0x10] sm:$0xff] }
   0x3   :  { %v214_v6 = vld [vmem:[%s309_s1 + $0x8] sm:$0xff]  ;;  %v213_v7 = vld [vmem:[%s309_s1] sm:$0xff] }
   0x4   :  { %v211_v8 = vld [vmem:[%s312_s0] sm:$0xff]  ;;  %v212_v9 = vld [vmem:[%s312_s0 + $0x8] sm:$0xff] }
   0x5   :  { %v240_v12 = vld [vmem:[%s310_s2] ss:$0 sm:$0xff] }
   0x6   :  { %110 = vmatpush.bf16.msra.mxu0 %v219_v1  ;;  %233 = vmatpush.bf16.msra.mxu1 %v219_v1  ;;  %v241_v14 = vld [vmem:[%s311_s3] ss:$0 sm:$0xff] }
   0xa   :  { %111 = vmatpush.bf16.msra.mxu0 %v218_v2  ;;  %234 = vmatpush.bf16.msra.mxu1 %v218_v2 }
   0xe   :  { %112 = vmatpush.bf16.msra.mxu0 %v217_v3  ;;  %235 = vmatpush.bf16.msra.mxu1 %v217_v3 }
  0x12   :  { %113 = vmatpush.bf16.msra.mxu0 %v216_v4  ;;  %236 = vmatpush.bf16.msra.mxu1 %v216_v4 }
  0x16   :  { %114 = vmatpush.bf16.msra.mxu0 %v215_v5  ;;  %237 = vmatpush.bf16.msra.mxu1 %v215_v5 }
  0x1a   :  { %115 = vmatpush.bf16.msra.mxu0 %v214_v6  ;;  %238 = vmatpush.bf16.msra.mxu1 %v214_v6 }
  0x1e   :  { %116 = vmatpush.bf16.msra.mxu0 %v213_v7  ;;  %239 = vmatpush.bf16.msra.mxu1 %v213_v7 }
  0x21   :  { %117 = vmatmul.bf16.vlgmr.msra.gmra.mxu0 %v211_v8  ;;  %122 = vmatmul.bf16.vlgmr.msra.gmra.mxu1 %v212_v9 }
  0x9e   :  { %v118_v10 = vpop.f32.mrf.mxu0  ;;  %v123_v11 = vpop.f32.mrf.mxu1 }
  0x9f   :  { %v147_v13 = vmul.f32 %v240_v12, %v118_v10  ;;  %v149_v15 = vmul.f32 %v240_v12, %v123_v11 }
  0xa1   :  { %v155_v20 = vadd.f32 %v241_v14, %v147_v13  ;;  %v157_v21 = vadd.f32 %v241_v14, %v149_v15 }
  0xa6   :  { %v120_v16 = vpop.f32.mrf.mxu0  ;;  %v125_v17 = vpop.f32.mrf.mxu1 }
  0xa7   :  { %v148_v18 = vmul.f32 %v240_v12, %v120_v16  ;;  %v150_v19 = vmul.f32 %v240_v12, %v125_v17 }
  0xa9   :  { %v156_v22 = vadd.f32 %v241_v14, %v148_v18  ;;  %v158_v23 = vadd.f32 %v241_v14, %v150_v19 }
  0xab   :  { %v224_v24 = vpack.c.bf16 %v156_v22, %v155_v20  ;;  %v229_v25 = vpack.c.bf16 %v158_v23, %v157_v21 }
  0xad   :  { %225 = vst [vmem:[%s313_s4] sm:$0xff] %v224_v24  }
  0xae   :  { %231 = vst [vmem:[%s313_s4 + $0x8] sm:$0xff] %v229_v25  }

// kernel: gvb_resnet_forward.30
= control target key start
LH: loop header
LB: loop body
LE: loop exit
PB: predicated region body
PF: predicated region fallthrough
CT: control target
= control target key end

     0   :  { %s1218_s18 = smov 0   ;;  %s1220_s19 = smov 0   ;;  %s1343_s0 = inlined_call_operand.vmem [shape: bf16[32,1152], index: 0, kind: input, shape index: {}]   ;;  %s1344_s1 = inlined_call_operand.vmem [shape: bf16[1152,128], index: 1, kind: input, shape index: {}]   ;;  %s1345_s2 = inlined_call_operand.vmem [shape: f32[1,128], index: 2, kind: input, shape index: {}]   ;;  %s1346_s3 = inlined_call_operand.vmem [shape: f32[1,128], index: 3, kind: input, shape index: {}]   ;;  %s1347_s4 = inlined_call_operand.vmem [shape: bf16[32,128], index: 4, kind: input, shape index: {}]   ;;  %s1348_s5 = inlined_call_operand.vmem [shape: bf16[32,128], index: 5, kind: output, shape index: {}]  }
   0x1   :  { %s1222_s20 = smov 0   ;;  %s1224_s21 = smov 0  }
   0x2   :  { %s1226_s22 = smov 0  }
   0x3 LB: > { %s27_s23 = sadd.s32 1, %s1181_s21  ;;  %p50_p1 = scmp.ne.s32.totalorder %s1173_s19, %s1169_s18  ;;  %s1185_s22 = sphi %s1226_s22, %s15_s22   ;;  %s1181_s21 = sphi %s1224_s21, %s1352_s21   ;;  %s1177_s20 = sphi %s1222_s20, %s1351_s20   ;;  %s1173_s19 = sphi %s1220_s19, %s1350_s19   ;;  %s1169_s18 = sphi %s1218_s18, %s1349_s18  }
   0x4   : > { %p28_p0 = scmp.ge.s32.totalorder %s27_s23, 3  ;;  %p51_p2 = scmp.eq.s32.totalorder %s1185_s22, 0 }
   0x5   : > { %s43_s25 = sadd.s32 1, %s1173_s19  ;;  %p905_p5 = scmp.ge.s32.totalorder %s1185_s22, 3 }
   0x6   : > { %s1354_s23 = smov (%p28_p0, %s27_s23), 0  ;;  %p52_p3 = por %p51_p2, %p50_p1 }
   0x7   : > { %s39_s24 = ssub.s32 %s1181_s21, %s1354_s23  ;;  %236 = sbr.rel (%p905_p5) target bundleno = 25 (0x19), region = 28 }
   0x8   : > { %p41_p4 = scmp.eq.s32.totalorder %s39_s24, 0 }
   0xa   : > { %s1253_s26 = scalar_select %p41_p4, %s1173_s19, %s43_s25  }
   0xc   : > { %239 = sbr.rel (!%p52_p3) target bundleno = 25 (0x19), region = 32  ;;  %s241_s27 = sand.u32 (%p52_p3), 1, %s1173_s19  }
   0xd   : > { %s1043_s28 = smul.u32 (%p52_p3), 12, %s1181_s21 }
   0xe   : > { %s1102_s29 = smul.u32 (%p52_p3), 48, %s241_s27 }
   0xf   : > { %s249_s7 = scalar_lea.vmem (%p52_p3), %s1343_s0, %s1043_s28 }
  0x10   : > { %v264_v0 = vld [vmem:[%s249_s7] sm:$0xff] (%p52_p3)  ;;  %v268_v2 = vld [vmem:[%s249_s7 + $0x48] sm:$0xff] (%p52_p3)  ;;  %s243_s8 = scalar_lea.vmem (%p52_p3), [#allocation3], %s1102_s29  ;;  %v911_v6 = vld [vmem:[%s249_s7 + $0x50] sm:$0xf] (%p52_p3) }
  0x11   : > { %v266_v1 = vld [vmem:[%s249_s7 + $0x24] sm:$0xff]  ;;  %265 = vst [vmem:[%s243_s8] sm:$0xff] %v264_v0  ;;  %v270_v3 = vld [vmem:[%s249_s7 + $0x6c] sm:$0xff]  ;;  %v913_v7 = vld [vmem:[%s249_s7 + $0x74] sm:$0xf] }
  0x12   : > { %267 = vst [vmem:[%s243_s8 + $0xc] sm:$0xff] %v266_v1  ;;  %v907_v4 = vld [vmem:[%s249_s7 + $0x8] sm:$0xf]  ;;  %v909_v5 = vld [vmem:[%s249_s7 + $0x2c] sm:$0xf] }
  0x13   : > { %269 = vst [vmem:[%s243_s8 + $0x18] sm:$0xff] %v268_v2 }
  0x14   : > { %271 = vst [vmem:[%s243_s8 + $0x24] sm:$0xff] %v270_v3 }
  0x15   : > { %908 = vst [vmem:[%s243_s8 + $0x8] sm:$0xf] %v907_v4 }
  0x16   : > { %910 = vst [vmem:[%s243_s8 + $0x14] sm:$0xf] %v909_v5 }
  0x17   : > { %912 = vst [vmem:[%s243_s8 + $0x20] sm:$0xf] %v911_v6 }
  0x18   : > { %914 = vst [vmem:[%s243_s8 + $0x2c] sm:$0xf] %v913_v7 }
  0x19 PF: > { %p915_p6 = scmp.ge.s32.totalorder %s1185_s22, 1  ;;  %p304_p7 = scmp.lt.s32.totalorder %s1185_s22, 4 }
  0x1b   : > { %p305_p8 = pnand %p915_p6, %p304_p7 }
  0x1c   : > { %s311_s9 = sand.u32 (!%p305_p8), 1, %s1169_s18   ;;  %s365_s10 = smul.u32 (!%p305_p8), 48, %s1177_s20 }
  0x1d   : > { %308 = sbr.rel (%p305_p8) target bundleno = 257 (0x101), region = 62  ;;  %p917_p10 = scmp.ne.s32.totalorder (!%p305_p8), %s1177_s20, 0 }
  0x1e   : > { %s1103_s11 = smul.u32 (!%p305_p8), 48, %s311_s9  ;;  %p366_p9 = scmp.lt.s32.totalorder (!%p305_p8), %s365_s10, 143 }
  0x20   : > { %s1270_s16 = scalar_lea.vmem (!%p305_p8), [#allocation3], %s1103_s11 }
  0x22   : > { %s1356_s10 = smov (!%p366_p9, %s365_s10), 143  ;;  %401 = sbr.rel (%p917_p10) target bundleno = 44 (0x2c), region = 70 }
  0x23   : > { %s916_s12 = sshll.u32 %s1356_s10, 2 }
  0x24   : > { %s1268_s15 = scalar_lea.vmem %s1344_s1, %s916_s12 }
  0x27   : > { %v1187_v8 = vmov 0.0  }
  0x28   : > { %402 = vst [vmem:[#allocation2 + $0x10] sm:$0xff] %v1187_v8 }
  0x29   : > { %403 = vst [vmem:[#allocation2] sm:$0xff] %v1187_v8 }
  0x2a   : > { %404 = vst [vmem:[#allocation2 + $0x18] sm:$0xff] %v1187_v8 }
  0x2b   : > { %405 = vst [vmem:[#allocation2 + $0x8] sm:$0xff] %v1187_v8 }
  0x2c PF: > { %v1057_v9 = vld [vmem:[%s1268_s15 + $0x38] sm:$0xff]  ;;  %v1056_v12 = vld [vmem:[%s1268_s15 + $0x30] sm:$0xff]  ;;  %v1055_v15 = vld [vmem:[%s1268_s15 + $0x28] sm:$0xff]  ;;  %p1038_p11 = scmp.ne.s32.totalorder %s1177_s20, 2 }
  0x2d   : > { %v1065_v10 = vld [vmem:[%s1268_s15 + $0x78] sm:$0xff]  ;;  %642 = vmatpush.bf16.msra.mxu0 %v1057_v9  ;;  %v1064_v13 = vld [vmem:[%s1268_s15 + $0x70] sm:$0xff]  ;;  %1094 = vmatpush.bf16.msra.mxu3 %v1057_v9  ;;  %v1063_v16 = vld [vmem:[%s1268_s15 + $0x68] sm:$0xff] }
  0x2e   : > { %v1073_v11 = vld [vmem:[%s1268_s15 + $0xb8] sm:$0xff]  ;;  %661 = vmatpush.bf16.msra.mxu1 %v1065_v10  ;;  %v1072_v14 = vld [vmem:[%s1268_s15 + $0xb0] sm:$0xff]  ;;  %v1071_v17 = vld [vmem:[%s1268_s15 + $0xa8] sm:$0xff] }
  0x2f   : > { %680 = vmatpush.bf16.msra.mxu2 %v1073_v11  ;;  %v1054_v18 = vld [vmem:[%s1268_s15 + $0x20] sm:$0xff]  ;;  %v1053_v21 = vld [vmem:[%s1268_s15 + $0x18] sm:$0xff]  ;;  %v1052_v24 = vld [vmem:[%s1268_s15 + $0x10] sm:$0xff] }
  0x30   : > { %v1062_v19 = vld [vmem:[%s1268_s15 + $0x60] sm:$0xff]  ;;  %v1061_v22 = vld [vmem:[%s1268_s15 + $0x58] sm:$0xff]  ;;  %v1060_v25 = vld [vmem:[%s1268_s15 + $0x50] sm:$0xff] }
  0x31   : > { %643 = vmatpush.bf16.msra.mxu0 %v1056_v12  ;;  %1095 = vmatpush.bf16.msra.mxu3 %v1056_v12  ;;  %v1070_v20 = vld [vmem:[%s1268_s15 + $0xa0] sm:$0xff]  ;;  %v1069_v23 = vld [vmem:[%s1268_s15 + $0x98] sm:$0xff]  ;;  %v1068_v26 = vld [vmem:[%s1268_s15 + $0x90] sm:$0xff] }
  0x32   : > { %662 = vmatpush.bf16.msra.mxu1 %v1064_v13  ;;  %v1051_v27 = vld [vmem:[%s1268_s15 + $0x8] sm:$0xff]  ;;  %v1050_v30 = vld [vmem:[%s1268_s15] sm:$0xff]  ;;  %v406_v54 = vld [vmem:[#allocation2 + $0x10] sm:$0xff] }
  0x33   : > { %681 = vmatpush.bf16.msra.mxu2 %v1072_v14  ;;  %v1059_v28 = vld [vmem:[%s1268_s15 + $0x48] sm:$0xff]  ;;  %v1058_v31 = vld [vmem:[%s1268_s15 + $0x40] sm:$0xff]  ;;  %v408_v4 = vld [vmem:[#allocation2 + $0x18] sm:$0xff] }
  0x34   : > { %v1067_v29 = vld [vmem:[%s1268_s15 + $0x88] sm:$0xff]  ;;  %v1066_v32 = vld [vmem:[%s1268_s15 + $0x80] sm:$0xff] }
  0x35   : > { %644 = vmatpush.bf16.msra.mxu0 %v1055_v15  ;;  %1096 = vmatpush.bf16.msra.mxu3 %v1055_v15  ;;  %v920_v33 = vld [vmem:[%s1270_s16] sm:$0xf]  ;;  %v1045_v34 = vld [vmem:[%s1270_s16 + $0x8] sm:$0xf0]  ;;  %v1044_v35 = vld [vmem:[%s1270_s16 + $0x4] sm:$0xf] }
  0x36   : > { %663 = vmatpush.bf16.msra.mxu1 %v1063_v16  ;;  %v922_v36 = vld [vmem:[%s1270_s16 + $0xc] sm:$0xf0]  ;;  %v928_v37 = vld [vmem:[%s1270_s16 + $0x8] sm:$0xf]  ;;  %v1046_v38 = vld [vmem:[%s1270_s16 + $0x10] sm:$0xf0]  ;;  %v921_v41 = vor.u32 %v1045_v34, %v920_v33 }
  0x37   : > { %682 = vmatpush.bf16.msra.mxu2 %v1071_v17  ;;  %v932_v39 = vld [vmem:[%s1270_s16 + $0x18] sm:$0xf]  ;;  %v1048_v40 = vld [vmem:[%s1270_s16 + $0x20] sm:$0xf0]  ;;  %v925_v42 = vor.u32 %v1044_v35, %v922_v36  ;;  %v929_v43 = vor.u32 %v1046_v38, %v928_v37  ;;  %v1047_v45 = vld [vmem:[%s1270_s16 + $0x1c] sm:$0xf] }
  0x38   : > { %v933_v44 = vor.u32 %v1048_v40, %v932_v39  ;;  %v934_v46 = vld [vmem:[%s1270_s16 + $0x24] sm:$0xf0]  ;;  %v940_v47 = vld [vmem:[%s1270_s16 + $0x20] sm:$0xf]  ;;  %v1049_v48 = vld [vmem:[%s1270_s16 + $0x28] sm:$0xf0] }
  0x39   : > { %645 = vmatpush.bf16.msra.mxu0 %v1054_v18  ;;  %1097 = vmatpush.bf16.msra.mxu3 %v1054_v18  ;;  %v937_v49 = vor.u32 %v1047_v45, %v934_v46  ;;  %v941_v50 = vor.u32 %v1049_v48, %v940_v47  ;;  %v407_v61 = vld [vmem:[#allocation2] sm:$0xff]  ;;  %v409_v11 = vld [vmem:[#allocation2 + $0x8] sm:$0xff] }
  0x3a   : > { %664 = vmatpush.bf16.msra.mxu1 %v1062_v19 }
  0x3b   : > { %683 = vmatpush.bf16.msra.mxu2 %v1070_v20 }
  0x3d   : > { %646 = vmatpush.bf16.msra.mxu0 %v1053_v21  ;;  %1098 = vmatpush.bf16.msra.mxu3 %v1053_v21 }
  0x3e   : > { %665 = vmatpush.bf16.msra.mxu1 %v1061_v22 }
  0x3f   : > { %684 = vmatpush.bf16.msra.mxu2 %v1069_v23 }
  0x41   : > { %647 = vmatpush.bf16.msra.mxu0 %v1052_v24  ;;  %1099 = vmatpush.bf16.msra.mxu3 %v1052_v24 }
  0x42   : > { %666 = vmatpush.bf16.msra.mxu1 %v1060_v25 }
  0x43   : > { %685 = vmatpush.bf16.msra.mxu2 %v1068_v26 }
  0x45   : > { %648 = vmatpush.bf16.msra.mxu0 %v1051_v27  ;;  %1100 = vmatpush.bf16.msra.mxu3 %v1051_v27 }
  0x46   : > { %667 = vmatpush.bf16.msra.mxu1 %v1059_v28 }
  0x47   : > { %686 = vmatpush.bf16.msra.mxu2 %v1067_v29 }
  0x49   : > { %649 = vmatpush.bf16.msra.mxu0 %v1050_v30  ;;  %1101 = vmatpush.bf16.msra.mxu3 %v1050_v30 }
  0x4a   : > { %668 = vmatpush.bf16.msra.mxu1 %v1058_v31 }
  0x4b   : > { %687 = vmatpush.bf16.msra.mxu2 %v1066_v32 }
  0x4c   : > { %650 = vmatmul.bf16.vlgmr.msra.gmra.mxu0 %v921_v41  ;;  %655 = vmatmul.bf16.vlgmr.msra.gmra.mxu3 %v933_v44 }
  0x4d   : > { %669 = vmatmul.bf16.vlgmr.msra.gmra.mxu1 %v925_v42 }
  0x4e   : > { %688 = vmatmul.bf16.vlgmr.msra.gmra.mxu2 %v929_v43 }
  0x5d   : > { %674 = vmatmul.bf16.gmra.mxu1 %v937_v49 }
  0x5e   : > { %693 = vmatmul.bf16.gmra.mxu2 %v941_v50 }
  0xc9   : > { %v651_v52 = vpop.f32.mrf.mxu0 }
  0xca   : > { %v670_v51 = vpop.f32.mrf.mxu1 }
  0xcb   : > { %v671_v53 = vadd.f32 %v670_v51, %v651_v52 }
  0xcf   : > { %v656_v2 = vpop.f32.mrf.mxu3 }
  0xd1   : > { %v689_v55 = vpop.f32.mrf.mxu2  ;;  %v653_v59 = vpop.f32.mrf.mxu0 }
  0xd2   : > { %v690_v56 = vadd.f32 %v689_v55, %v671_v53  ;;  %v672_v57 = vpop.f32.mrf.mxu1 }
  0xd3   : > { %v673_v60 = vadd.f32 %v672_v57, %v653_v59 }
  0xd4   : > { %v699_v58 = vadd.f32 %v690_v56, %v406_v54 }
  0xd6   : > { %703 = vst [vmem:[#allocation2 + $0x10] sm:$0xff] %v699_v58 }
  0xd7   : > { %v658_v9 = vpop.f32.mrf.mxu3 }
  0xd9   : > { %v691_v62 = vpop.f32.mrf.mxu2 }
  0xda   : > { %v692_v63 = vadd.f32 %v691_v62, %v673_v60  ;;  %v675_v0 = vpop.f32.mrf.mxu1 }
  0xdb   : > { %v676_v3 = vadd.f32 %v675_v0, %v656_v2 }
  0xdc   : > { %v700_v1 = vadd.f32 %v692_v63, %v407_v61 }
  0xde   : > { %704 = vst [vmem:[#allocation2] sm:$0xff] %v700_v1 }
  0xe1   : > { %v694_v5 = vpop.f32.mrf.mxu2 }
  0xe2   : > { %v695_v6 = vadd.f32 %v694_v5, %v676_v3  ;;  %v677_v8 = vpop.f32.mrf.mxu1 }
  0xe3   : > { %v678_v10 = vadd.f32 %v677_v8, %v658_v9 }
  0xe4   : > { %v701_v7 = vadd.f32 %v695_v6, %v408_v4 }
  0xe6   : > { %705 = vst [vmem:[#allocation2 + $0x18] sm:$0xff] %v701_v7 }
  0xe9   : > { %v696_v12 = vpop.f32.mrf.mxu2 }
  0xea   : > { %v697_v13 = vadd.f32 %v696_v12, %v678_v10  ;;  %710 = sbr.rel (%p1038_p11) target bundleno = 257 (0x101), region = 74 }
  0xec   : > { %v702_v14 = vadd.f32 %v697_v13, %v409_v11 }
  0xee   : > { %706 = vst [vmem:[#allocation2 + $0x8] sm:$0xff] %v702_v14 }
  0xef   : > { %v711_v15 = vld [vmem:[#allocation2 + $0x10] sm:$0xff]  ;;  %v712_v16 = vld [vmem:[#allocation2] sm:$0xff]  ;;  %v713_v20 = vld [vmem:[#allocation2 + $0x18] sm:$0xff] }
  0xf0   : > { %v1145_v17 = vld [vmem:[%s1345_s2] ss:$0 sm:$0xff]  ;;  %v1092_v26 = vld [vmem:[%s1347_s4 + $0x8] sm:$0xff]  }
  0xf1   : > { %v1146_v18 = vld [vmem:[%s1346_s3] ss:$0 sm:$0xff]  ;;  %v719_v22 = vmul.f32 %v1145_v17, %v711_v15  ;;  %v720_v23 = vmul.f32 %v1145_v17, %v712_v16  ;;  %v721_v27 = vmul.f32 %v1145_v17, %v713_v20  ;;  %v1080_v29 = vunpack.c.l.bf16 %v1092_v26 }
  0xf2   : > { %v1075_v19 = vld [vmem:[%s1347_s4] sm:$0xff]   ;;  %v1081_v30 = vunpack.c.h.bf16 %v1092_v26 }
  0xf3   : > { %v1076_v24 = vunpack.c.l.bf16 %v1075_v19  ;;  %v1077_v25 = vunpack.c.h.bf16 %v1075_v19  ;;  %v727_v31 = vadd.f32 %v1146_v18, %v719_v22  ;;  %v728_v32 = vadd.f32 %v1146_v18, %v720_v23 }
  0xf4   : > { %v729_v33 = vadd.f32 %v1146_v18, %v721_v27 }
  0xf5   : > { %v714_v21 = vld [vmem:[#allocation2 + $0x8] sm:$0xff]  ;;  %v739_v35 = vadd.f32 %v1076_v24, %v727_v31  ;;  %v740_v36 = vadd.f32 %v1077_v25, %v728_v32 }
  0xf6   : > { %v722_v28 = vmul.f32 %v1145_v17, %v714_v21  ;;  %v741_v37 = vadd.f32 %v1080_v29, %v729_v33 }
  0xf7   : > { %v743_v39 = vmax.f32 %v739_v35, 0.0  ;;  %v744_v40 = vmax.f32 %v740_v36, 0.0 }
  0xf8   : > { %v730_v34 = vadd.f32 %v1146_v18, %v722_v28  ;;  %v745_v41 = vmax.f32 %v741_v37, 0.0 }
  0xf9   : > { %v1085_v43 = vpack.c.bf16 %v744_v40, %v743_v39 }
  0xfa   : > { %v742_v38 = vadd.f32 %v1081_v30, %v730_v34 }
  0xfb   : > { %1086 = vst [vmem:[%s1348_s5] sm:$0xff] %v1085_v43  }
  0xfc   : > { %v746_v42 = vmax.f32 %v742_v38, 0.0 }
  0xfe   : > { %v1090_v44 = vpack.c.bf16 %v746_v42, %v745_v41 }
 0x100   : > { %1093 = vst [vmem:[%s1348_s5 + $0x8] sm:$0xff] %v1090_v44  }
 0x101 PF: > { %s15_s22 = sadd.s32 1, %s1185_s22   ;;  %s1349_s18 = smov %s1173_s19 }
 0x102   : > { %p12_p12 = scmp.ge.s32.totalorder %s15_s22, 5   ;;  %s1350_s19 = smov %s1253_s26 }
 0x103   : > { %s1351_s20 = smov %s1181_s21  ;;  %s1352_s21 = smov %s1354_s23 }
 0x104   :  { %14 = sbr.rel (!%p12_p12) target bundleno = 3 (0x3), region = 127 }

// kernel: gvb_resnet_forward.33
= control target key start
LH: loop header
LB: loop body
LE: loop exit
PB: predicated region body
PF: predicated region fallthrough
CT: control target
= control target key end

     0   :  { %s1017_s15 = smov 0   ;;  %s1019_s16 = smov 0   ;;  %s1127_s0 = inlined_call_operand.vmem [shape: bf16[16,1152], index: 0, kind: input, shape index: {}]   ;;  %s1128_s1 = inlined_call_operand.vmem [shape: bf16[1152,128], index: 1, kind: input, shape index: {}]   ;;  %s1129_s2 = inlined_call_operand.vmem [shape: f32[1,128], index: 2, kind: input, shape index: {}]   ;;  %s1130_s3 = inlined_call_operand.vmem [shape: f32[1,128], index: 3, kind: input, shape index: {}]   ;;  %s1131_s4 = inlined_call_operand.vmem [shape: bf16[16,128], index: 4, kind: output, shape index: {}]  }
   0x1   :  { %s1021_s17 = smov 0   ;;  %s1023_s18 = smov 0  }
   0x2   :  { %s1025_s19 = smov 0  }
   0x3 LB: > { %s26_s20 = sadd.s32 1, %s985_s18  ;;  %p49_p1 = scmp.ne.s32.totalorder %s977_s16, %s973_s15  ;;  %s989_s19 = sphi %s1025_s19, %s14_s19   ;;  %s985_s18 = sphi %s1023_s18, %s1135_s18   ;;  %s981_s17 = sphi %s1021_s17, %s1134_s17   ;;  %s977_s16 = sphi %s1019_s16, %s1133_s16   ;;  %s973_s15 = sphi %s1017_s15, %s1132_s15  }
   0x4   : > { %p27_p0 = scmp.ge.s32.totalorder %s26_s20, 3  ;;  %p50_p2 = scmp.eq.s32.totalorder %s989_s19, 0 }
   0x5   : > { %s42_s22 = sadd.s32 1, %s977_s16  ;;  %p751_p5 = scmp.ge.s32.totalorder %s989_s19, 3 }
   0x6   : > { %s1137_s20 = smov (%p27_p0, %s26_s20), 0  ;;  %p51_p3 = por %p50_p2, %p49_p1 }
   0x7   : > { %s38_s21 = ssub.s32 %s985_s18, %s1137_s20  ;;  %195 = sbr.rel (%p751_p5) target bundleno = 21 (0x15), region = 24 }
   0x8   : > { %p40_p4 = scmp.eq.s32.totalorder %s38_s21, 0 }
   0xa   : > { %s1052_s23 = scalar_select %p40_p4, %s977_s16, %s42_s22  }
   0xc   : > { %198 = sbr.rel (!%p51_p3) target bundleno = 21 (0x15), region = 28  ;;  %s200_s24 = sand.u32 (%p51_p3), 1, %s977_s16  }
   0xd   : > { %s873_s25 = smul.u32 (%p51_p3), 12, %s985_s18 }
   0xe   : > { %s906_s26 = smul.u32 (%p51_p3), 24, %s200_s24 }
   0xf   : > { %s208_s29 = scalar_lea.vmem (%p51_p3), %s1127_s0, %s873_s25 }
  0x10   : > { %v223_v0 = vld [vmem:[%s208_s29] sm:$0xff] (%p51_p3)  ;;  %v753_v2 = vld [vmem:[%s208_s29 + $0x8] sm:$0xf] (%p51_p3)  ;;  %s202_s30 = scalar_lea.vmem (%p51_p3), [#allocation3], %s906_s26  ;;  %v755_v3 = vld [vmem:[%s208_s29 + $0x2c] sm:$0xf] (%p51_p3) }
  0x11   : > { %v225_v1 = vld [vmem:[%s208_s29 + $0x24] sm:$0xff]  ;;  %224 = vst [vmem:[%s202_s30] sm:$0xff] %v223_v0 }
  0x12   : > { %226 = vst [vmem:[%s202_s30 + $0xc] sm:$0xff] %v225_v1 }
  0x13   : > { %754 = vst [vmem:[%s202_s30 + $0x8] sm:$0xf] %v753_v2 }
  0x14   : > { %756 = vst [vmem:[%s202_s30 + $0x14] sm:$0xf] %v755_v3 }
  0x15 PF: > { %p757_p6 = scmp.ge.s32.totalorder %s989_s19, 1  ;;  %p255_p7 = scmp.lt.s32.totalorder %s989_s19, 4 }
  0x17   : > { %p256_p8 = pnand %p757_p6, %p255_p7 }
  0x18   : > { %s262_s5 = sand.u32 (!%p256_p8), 1, %s973_s15   ;;  %s306_s6 = smul.u32 (!%p256_p8), 48, %s981_s17 }
  0x19   : > { %259 = sbr.rel (%p256_p8) target bundleno = 233 (0xe9), region = 58  ;;  %p759_p10 = scmp.ne.s32.totalorder (!%p256_p8), %s981_s17, 0 }
  0x1a   : > { %s907_s7 = smul.u32 (!%p256_p8), 24, %s262_s5  ;;  %p307_p9 = scmp.lt.s32.totalorder (!%p256_p8), %s306_s6, 143 }
  0x1c   : > { %s1069_s12 = scalar_lea.vmem (!%p256_p8), [#allocation3], %s907_s7 }
  0x1e   : > { %s1139_s6 = smov (!%p307_p9, %s306_s6), 143  ;;  %333 = sbr.rel (%p759_p10) target bundleno = 38 (0x26), region = 66 }
  0x1f   : > { %s758_s8 = sshll.u32 %s1139_s6, 2 }
  0x20   : > { %s1067_s11 = scalar_lea.vmem %s1128_s1, %s758_s8 }
  0x23   : > { %v991_v4 = vmov 0.0  }
  0x24   : > { %334 = vst [vmem:[#allocation2] sm:$0xff] %v991_v4 }
  0x25   : > { %335 = vst [vmem:[#allocation2 + $0x8] sm:$0xff] %v991_v4 }
  0x26 PF: > { %v884_v5 = vld [vmem:[%s1067_s11 + $0x38] sm:$0xff]  ;;  %v883_v8 = vld [vmem:[%s1067_s11 + $0x30] sm:$0xff]  ;;  %v882_v11 = vld [vmem:[%s1067_s11 + $0x28] sm:$0xff]  ;;  %p868_p11 = scmp.ne.s32.totalorder %s981_s17, 2 }
  0x27   : > { %v892_v6 = vld [vmem:[%s1067_s11 + $0x78] sm:$0xff]  ;;  %550 = vmatpush.bf16.msra.mxu0 %v884_v5  ;;  %v891_v9 = vld [vmem:[%s1067_s11 + $0x70] sm:$0xff]  ;;  %v890_v12 = vld [vmem:[%s1067_s11 + $0x68] sm:$0xff] }
  0x28   : > { %v900_v7 = vld [vmem:[%s1067_s11 + $0xb8] sm:$0xff]  ;;  %564 = vmatpush.bf16.msra.mxu1 %v892_v6  ;;  %v899_v10 = vld [vmem:[%s1067_s11 + $0xb0] sm:$0xff]  ;;  %v898_v13 = vld [vmem:[%s1067_s11 + $0xa8] sm:$0xff] }
  0x29   : > { %578 = vmatpush.bf16.msra.mxu2 %v900_v7  ;;  %v881_v14 = vld [vmem:[%s1067_s11 + $0x20] sm:$0xff]  ;;  %v880_v17 = vld [vmem:[%s1067_s11 + $0x18] sm:$0xff]  ;;  %v879_v20 = vld [vmem:[%s1067_s11 + $0x10] sm:$0xff] }
  0x2a   : > { %v889_v15 = vld [vmem:[%s1067_s11 + $0x60] sm:$0xff]  ;;  %v888_v18 = vld [vmem:[%s1067_s11 + $0x58] sm:$0xff]  ;;  %v887_v21 = vld [vmem:[%s1067_s11 + $0x50] sm:$0xff] }
  0x2b   : > { %551 = vmatpush.bf16.msra.mxu0 %v883_v8  ;;  %v897_v16 = vld [vmem:[%s1067_s11 + $0xa0] sm:$0xff]  ;;  %v896_v19 = vld [vmem:[%s1067_s11 + $0x98] sm:$0xff]  ;;  %v895_v22 = vld [vmem:[%s1067_s11 + $0x90] sm:$0xff] }
  0x2c   : > { %565 = vmatpush.bf16.msra.mxu1 %v891_v9  ;;  %v878_v23 = vld [vmem:[%s1067_s11 + $0x8] sm:$0xff]  ;;  %v877_v26 = vld [vmem:[%s1067_s11] sm:$0xff]  ;;  %v875_v29 = vld [vmem:[%s1069_s12 + $0x8] sm:$0xf0] }
  0x2d   : > { %579 = vmatpush.bf16.msra.mxu2 %v899_v10  ;;  %v886_v24 = vld [vmem:[%s1067_s11 + $0x48] sm:$0xff]  ;;  %v885_v27 = vld [vmem:[%s1067_s11 + $0x40] sm:$0xff]  ;;  %v770_v33 = vld [vmem:[%s1069_s12 + $0x8] sm:$0xf] }
  0x2e   : > { %v894_v25 = vld [vmem:[%s1067_s11 + $0x88] sm:$0xff]  ;;  %v764_v31 = vld [vmem:[%s1069_s12 + $0xc] sm:$0xf0]  ;;  %v876_v34 = vld [vmem:[%s1069_s12 + $0x10] sm:$0xf0] }
  0x2f   : > { %552 = vmatpush.bf16.msra.mxu0 %v882_v11  ;;  %v762_v28 = vld [vmem:[%s1069_s12] sm:$0xf]  ;;  %v874_v30 = vld [vmem:[%s1069_s12 + $0x4] sm:$0xf]  ;;  %v893_v32 = vld [vmem:[%s1067_s11 + $0x80] sm:$0xff]  ;;  %v771_v37 = vor.u32 %v876_v34, %v770_v33 }
  0x30   : > { %566 = vmatpush.bf16.msra.mxu1 %v890_v12  ;;  %v763_v35 = vor.u32 %v875_v29, %v762_v28  ;;  %v767_v36 = vor.u32 %v874_v30, %v764_v31  ;;  %v336_v41 = vld [vmem:[#allocation2] sm:$0xff]  ;;  %v337_v48 = vld [vmem:[#allocation2 + $0x8] sm:$0xff] }
  0x31   : > { %580 = vmatpush.bf16.msra.mxu2 %v898_v13 }
  0x33   : > { %553 = vmatpush.bf16.msra.mxu0 %v881_v14 }
  0x34   : > { %567 = vmatpush.bf16.msra.mxu1 %v889_v15 }
  0x35   : > { %581 = vmatpush.bf16.msra.mxu2 %v897_v16 }
  0x37   : > { %554 = vmatpush.bf16.msra.mxu0 %v880_v17 }
  0x38   : > { %568 = vmatpush.bf16.msra.mxu1 %v888_v18 }
  0x39   : > { %582 = vmatpush.bf16.msra.mxu2 %v896_v19 }
  0x3b   : > { %555 = vmatpush.bf16.msra.mxu0 %v879_v20 }
  0x3c   : > { %569 = vmatpush.bf16.msra.mxu1 %v887_v21 }
  0x3d   : > { %583 = vmatpush.bf16.msra.mxu2 %v895_v22 }
  0x3f   : > { %556 = vmatpush.bf16.msra.mxu0 %v878_v23 }
  0x40   : > { %570 = vmatpush.bf16.msra.mxu1 %v886_v24 }
  0x41   : > { %584 = vmatpush.bf16.msra.mxu2 %v894_v25 }
  0x43   : > { %557 = vmatpush.bf16.msra.mxu0 %v877_v26 }
  0x44   : > { %571 = vmatpush.bf16.msra.mxu1 %v885_v27 }
  0x45   : > { %585 = vmatpush.bf16.msra.mxu2 %v893_v32 }
  0x46   : > { %558 = vmatmul.bf16.vlgmr.msra.gmra.mxu0 %v763_v35 }
  0x47   : > { %572 = vmatmul.bf16.vlgmr.msra.gmra.mxu1 %v767_v36 }
  0x48   : > { %586 = vmatmul.bf16.vlgmr.msra.gmra.mxu2 %v771_v37 }
  0xc3   : > { %v559_v38 = vpop.f32.mrf.mxu0 }
  0xc4   : > { %v573_v39 = vpop.f32.mrf.mxu1 }
  0xc5   : > { %v574_v40 = vadd.f32 %v573_v39, %v559_v38 }
  0xcb   : > { %v587_v42 = vpop.f32.mrf.mxu2  ;;  %v561_v45 = vpop.f32.mrf.mxu0 }
  0xcc   : > { %v588_v43 = vadd.f32 %v587_v42, %v574_v40  ;;  %v575_v46 = vpop.f32.mrf.mxu1 }
  0xcd   : > { %v576_v47 = vadd.f32 %v575_v46, %v561_v45 }
  0xce   : > { %v592_v44 = vadd.f32 %v588_v43, %v336_v41 }
  0xd0   : > { %594 = vst [vmem:[#allocation2] sm:$0xff] %v592_v44 }
  0xd3   : > { %v589_v49 = vpop.f32.mrf.mxu2 }
  0xd4   : > { %v590_v50 = vadd.f32 %v589_v49, %v576_v47  ;;  %599 = sbr.rel (%p868_p11) target bundleno = 233 (0xe9), region = 70 }
  0xd6   : > { %v593_v51 = vadd.f32 %v590_v50, %v337_v48 }
  0xd8   : > { %595 = vst [vmem:[#allocation2 + $0x8] sm:$0xff] %v593_v51 }
  0xd9   : > { %v600_v52 = vld [vmem:[#allocation2] sm:$0xff] }
  0xda   : > { %v949_v54 = vld [vmem:[%s1129_s2] ss:$0 sm:$0xff] }
  0xdb   : > { %v950_v55 = vld [vmem:[%s1130_s3] ss:$0 sm:$0xff]  ;;  %v606_v56 = vmul.f32 %v949_v54, %v600_v52 }
  0xdd   : > { %v612_v58 = vadd.f32 %v950_v55, %v606_v56 }
  0xdf   : > { %v601_v53 = vld [vmem:[#allocation2 + $0x8] sm:$0xff]  ;;  %v614_v60 = vmax.f32 %v612_v58, 0.0 }
  0xe0   : > { %v607_v57 = vmul.f32 %v949_v54, %v601_v53 }
  0xe2   : > { %v613_v59 = vadd.f32 %v950_v55, %v607_v57 }
  0xe4   : > { %v615_v61 = vmax.f32 %v613_v59, 0.0 }
  0xe6   : > { %v904_v62 = vpack.c.bf16 %v615_v61, %v614_v60 }
  0xe8   : > { %905 = vst [vmem:[%s1131_s4] sm:$0xff] %v904_v62  }
  0xe9 PF: > { %s14_s19 = sadd.s32 1, %s989_s19   ;;  %s1132_s15 = smov %s977_s16 }
  0xea   : > { %p11_p12 = scmp.ge.s32.totalorder %s14_s19, 5   ;;  %s1133_s16 = smov %s1052_s23 }
  0xeb   : > { %s1134_s17 = smov %s985_s18  ;;  %s1135_s18 = smov %s1137_s20 }
  0xec   :  { %13 = sbr.rel (!%p11_p12) target bundleno = 3 (0x3), region = 120 }

// kernel: gvb_resnet_forward.34
= control target key start
LH: loop header
LB: loop body
LE: loop exit
PB: predicated region body
PF: predicated region fallthrough
CT: control target
= control target key end

     0   :  { %s253_s1 = inlined_call_operand.vmem [shape: bf16[128,128], index: 1, kind: input, shape index: {}]   ;;  %s254_s2 = inlined_call_operand.vmem [shape: f32[1,128], index: 2, kind: input, shape index: {}]   ;;  %s255_s3 = inlined_call_operand.vmem [shape: f32[1,128], index: 3, kind: input, shape index: {}]   ;;  %s256_s0 = inlined_call_operand.vmem [shape: bf16[16,128], index: 0, kind: input, shape index: {}]   ;;  %s257_s4 = inlined_call_operand.vmem [shape: bf16[16,128], index: 4, kind: output, shape index: {}]  }
   0x1   :  { %v184_v0 = vld [vmem:[%s253_s1 + $0x38] sm:$0xff]  ;;  %v183_v1 = vld [vmem:[%s253_s1 + $0x30] sm:$0xff]  ;;  %v182_v2 = vld [vmem:[%s253_s1 + $0x28] sm:$0xff] }
   0x2   :  { %97 = vmatpush.bf16.msra.mxu0 %v184_v0  ;;  %v181_v3 = vld [vmem:[%s253_s1 + $0x20] sm:$0xff]  ;;  %v180_v4 = vld [vmem:[%s253_s1 + $0x18] sm:$0xff]  ;;  %v179_v5 = vld [vmem:[%s253_s1 + $0x10] sm:$0xff] }
   0x3   :  { %v178_v6 = vld [vmem:[%s253_s1 + $0x8] sm:$0xff]  ;;  %v177_v7 = vld [vmem:[%s253_s1] sm:$0xff] }
   0x4   :  { %v176_v8 = vld [vmem:[%s256_s0] sm:$0xff] }
   0x5   :  { %v190_v10 = vld [vmem:[%s254_s2] ss:$0 sm:$0xff] }
   0x6   :  { %98 = vmatpush.bf16.msra.mxu0 %v183_v1  ;;  %v191_v12 = vld [vmem:[%s255_s3] ss:$0 sm:$0xff] }
   0xa   :  { %99 = vmatpush.bf16.msra.mxu0 %v182_v2 }
   0xe   :  { %100 = vmatpush.bf16.msra.mxu0 %v181_v3 }
  0x12   :  { %101 = vmatpush.bf16.msra.mxu0 %v180_v4 }
  0x16   :  { %102 = vmatpush.bf16.msra.mxu0 %v179_v5 }
  0x1a   :  { %103 = vmatpush.bf16.msra.mxu0 %v178_v6 }
  0x1e   :  { %104 = vmatpush.bf16.msra.mxu0 %v177_v7 }
  0x21   :  { %105 = vmatmul.bf16.vlgmr.msra.gmra.mxu0 %v176_v8 }
  0x9e   :  { %v106_v9 = vpop.f32.mrf.mxu0 }
  0x9f   :  { %v124_v11 = vmul.f32 %v190_v10, %v106_v9 }
  0xa1   :  { %v130_v15 = vadd.f32 %v191_v12, %v124_v11 }
  0xa6   :  { %v108_v13 = vpop.f32.mrf.mxu0 }
  0xa7   :  { %v125_v14 = vmul.f32 %v190_v10, %v108_v13 }
  0xa9   :  { %v131_v16 = vadd.f32 %v191_v12, %v125_v14 }
  0xab   :  { %v188_v17 = vpack.c.bf16 %v131_v16, %v130_v15 }
  0xad   :  { %189 = vst [vmem:[%s257_s4] sm:$0xff] %v188_v17  }

// kernel: gvb_resnet_forward.35
= control target key start
LH: loop header
LB: loop body
LE: loop exit
PB: predicated region body
PF: predicated region fallthrough
CT: control target
= control target key end

     0   :  { %s1111_s18 = smov 0   ;;  %s1113_s19 = smov 0   ;;  %s1224_s0 = inlined_call_operand.vmem [shape: bf16[16,1152], index: 0, kind: input, shape index: {}]   ;;  %s1225_s1 = inlined_call_operand.vmem [shape: bf16[1152,128], index: 1, kind: input, shape index: {}]   ;;  %s1226_s2 = inlined_call_operand.vmem [shape: f32[1,128], index: 2, kind: input, shape index: {}]   ;;  %s1227_s3 = inlined_call_operand.vmem [shape: f32[1,128], index: 3, kind: input, shape index: {}]   ;;  %s1228_s4 = inlined_call_operand.vmem [shape: bf16[16,128], index: 4, kind: input, shape index: {}]   ;;  %s1229_s5 = inlined_call_operand.vmem [shape: bf16[16,128], index: 5, kind: output, shape index: {}]  }
   0x1   :  { %s1115_s20 = smov 0   ;;  %s1117_s21 = smov 0  }
   0x2   :  { %s1119_s22 = smov 0  }
   0x3 LB: > { %s27_s23 = sadd.s32 1, %s1074_s21  ;;  %p50_p1 = scmp.ne.s32.totalorder %s1066_s19, %s1062_s18  ;;  %s1078_s22 = sphi %s1119_s22, %s15_s22   ;;  %s1074_s21 = sphi %s1117_s21, %s1233_s21   ;;  %s1070_s20 = sphi %s1115_s20, %s1232_s20   ;;  %s1066_s19 = sphi %s1113_s19, %s1231_s19   ;;  %s1062_s18 = sphi %s1111_s18, %s1230_s18  }
   0x4   : > { %p28_p0 = scmp.ge.s32.totalorder %s27_s23, 3  ;;  %p51_p2 = scmp.eq.s32.totalorder %s1078_s22, 0 }
   0x5   : > { %s43_s25 = sadd.s32 1, %s1066_s19  ;;  %p836_p5 = scmp.ge.s32.totalorder %s1078_s22, 3 }
   0x6   : > { %s1235_s23 = smov (%p28_p0, %s27_s23), 0  ;;  %p52_p3 = por %p51_p2, %p50_p1 }
   0x7   : > { %s39_s24 = ssub.s32 %s1074_s21, %s1235_s23  ;;  %236 = sbr.rel (%p836_p5) target bundleno = 21 (0x15), region = 28 }
   0x8   : > { %p41_p4 = scmp.eq.s32.totalorder %s39_s24, 0 }
   0xa   : > { %s1146_s26 = scalar_select %p41_p4, %s1066_s19, %s43_s25  }
   0xc   : > { %239 = sbr.rel (!%p52_p3) target bundleno = 21 (0x15), region = 32  ;;  %s241_s27 = sand.u32 (%p52_p3), 1, %s1066_s19  }
   0xd   : > { %s958_s28 = smul.u32 (%p52_p3), 12, %s1074_s21 }
   0xe   : > { %s995_s29 = smul.u32 (%p52_p3), 24, %s241_s27 }
   0xf   : > { %s249_s7 = scalar_lea.vmem (%p52_p3), %s1224_s0, %s958_s28 }
  0x10   : > { %v264_v0 = vld [vmem:[%s249_s7] sm:$0xff] (%p52_p3)  ;;  %v838_v2 = vld [vmem:[%s249_s7 + $0x8] sm:$0xf] (%p52_p3)  ;;  %s243_s8 = scalar_lea.vmem (%p52_p3), [#allocation3], %s995_s29  ;;  %v840_v3 = vld [vmem:[%s249_s7 + $0x2c] sm:$0xf] (%p52_p3) }
  0x11   : > { %v266_v1 = vld [vmem:[%s249_s7 + $0x24] sm:$0xff]  ;;  %265 = vst [vmem:[%s243_s8] sm:$0xff] %v264_v0 }
  0x12   : > { %267 = vst [vmem:[%s243_s8 + $0xc] sm:$0xff] %v266_v1 }
  0x13   : > { %839 = vst [vmem:[%s243_s8 + $0x8] sm:$0xf] %v838_v2 }
  0x14   : > { %841 = vst [vmem:[%s243_s8 + $0x14] sm:$0xf] %v840_v3 }
  0x15 PF: > { %p842_p6 = scmp.ge.s32.totalorder %s1078_s22, 1  ;;  %p296_p7 = scmp.lt.s32.totalorder %s1078_s22, 4 }
  0x17   : > { %p297_p8 = pnand %p842_p6, %p296_p7 }
  0x18   : > { %s303_s9 = sand.u32 (!%p297_p8), 1, %s1062_s18   ;;  %s357_s10 = smul.u32 (!%p297_p8), 48, %s1070_s20 }
  0x19   : > { %300 = sbr.rel (%p297_p8) target bundleno = 235 (0xeb), region = 62  ;;  %p844_p10 = scmp.ne.s32.totalorder (!%p297_p8), %s1070_s20, 0 }
  0x1a   : > { %s996_s11 = smul.u32 (!%p297_p8), 24, %s303_s9  ;;  %p358_p9 = scmp.lt.s32.totalorder (!%p297_p8), %s357_s10, 143 }
  0x1c   : > { %s1163_s16 = scalar_lea.vmem (!%p297_p8), [#allocation3], %s996_s11 }
  0x1e   : > { %s1237_s10 = smov (!%p358_p9, %s357_s10), 143  ;;  %393 = sbr.rel (%p844_p10) target bundleno = 38 (0x26), region = 70 }
  0x1f   : > { %s843_s12 = sshll.u32 %s1237_s10, 2 }
  0x20   : > { %s1161_s15 = scalar_lea.vmem %s1225_s1, %s843_s12 }
  0x23   : > { %v1080_v4 = vmov 0.0  }
  0x24   : > { %394 = vst [vmem:[#allocation2] sm:$0xff] %v1080_v4 }
  0x25   : > { %395 = vst [vmem:[#allocation2 + $0x8] sm:$0xff] %v1080_v4 }
  0x26 PF: > { %v969_v5 = vld [vmem:[%s1161_s15 + $0x38] sm:$0xff]  ;;  %v968_v8 = vld [vmem:[%s1161_s15 + $0x30] sm:$0xff]  ;;  %v967_v11 = vld [vmem:[%s1161_s15 + $0x28] sm:$0xff]  ;;  %p953_p11 = scmp.ne.s32.totalorder %s1070_s20, 2 }
  0x27   : > { %v977_v6 = vld [vmem:[%s1161_s15 + $0x78] sm:$0xff]  ;;  %610 = vmatpush.bf16.msra.mxu0 %v969_v5  ;;  %v976_v9 = vld [vmem:[%s1161_s15 + $0x70] sm:$0xff]  ;;  %v975_v12 = vld [vmem:[%s1161_s15 + $0x68] sm:$0xff] }
  0x28   : > { %v985_v7 = vld [vmem:[%s1161_s15 + $0xb8] sm:$0xff]  ;;  %624 = vmatpush.bf16.msra.mxu1 %v977_v6  ;;  %v984_v10 = vld [vmem:[%s1161_s15 + $0xb0] sm:$0xff]  ;;  %v983_v13 = vld [vmem:[%s1161_s15 + $0xa8] sm:$0xff] }
  0x29   : > { %638 = vmatpush.bf16.msra.mxu2 %v985_v7  ;;  %v966_v14 = vld [vmem:[%s1161_s15 + $0x20] sm:$0xff]  ;;  %v965_v17 = vld [vmem:[%s1161_s15 + $0x18] sm:$0xff]  ;;  %v964_v20 = vld [vmem:[%s1161_s15 + $0x10] sm:$0xff] }
  0x2a   : > { %v974_v15 = vld [vmem:[%s1161_s15 + $0x60] sm:$0xff]  ;;  %v973_v18 = vld [vmem:[%s1161_s15 + $0x58] sm:$0xff]  ;;  %v972_v21 = vld [vmem:[%s1161_s15 + $0x50] sm:$0xff] }
  0x2b   : > { %611 = vmatpush.bf16.msra.mxu0 %v968_v8  ;;  %v982_v16 = vld [vmem:[%s1161_s15 + $0xa0] sm:$0xff]  ;;  %v981_v19 = vld [vmem:[%s1161_s15 + $0x98] sm:$0xff]  ;;  %v980_v22 = vld [vmem:[%s1161_s15 + $0x90] sm:$0xff] }
  0x2c   : > { %625 = vmatpush.bf16.msra.mxu1 %v976_v9  ;;  %v963_v23 = vld [vmem:[%s1161_s15 + $0x8] sm:$0xff]  ;;  %v962_v26 = vld [vmem:[%s1161_s15] sm:$0xff]  ;;  %v960_v29 = vld [vmem:[%s1163_s16 + $0x8] sm:$0xf0] }
  0x2d   : > { %639 = vmatpush.bf16.msra.mxu2 %v984_v10  ;;  %v971_v24 = vld [vmem:[%s1161_s15 + $0x48] sm:$0xff]  ;;  %v970_v27 = vld [vmem:[%s1161_s15 + $0x40] sm:$0xff]  ;;  %v855_v33 = vld [vmem:[%s1163_s16 + $0x8] sm:$0xf] }
  0x2e   : > { %v979_v25 = vld [vmem:[%s1161_s15 + $0x88] sm:$0xff]  ;;  %v849_v31 = vld [vmem:[%s1163_s16 + $0xc] sm:$0xf0]  ;;  %v961_v34 = vld [vmem:[%s1163_s16 + $0x10] sm:$0xf0] }
  0x2f   : > { %612 = vmatpush.bf16.msra.mxu0 %v967_v11  ;;  %v847_v28 = vld [vmem:[%s1163_s16] sm:$0xf]  ;;  %v959_v30 = vld [vmem:[%s1163_s16 + $0x4] sm:$0xf]  ;;  %v978_v32 = vld [vmem:[%s1161_s15 + $0x80] sm:$0xff]  ;;  %v856_v37 = vor.u32 %v961_v34, %v855_v33 }
  0x30   : > { %626 = vmatpush.bf16.msra.mxu1 %v975_v12  ;;  %v848_v35 = vor.u32 %v960_v29, %v847_v28  ;;  %v852_v36 = vor.u32 %v959_v30, %v849_v31  ;;  %v396_v41 = vld [vmem:[#allocation2] sm:$0xff]  ;;  %v397_v48 = vld [vmem:[#allocation2 + $0x8] sm:$0xff] }
  0x31   : > { %640 = vmatpush.bf16.msra.mxu2 %v983_v13 }
  0x33   : > { %613 = vmatpush.bf16.msra.mxu0 %v966_v14 }
  0x34   : > { %627 = vmatpush.bf16.msra.mxu1 %v974_v15 }
  0x35   : > { %641 = vmatpush.bf16.msra.mxu2 %v982_v16 }
  0x37   : > { %614 = vmatpush.bf16.msra.mxu0 %v965_v17 }
  0x38   : > { %628 = vmatpush.bf16.msra.mxu1 %v973_v18 }
  0x39   : > { %642 = vmatpush.bf16.msra.mxu2 %v981_v19 }
  0x3b   : > { %615 = vmatpush.bf16.msra.mxu0 %v964_v20 }
  0x3c   : > { %629 = vmatpush.bf16.msra.mxu1 %v972_v21 }
  0x3d   : > { %643 = vmatpush.bf16.msra.mxu2 %v980_v22 }
  0x3f   : > { %616 = vmatpush.bf16.msra.mxu0 %v963_v23 }
  0x40   : > { %630 = vmatpush.bf16.msra.mxu1 %v971_v24 }
  0x41   : > { %644 = vmatpush.bf16.msra.mxu2 %v979_v25 }
  0x43   : > { %617 = vmatpush.bf16.msra.mxu0 %v962_v26 }
  0x44   : > { %631 = vmatpush.bf16.msra.mxu1 %v970_v27 }
  0x45   : > { %645 = vmatpush.bf16.msra.mxu2 %v978_v32 }
  0x46   : > { %618 = vmatmul.bf16.vlgmr.msra.gmra.mxu0 %v848_v35 }
  0x47   : > { %632 = vmatmul.bf16.vlgmr.msra.gmra.mxu1 %v852_v36 }
  0x48   : > { %646 = vmatmul.bf16.vlgmr.msra.gmra.mxu2 %v856_v37 }
  0xc3   : > { %v619_v38 = vpop.f32.mrf.mxu0 }
  0xc4   : > { %v633_v39 = vpop.f32.mrf.mxu1 }
  0xc5   : > { %v634_v40 = vadd.f32 %v633_v39, %v619_v38 }
  0xcb   : > { %v647_v42 = vpop.f32.mrf.mxu2  ;;  %v621_v45 = vpop.f32.mrf.mxu0 }
  0xcc   : > { %v648_v43 = vadd.f32 %v647_v42, %v634_v40  ;;  %v635_v46 = vpop.f32.mrf.mxu1 }
  0xcd   : > { %v636_v47 = vadd.f32 %v635_v46, %v621_v45 }
  0xce   : > { %v652_v44 = vadd.f32 %v648_v43, %v396_v41 }
  0xd0   : > { %654 = vst [vmem:[#allocation2] sm:$0xff] %v652_v44 }
  0xd3   : > { %v649_v49 = vpop.f32.mrf.mxu2 }
  0xd4   : > { %v650_v50 = vadd.f32 %v649_v49, %v636_v47  ;;  %659 = sbr.rel (%p953_p11) target bundleno = 235 (0xeb), region = 74 }
  0xd6   : > { %v653_v51 = vadd.f32 %v650_v50, %v397_v48 }
  0xd8   : > { %655 = vst [vmem:[#allocation2 + $0x8] sm:$0xff] %v653_v51 }
  0xd9   : > { %v660_v52 = vld [vmem:[#allocation2] sm:$0xff] }
  0xda   : > { %v1038_v54 = vld [vmem:[%s1226_s2] ss:$0 sm:$0xff] }
  0xdb   : > { %v1039_v55 = vld [vmem:[%s1227_s3] ss:$0 sm:$0xff]  ;;  %v666_v57 = vmul.f32 %v1038_v54, %v660_v52 }
  0xdc   : > { %v987_v56 = vld [vmem:[%s1228_s4] sm:$0xff]  }
  0xdd   : > { %v988_v59 = vunpack.c.l.bf16 %v987_v56  ;;  %v989_v60 = vunpack.c.h.bf16 %v987_v56  ;;  %v672_v61 = vadd.f32 %v1039_v55, %v666_v57 }
  0xdf   : > { %v661_v53 = vld [vmem:[#allocation2 + $0x8] sm:$0xff]  ;;  %v678_v63 = vadd.f32 %v988_v59, %v672_v61 }
  0xe0   : > { %v667_v58 = vmul.f32 %v1038_v54, %v661_v53 }
  0xe1   : > { %v680_v1 = vmax.f32 %v678_v63, 0.0 }
  0xe2   : > { %v673_v62 = vadd.f32 %v1039_v55, %v667_v58 }
  0xe4   : > { %v679_v0 = vadd.f32 %v989_v60, %v673_v62 }
  0xe6   : > { %v681_v2 = vmax.f32 %v679_v0, 0.0 }
  0xe8   : > { %v993_v3 = vpack.c.bf16 %v681_v2, %v680_v1 }
  0xea   : > { %994 = vst [vmem:[%s1229_s5] sm:$0xff] %v993_v3  }
  0xeb PF: > { %s15_s22 = sadd.s32 1, %s1078_s22   ;;  %s1230_s18 = smov %s1066_s19 }
  0xec   : > { %p12_p12 = scmp.ge.s32.totalorder %s15_s22, 5   ;;  %s1231_s19 = smov %s1146_s26 }
  0xed   : > { %s1232_s20 = smov %s1074_s21  ;;  %s1233_s21 = smov %s1235_s23 }
  0xee   :  { %14 = sbr.rel (!%p12_p12) target bundleno = 3 (0x3), region = 127 }

// kernel: gvb_resnet_forward.43
= control target key start
LH: loop header
LB: loop body
LE: loop exit
PB: predicated region body
PF: predicated region fallthrough
CT: control target
= control target key end

     0   :  { %vm262_vm0 = vcmask 1041409   ;;  %vm264_vm1 = vcmask 1042434   ;;  %vm266_vm2 = vcmask 1043459   ;;  %vm268_vm3 = vcmask 1044484   ;;  %s899_s1 = inlined_call_operand.vmem [shape: bf16[128,256], index: 1, kind: input, shape index: {}]   ;;  %s900_s0 = inlined_call_operand.vmem [shape: bf16[16,16,128], index: 0, kind: input, shape index: {}]   ;;  %s901_s2 = inlined_call_operand.vmem [shape: f32[1,256], index: 2, kind: input, shape index: {}]   ;;  %s902_s4 = inlined_call_operand.vmem [shape: f32[16,128], index: 4, kind: output, shape index: {1}]   ;;  %s903_s3 = inlined_call_operand.vmem [shape: f32[16,128], index: 3, kind: output, shape index: {0}]  }
   0x1   :  { %v465_v0 = vld [vmem:[%s899_s1 + $0x70] sm:$0xf]  ;;  %v486_v1 = vld [vmem:[%s899_s1 + $0x74] sm:$0xf0]  ;;  %v485_v2 = vld [vmem:[%s899_s1 + $0x74] sm:$0xf] }
   0x2   :  { %v466_v3 = vor.u32 %v486_v1, %v465_v0  ;;  %v467_v4 = vld [vmem:[%s899_s1 + $0x78] sm:$0xf0]  ;;  %v457_v5 = vld [vmem:[%s899_s1 + $0x60] sm:$0xf]  ;;  %v484_v6 = vld [vmem:[%s899_s1 + $0x64] sm:$0xf0] }
   0x3   :  { %v470_v7 = vor.u32 %v485_v2, %v467_v4  ;;  %v483_v8 = vld [vmem:[%s899_s1 + $0x64] sm:$0xf]  ;;  %v459_v9 = vld [vmem:[%s899_s1 + $0x68] sm:$0xf0]  ;;  %v458_v10 = vor.u32 %v484_v6, %v457_v5  ;;  %v449_v11 = vld [vmem:[%s899_s1 + $0x50] sm:$0xf] }
   0x4   :  { %365 = vmatpush.bf16.msra.mxu0 %v466_v3  ;;  %v462_v12 = vor.u32 %v483_v8, %v459_v9  ;;  %v482_v13 = vld [vmem:[%s899_s1 + $0x54] sm:$0xf0]  ;;  %v481_v14 = vld [vmem:[%s899_s1 + $0x54] sm:$0xf]  ;;  %v451_v15 = vld [vmem:[%s899_s1 + $0x58] sm:$0xf0] }
   0x5   :  { %379 = vmatpush.bf16.msra.mxu1 %v470_v7  ;;  %v441_v16 = vld [vmem:[%s899_s1 + $0x40] sm:$0xf]  ;;  %v480_v17 = vld [vmem:[%s899_s1 + $0x44] sm:$0xf0]  ;;  %v636_v18 = vld [vmem:[%s899_s1 + $0x44] sm:$0xf]  ;;  %v450_v25 = vor.u32 %v482_v13, %v449_v11  ;;  %v454_v29 = vor.u32 %v481_v14, %v451_v15 }
   0x6   :  { %v443_v19 = vld [vmem:[%s899_s1 + $0x48] sm:$0xf0]  ;;  %v644_v20 = vld [vmem:[%s899_s1 + $0x30] sm:$0xf]  ;;  %v649_v21 = vld [vmem:[%s899_s1 + $0x34] sm:$0xf0]  ;;  %v442_v36 = vor.u32 %v480_v17, %v441_v16 }
   0x7   :  { %v654_v22 = vld [vmem:[%s899_s1 + $0x34] sm:$0xf]  ;;  %v659_v23 = vld [vmem:[%s899_s1 + $0x38] sm:$0xf0]  ;;  %v664_v24 = vld [vmem:[%s899_s1 + $0x20] sm:$0xf]  ;;  %v446_v37 = vor.u32 %v636_v18, %v443_v19  ;;  %v434_v38 = vor.u32 %v649_v21, %v644_v20 }
   0x8   :  { %366 = vmatpush.bf16.msra.mxu0 %v458_v10  ;;  %v669_v26 = vld [vmem:[%s899_s1 + $0x24] sm:$0xf0]  ;;  %v674_v27 = vld [vmem:[%s899_s1 + $0x24] sm:$0xf]  ;;  %v679_v28 = vld [vmem:[%s899_s1 + $0x28] sm:$0xf0]  ;;  %v438_v39 = vor.u32 %v654_v22, %v659_v23 }
   0x9   :  { %380 = vmatpush.bf16.msra.mxu1 %v462_v12  ;;  %v684_v30 = vld [vmem:[%s899_s1 + $0x10] sm:$0xf]  ;;  %v689_v31 = vld [vmem:[%s899_s1 + $0x14] sm:$0xf0]  ;;  %v694_v32 = vld [vmem:[%s899_s1 + $0x14] sm:$0xf]  ;;  %v426_v43 = vor.u32 %v669_v26, %v664_v24  ;;  %v430_v44 = vor.u32 %v674_v27, %v679_v28 }
   0xa   :  { %v699_v33 = vld [vmem:[%s899_s1 + $0x18] sm:$0xf0]  ;;  %v704_v34 = vld [vmem:[%s899_s1] sm:$0xf]  ;;  %v709_v35 = vld [vmem:[%s899_s1 + $0x4] sm:$0xf0]  ;;  %v418_v45 = vor.u32 %v689_v31, %v684_v30 }
   0xb   :  { %v719_v40 = vld [vmem:[%s899_s1 + $0x4] sm:$0xf]  ;;  %v724_v41 = vld [vmem:[%s899_s1 + $0x8] sm:$0xf0]  ;;  %v422_v46 = vor.u32 %v694_v32, %v699_v33  ;;  %v552_v48 = vld [vmem:[%s900_s0 + $0x10] sm:$0xff]   ;;  %v410_v50 = vor.u32 %v709_v35, %v704_v34  ;;  %vm270_vm4 = vcmask 1045509  }
   0xc   :  { %v488_v42 = vld [vmem:[%s900_s0] sm:$0xff]   ;;  %367 = vmatpush.bf16.msra.mxu0 %v450_v25  ;;  %v551_v47 = vld [vmem:[%s900_s0 + $0x8] sm:$0xff]   ;;  %v553_v49 = vld [vmem:[%s900_s0 + $0x18] sm:$0xff]   ;;  %v414_v51 = vor.u32 %v719_v40, %v724_v41  ;;  %v497_v59 = vunpack.c.l.bf16 %v552_v48  ;;  %v498_v60 = vunpack.c.h.bf16 %v552_v48  ;;  %vm272_vm5 = vcmask 1046534  }
   0xd   :  { %381 = vmatpush.bf16.msra.mxu1 %v454_v29  ;;  %v489_v52 = vunpack.c.l.bf16 %v488_v42  ;;  %v490_v53 = vunpack.c.h.bf16 %v488_v42  ;;  %v554_v54 = vld [vmem:[%s900_s0 + $0x20] sm:$0xff]   ;;  %v555_v55 = vld [vmem:[%s900_s0 + $0x28] sm:$0xff]   ;;  %v556_v56 = vld [vmem:[%s900_s0 + $0x30] sm:$0xff]   ;;  %v493_v57 = vunpack.c.l.bf16 %v551_v47  ;;  %v494_v58 = vunpack.c.h.bf16 %v551_v47 }
   0xe   :  { %v557_v61 = vld [vmem:[%s900_s0 + $0x38] sm:$0xff]   ;;  %v765_v62 = vld [vmem:[%s900_s0 + $0x40] sm:$0xff]   ;;  %v501_v63 = vunpack.c.l.bf16 %v553_v49  ;;  %v502_v0 = vunpack.c.h.bf16 %v553_v49  ;;  %v505_v1 = vunpack.c.l.bf16 %v554_v54  ;;  %v506_v2 = vunpack.c.h.bf16 %v554_v54  ;;  %v770_v3 = vld [vmem:[%s900_s0 + $0x48] sm:$0xff]  }
   0xf   :  { %v775_v4 = vld [vmem:[%s900_s0 + $0x50] sm:$0xff]   ;;  %v509_v5 = vunpack.c.l.bf16 %v555_v55  ;;  %v510_v6 = vunpack.c.h.bf16 %v555_v55  ;;  %v513_v7 = vunpack.c.l.bf16 %v556_v56  ;;  %v514_v8 = vunpack.c.h.bf16 %v556_v56  ;;  %v780_v9 = vld [vmem:[%s900_s0 + $0x58] sm:$0xff]   ;;  %v785_v10 = vld [vmem:[%s900_s0 + $0x60] sm:$0xff]  }
  0x10   :  { %368 = vmatpush.bf16.msra.mxu0 %v442_v36  ;;  %v517_v11 = vunpack.c.l.bf16 %v557_v61  ;;  %v518_v12 = vunpack.c.h.bf16 %v557_v61  ;;  %v521_v13 = vunpack.c.l.bf16 %v765_v62  ;;  %v522_v14 = vunpack.c.h.bf16 %v765_v62  ;;  %v792_v15 = vld [vmem:[%s900_s0 + $0x68] sm:$0xff]   ;;  %v564_v27 = vld [vmem:[%s900_s0 + $0x70] sm:$0xff]  }
  0x11   :  { %382 = vmatpush.bf16.msra.mxu1 %v446_v37  ;;  %v525_v16 = vunpack.c.l.bf16 %v770_v3  ;;  %v526_v17 = vunpack.c.h.bf16 %v770_v3  ;;  %v529_v18 = vunpack.c.l.bf16 %v775_v4  ;;  %v530_v19 = vunpack.c.h.bf16 %v775_v4 }
  0x12   :  { %v541_v25 = vunpack.c.l.bf16 %v792_v15  ;;  %v542_v29 = vunpack.c.h.bf16 %v792_v15  ;;  %v80_v36 = vadd.f32 %v490_v53, %v489_v52  ;;  %v87_v37 = vadd.f32 %v494_v58, %v493_v57 }
  0x13   :  { %v94_v42 = vadd.f32 %v498_v60, %v497_v59  ;;  %v101_v47 = vadd.f32 %v502_v0, %v501_v63  ;;  %v108_v48 = vadd.f32 %v506_v2, %v505_v1  ;;  %v115_v49 = vadd.f32 %v510_v6, %v509_v5 }
  0x14   :  { %369 = vmatpush.bf16.msra.mxu0 %v434_v38  ;;  %v81_v54 = vrot.slane %v80_v36, 4  ;;  %v88_v55 = vrot.slane %v87_v37, 4  ;;  %v122_v56 = vadd.f32 %v514_v8, %v513_v7  ;;  %v129_v61 = vadd.f32 %v518_v12, %v517_v11  ;;  %v565_v8 = vld [vmem:[%s900_s0 + $0x78] sm:$0xff]  }
  0x15   :  { %383 = vmatpush.bf16.msra.mxu1 %v438_v39  ;;  %v95_v21 = vrot.slane %v94_v42, 4  ;;  %v102_v22 = vrot.slane %v101_v47, 4  ;;  %v109_v20 = vrot.slane %v108_v48, 4  ;;  %v116_v23 = vrot.slane %v115_v49, 4 }
  0x16   :  { %v82_v38 = vadd.f32 %v81_v54, %v80_v36  ;;  %v89_v52 = vadd.f32 %v88_v55, %v87_v37  ;;  %v123_v53 = vrot.slane %v122_v56, 4  ;;  %v130_v39 = vrot.slane %v129_v61, 4 }
  0x17   :  { %v96_v57 = vadd.f32 %v95_v21, %v94_v42  ;;  %v103_v58 = vadd.f32 %v102_v22, %v101_v47  ;;  %v110_v59 = vadd.f32 %v109_v20, %v108_v48  ;;  %v117_v60 = vadd.f32 %v116_v23, %v115_v49 }
  0x18   :  { %370 = vmatpush.bf16.msra.mxu0 %v426_v43  ;;  %v83_v63 = vrot.slane %v82_v38, 2  ;;  %v90_v0 = vrot.slane %v89_v52, 2  ;;  %v124_v1 = vadd.f32 %v123_v53, %v122_v56  ;;  %v131_v2 = vadd.f32 %v130_v39, %v129_v61 }
  0x19   :  { %384 = vmatpush.bf16.msra.mxu1 %v430_v44  ;;  %v97_v5 = vrot.slane %v96_v57, 2  ;;  %v104_v6 = vrot.slane %v103_v58, 2  ;;  %v111_v24 = vrot.slane %v110_v59, 2  ;;  %v118_v26 = vrot.slane %v117_v60, 2 }
  0x1a   :  { %v84_v28 = vadd.f32 %v83_v63, %v82_v38  ;;  %v91_v43 = vadd.f32 %v90_v0, %v89_v52  ;;  %v125_v44 = vrot.slane %v124_v1, 2  ;;  %v132_v7 = vrot.slane %v131_v2, 2 }
  0x1b   :  { %v98_v11 = vadd.f32 %v97_v5, %v96_v57  ;;  %v105_v12 = vadd.f32 %v104_v6, %v103_v58  ;;  %v822_v30 = vadd.f32 %v111_v24, %v110_v59  ;;  %v824_v31 = vadd.f32 %v118_v26, %v117_v60 }
  0x1c   :  { %371 = vmatpush.bf16.msra.mxu0 %v418_v45  ;;  %v85_v45 = vrot.slane %v84_v28, 1  ;;  %v92_v20 = vrot.slane %v91_v43, 1  ;;  %v826_v21 = vadd.f32 %v125_v44, %v124_v1  ;;  %v828_v22 = vadd.f32 %v132_v7, %v131_v2 }
  0x1d   :  { %385 = vmatpush.bf16.msra.mxu1 %v422_v46  ;;  %v545_v23 = vunpack.c.l.bf16 %v564_v27  ;;  %v546_v36 = vunpack.c.h.bf16 %v564_v27  ;;  %v99_v32 = vrot.slane %v98_v11, 1  ;;  %v106_v33 = vrot.slane %v105_v12, 1 }
  0x1e   :  { %v549_v46 = vunpack.c.l.bf16 %v565_v8  ;;  %v550_v37 = vunpack.c.h.bf16 %v565_v8  ;;  %v113_v42 = vrot.slane %v822_v30, 1  ;;  %v120_v47 = vrot.slane %v824_v31, 1 }
  0x1f   :  { %v838_v48 = vadd.f32 %v85_v45, %v84_v28  ;;  %v840_v49 = vadd.f32 %v92_v20, %v91_v43  ;;  %v127_v54 = vrot.slane %v826_v21, 1  ;;  %v134_v55 = vrot.slane %v828_v22, 1 }
  0x20   :  { %372 = vmatpush.bf16.msra.mxu0 %v410_v50  ;;  %v844_v34 = vadd.f32 %v99_v32, %v98_v11  ;;  %v846_v35 = vadd.f32 %v106_v33, %v105_v12  ;;  %v136_v50 = vadd.f32 %v522_v14, %v521_v13  ;;  %v143_v40 = vadd.f32 %v526_v17, %v525_v16 }
  0x21   :  { %386 = vmatpush.bf16.msra.mxu1 %v414_v51  ;;  %v150_v41 = vadd.f32 %v530_v19, %v529_v18  ;;  %v904_v51 = vunpack.c.l.bf16 %v780_v9  ;;  %v905_v56 = vunpack.c.h.bf16 %v780_v9  ;;  %v906_v38 = vunpack.c.l.bf16 %v785_v10 }
  0x22   :  { %v907_v62 = vunpack.c.h.bf16 %v785_v10  ;;  %v171_v3 = vadd.f32 %v542_v29, %v541_v25  ;;  %v137_v14 = vrot.slane %v136_v50, 4  ;;  %v144_v16 = vrot.slane %v143_v40, 4 }
  0x23   :  { %v157_v61 = vadd.f32 %v905_v56, %v904_v51  ;;  %v178_v17 = vadd.f32 %v546_v36, %v545_v23  ;;  %v185_v4 = vadd.f32 %v550_v37, %v549_v46  ;;  %v151_v18 = vrot.slane %v150_v41, 4 }
  0x24   :  { %v164_v13 = vadd.f32 %v907_v62, %v906_v38  ;;  %v172_v53 = vrot.slane %v171_v3, 4  ;;  %v138_v9 = vadd.f32 %v137_v14, %v136_v50  ;;  %v145_v39 = vadd.f32 %v144_v16, %v143_v40 }
  0x25   :  { %v158_v19 = vrot.slane %v157_v61, 4  ;;  %v179_v57 = vrot.slane %v178_v17, 4  ;;  %v186_v58 = vrot.slane %v185_v4, 4  ;;  %v152_v59 = vadd.f32 %v151_v18, %v150_v41 }
  0x26   :  { %v165_v52 = vrot.slane %v164_v13, 4  ;;  %v173_v63 = vadd.f32 %v172_v53, %v171_v3  ;;  %v139_v0 = vrot.slane %v138_v9, 2  ;;  %v146_v1 = vrot.slane %v145_v39, 2 }
  0x27   :  { %v159_v10 = vadd.f32 %v158_v19, %v157_v61  ;;  %v180_v15 = vadd.f32 %v179_v57, %v178_v17  ;;  %v187_v25 = vadd.f32 %v186_v58, %v185_v4  ;;  %v153_v29 = vrot.slane %v152_v59, 2 }
  0x28   :  { %v166_v60 = vadd.f32 %v165_v52, %v164_v13  ;;  %v174_v6 = vrot.slane %v173_v63, 2  ;;  %v140_v24 = vadd.f32 %v139_v0, %v138_v9  ;;  %v147_v26 = vadd.f32 %v146_v1, %v145_v39 }
  0x29   :  { %v160_v2 = vrot.slane %v159_v10, 2  ;;  %v181_v27 = vrot.slane %v180_v15, 2  ;;  %v188_v28 = vrot.slane %v187_v25, 2  ;;  %v154_v43 = vadd.f32 %v153_v29, %v152_v59 }
  0x2a   :  { %v167_v5 = vrot.slane %v166_v60, 2  ;;  %v175_v8 = vadd.f32 %v174_v6, %v173_v63  ;;  %v141_v11 = vrot.slane %v140_v24, 1  ;;  %v148_v12 = vrot.slane %v147_v26, 1 }
  0x2b   :  { %v161_v44 = vadd.f32 %v160_v2, %v159_v10  ;;  %v182_v45 = vadd.f32 %v181_v27, %v180_v15  ;;  %v189_v20 = vadd.f32 %v188_v28, %v187_v25  ;;  %v155_v23 = vrot.slane %v154_v43, 1 }
  0x2c   :  { %v168_v7 = vadd.f32 %v167_v5, %v166_v60  ;;  %v176_v33 = vrot.slane %v175_v8, 1  ;;  %v142_v46 = vadd.f32 %v141_v11, %v140_v24  ;;  %v149_v37 = vadd.f32 %v148_v12, %v147_v26 }
  0x2d   :  { %v162_v36 = vrot.slane %v161_v44, 1  ;;  %v183_v50 = vrot.slane %v182_v45, 1  ;;  %v190_v40 = vrot.slane %v189_v20, 1  ;;  %v114_v41 = vadd.f32 %v113_v42, %v822_v30 }
  0x2e   :  { %v169_v32 = vrot.slane %v168_v7, 1  ;;  %v121_v51 = vadd.f32 %v120_v47, %v824_v31  ;;  %v128_v56 = vadd.f32 %v127_v54, %v826_v21  ;;  %v156_v61 = vadd.f32 %v155_v23, %v154_v43 }
  0x2f   :  { %v135_v38 = vadd.f32 %v134_v55, %v828_v22  ;;  %v163_v62 = vadd.f32 %v162_v36, %v161_v44  ;;  %v177_v3 = vadd.f32 %v176_v33, %v175_v8  ;;  %v184_v14 = vadd.f32 %v183_v50, %v182_v45  ;;  %v224_v36 = vld [vmem:[%s901_s2] sm:$0x3] }
  0x30   :  { %v170_v13 = vadd.f32 %v169_v32, %v168_v7  ;;  %v191_v16 = vadd.f32 %v190_v40, %v189_v20  ;;  %v192_v17 = vpack.c.bf16 %v838_v48, %v838_v48  ;;  %v193_v4 = vpack.c.bf16 %v840_v49, %v840_v49 }
  0x31   :  { %v194_v30 = vpack.c.bf16 %v844_v34, %v844_v34  ;;  %v195_v31 = vpack.c.bf16 %v846_v35, %v846_v35  ;;  %v200_v21 = vpack.c.bf16 %v142_v46, %v142_v46  ;;  %v201_v42 = vpack.c.bf16 %v149_v37, %v149_v37 }
  0x32   :  { %v196_v22 = vpack.c.bf16 %v114_v41, %v114_v41  ;;  %v197_v47 = vpack.c.bf16 %v121_v51, %v121_v51  ;;  %v198_v54 = vpack.c.bf16 %v128_v56, %v128_v56  ;;  %v202_v55 = vpack.c.bf16 %v156_v61, %v156_v61 }
  0x33   :  { %v199_v18 = vpack.c.bf16 %v135_v38, %v135_v38  ;;  %v203_v19 = vpack.c.bf16 %v163_v62, %v163_v62  ;;  %v204_v52 = vpack.c.bf16 %v170_v13, %v170_v13  ;;  %v205_v53 = vpack.c.bf16 %v177_v3, %v177_v3 }
  0x34   :  { %v206_v48 = vpack.c.bf16 %v184_v14, %v184_v14  ;;  %v207_v9 = vpack.c.bf16 %v191_v16, %v191_v16  ;;  %v246_v39 = vunpack.c.l.b16 %v192_v17  ;;  %v247_v49 = vunpack.c.l.b16 %v193_v4 }
  0x35   :  { %v248_v57 = vunpack.c.l.b16 %v194_v30  ;;  %v249_v58 = vunpack.c.l.b16 %v195_v31  ;;  %v254_v34 = vunpack.c.l.b16 %v200_v21  ;;  %v255_v59 = vunpack.c.l.b16 %v201_v42 }
  0x36   :  { %v250_v10 = vunpack.c.l.b16 %v196_v22  ;;  %v251_v35 = vunpack.c.l.b16 %v197_v47  ;;  %v252_v60 = vunpack.c.l.b16 %v198_v54  ;;  %v256_v63 = vunpack.c.l.b16 %v202_v55 }
  0x37   :  { %v253_v0 = vunpack.c.l.b16 %v199_v18  ;;  %v257_v1 = vunpack.c.l.b16 %v203_v19  ;;  %v258_v15 = vunpack.c.l.b16 %v204_v52  ;;  %v263_v25 = vsel %vm262_vm0, %v247_v49, %v246_v39 }
  0x38   :  { %v259_v29 = vunpack.c.l.b16 %v205_v53  ;;  %v265_v2 = vsel %vm264_vm1, %v248_v57, %v263_v25  ;;  %v276_v5 = vsel %vm262_vm0, %v255_v59, %v254_v34  ;;  %v260_v6 = vunpack.c.l.b16 %v206_v48 }
  0x39   :  { %v267_v24 = vsel %vm266_vm2, %v249_v58, %v265_v2  ;;  %v277_v26 = vsel %vm264_vm1, %v256_v63, %v276_v5  ;;  %v261_v27 = vunpack.c.l.b16 %v207_v9  ;;  %vm274_vm6 = vcmask 1047559  }
  0x3a   :  { %v269_v28 = vsel %vm268_vm3, %v250_v10, %v267_v24  ;;  %v278_v43 = vsel %vm266_vm2, %v257_v1, %v277_v26  ;;  %v226_v32 = vperm.slane %v224_v36, 0  ;;  %v227_v33 = vperm.slane %v224_v36, 1 }
  0x3b   :  { %v271_v44 = vsel %vm270_vm4, %v251_v35, %v269_v28  ;;  %v279_v7 = vsel %vm268_vm3, %v258_v15, %v278_v43 }
  0x3c   :  { %v273_v8 = vsel %vm272_vm5, %v252_v60, %v271_v44  ;;  %v280_v11 = vsel %vm270_vm4, %v259_v29, %v279_v7 }
  0x3d   :  { %v275_v12 = vsel %vm274_vm6, %v253_v0, %v273_v8  ;;  %v281_v45 = vsel %vm272_vm5, %v260_v6, %v280_v11 }
  0x3e   :  { %v282_v20 = vsel %vm274_vm6, %v261_v27, %v281_v45 }
  0x3f   :  { %v283_v23 = vpack.c.b16 %v282_v20, %v275_v12 }
  0x41   :  { %373 = vmatmul.bf16.vlgmr.msra.gmra.mxu0 %v283_v23  ;;  %387 = vmatmul.bf16.vlgmr.msra.gmra.mxu1 %v283_v23 }
  0xbe   :  { %v374_v46 = vpop.f32.mrf.mxu0  ;;  %v388_v37 = vpop.f32.mrf.mxu1 }
  0xbf   :  { %v375_v50 = vadd.f32 %v374_v46, %v226_v32  ;;  %v389_v40 = vadd.f32 %v388_v37, %v227_v33 }
  0xc1   :  { %v393_v41 = vsub.f32 %v375_v50, %v389_v40  ;;  %397 = vst [vmem:[%s902_s4] sm:$0xff] %v389_v40 }
  0xc3   :  { %395 = vst [vmem:[%s903_s3] sm:$0xff] %v393_v41 }
  0xc6   :  { %v376_v51 = vpop.f32.mrf.mxu0  ;;  %v390_v56 = vpop.f32.mrf.mxu1 }
  0xc7   :  { %v377_v61 = vadd.f32 %v376_v51, %v226_v32  ;;  %v391_v38 = vadd.f32 %v390_v56, %v227_v33 }
  0xc9   :  { %v394_v62 = vsub.f32 %v377_v61, %v391_v38  ;;  %398 = vst [vmem:[%s902_s4 + $0x8] sm:$0xff] %v391_v38 }
  0xcb   :  { %396 = vst [vmem:[%s903_s3 + $0x8] sm:$0xff] %v394_v62 }

</bundles_post_ra>
